<compile_context>
chip_gen: v5e
topology: v5e:2x2
jax: 0.10.0
libtpu: 0.0.40
codegen_flags: <defaults>
</compile_context>

<pallas_src>
import jax
import jax.numpy as jnp
from jax.experimental import pallas as pl
from jax.experimental.pallas import tpu as pltpu

EPS = 1e-5
KTAP = 5  # Conv1d kernel size of all three conv layers.


# ----------------------------- Pallas kernel ------------------------------- #

def _conv_bn_relu(h, w_ref, b_ref):
    """One sample, one conv layer (valid, stride 1) with folded BN + ReLU.

    h:     (L, Cin) f32, channels-last
    w_ref: (KTAP*Cin, Cout) VMEM ref, BN scale folded in
    b_ref: (1, Cout)        VMEM ref, bias + BN shift folded in
    returns (Lout, Cout)
    """
    L = h.shape[0]
    Lout = L - KTAP + 1
    # im2col: column block k holds the k-shifted window -> (Lout, KTAP*Cin).
    win = jnp.concatenate([h[k:k + Lout, :] for k in range(KTAP)], axis=1)
    y = jnp.dot(win, w_ref[...], preferred_element_type=jnp.float32) + b_ref[...]
    return jnp.maximum(y, 0.0)


def fused_kernel(x_ref,
                 w1_ref, b1_ref, w2_ref, b2_ref, w3_ref, b3_ref,
                 fw1_ref, fb1_ref, fw2_ref, fb2_ref, fw3_ref, fb3_ref,
                 out_ref):
    """x: (B, 6, 60) -> out: (B, 4), everything in VMEM, one invocation."""
    B = x_ref.shape[0]

    flats = []
    for bi in range(B):  # static unroll: B is small (2)
        h = x_ref[bi].astype(jnp.float32).T            # (60, 6)  (length, chan)
        h = _conv_bn_relu(h, w1_ref, b1_ref)           # (56, 12)
        h = _conv_bn_relu(h, w2_ref, b2_ref)           # (52, 24)
        h = _conv_bn_relu(h, w3_ref, b3_ref)           # (48, 48) = (pos l, chan c)
        # Flatten to a lane-dense (1, 2304) row.  The order r = l*48 + c is
        # folded into fw1 at init time, so no transpose back to torch order.
        Lf = h.shape[0]
        flat = jnp.concatenate([h[l:l + 1, :] for l in range(Lf)], axis=1)
        flats.append(flat)

    # Merge per-sample rows into (B, 2304) via broadcast + row-select so the
    # fc1 weight is streamed through the MXU only once for the whole batch.
    F = flats[0].shape[1]
    row = jax.lax.broadcasted_iota(jnp.int32, (B, F), 0)
    flat_all = jnp.broadcast_to(flats[0], (B, F))
    for bi in range(1, B):
        flat_all = jnp.where(row == bi, jnp.broadcast_to(flats[bi], (B, F)),
                             flat_all)

    h = jnp.dot(flat_all, fw1_ref[...],
                preferred_element_type=jnp.float32) + fb1_ref[...]
    h = jnp.maximum(h, 0.0)                            # fc1 + folded norm4 + relu
    # TODO(synk): Dropout(p=0.1) is the identity (eval-mode forward, no RNG mask).
    h = jnp.dot(h, fw2_ref[...],
                preferred_element_type=jnp.float32) + fb2_ref[...]
    h = jnp.maximum(h, 0.0)                            # fc2 + folded norm5 + relu
    out_ref[...] = jnp.dot(h, fw3_ref[...],
                           preferred_element_type=jnp.float32) + fb3_ref[...]


# ------------------------------ JAX wrapper -------------------------------- #

@jax.jit
def cnn_norm_dropout_forward(x, p):
    B = x.shape[0]
    inputs = (
        x.astype(jnp.float32),
        p['w1'], p['b1'], p['w2'], p['b2'], p['w3'], p['b3'],
        p['fw1'], p['fb1'], p['fw2'], p['fb2'], p['fw3'], p['fb3'],
    )
    return pl.pallas_call(
        fused_kernel,
        out_shape=jax.ShapeDtypeStruct((B, 4), jnp.float32),
        in_specs=[pl.BlockSpec(memory_space=pltpu.MemorySpace.VMEM)
                  for _ in inputs],
        out_specs=pl.BlockSpec(memory_space=pltpu.MemorySpace.VMEM),
    )(*inputs)


# ----------------------- Deterministic parameter init ---------------------- #

def _fold_conv(w, b, scale, shift):
    """PyTorch conv (Cout, Cin, K) + BN -> (K*Cin, Cout) weight, (1, Cout) bias."""
    cout, cin, k = w.shape
    wf = (w * scale[:, None, None]).transpose(2, 1, 0).reshape(k * cin, cout)
    bf = (scale * b + shift).reshape(1, cout)
    return wf, bf


def init_params(key):
    ks = iter(jax.random.split(key, 32))

    def conv_layer(cout, cin, k):
        bound = 1.0 / jnp.sqrt(float(cin * k))
        w = jax.random.uniform(next(ks), (cout, cin, k), jnp.float32, -bound, bound)
        b = jax.random.uniform(next(ks), (cout,), jnp.float32, -bound, bound)
        return w, b

    def fc_layer(out_f, in_f):
        bound = 1.0 / jnp.sqrt(float(in_f))
        w = jax.random.uniform(next(ks), (out_f, in_f), jnp.float32, -bound, bound)
        b = jax.random.uniform(next(ks), (out_f,), jnp.float32, -bound, bound)
        return w, b

    def bn_layer(c):
        gamma = jax.random.uniform(next(ks), (c,), jnp.float32, 0.5, 1.5)
        beta = 0.1 * jax.random.normal(next(ks), (c,), jnp.float32)
        mean = 0.1 * jax.random.normal(next(ks), (c,), jnp.float32)
        var = jax.random.uniform(next(ks), (c,), jnp.float32, 0.5, 1.5)
        scale = gamma / jnp.sqrt(var + EPS)
        shift = beta - mean * scale
        return (gamma, beta, mean, var), scale, shift

    raw = {}
    raw['w1'], raw['b1'] = conv_layer(12, 6, KTAP)
    raw['bn1'], s1, t1 = bn_layer(12)
    raw['w2'], raw['b2'] = conv_layer(24, 12, KTAP)
    raw['bn2'], s2, t2 = bn_layer(24)
    raw['w3'], raw['b3'] = conv_layer(48, 24, KTAP)
    raw['bn3'], s3, t3 = bn_layer(48)
    raw['fw1'], raw['fb1'] = fc_layer(256, 48 * 48)
    raw['bn4'], s4, t4 = bn_layer(256)
    raw['fw2'], raw['fb2'] = fc_layer(64, 256)
    raw['bn5'], s5, t5 = bn_layer(64)
    raw['fw3'], raw['fb3'] = fc_layer(4, 64)

    kp = {}
    kp['w1'], kp['b1'] = _fold_conv(raw['w1'], raw['b1'], s1, t1)
    kp['w2'], kp['b2'] = _fold_conv(raw['w2'], raw['b2'], s2, t2)
    kp['w3'], kp['b3'] = _fold_conv(raw['w3'], raw['b3'], s3, t3)

    # fc1: fold norm4 AND the kernel's flatten order.  Kernel flat index is
    # r = l*48 + c (position-major); PyTorch flat index is c*48 + l.
    fw1_s = raw['fw1'] * s4[:, None]                       # (256, 2304)
    kp['fw1'] = fw1_s.reshape(256, 48, 48).transpose(2, 1, 0).reshape(48 * 48, 256)
    kp['fb1'] = (s4 * raw['fb1'] + t4).reshape(1, -1)

    # fc2: fold norm5.
    kp['fw2'] = (raw['fw2'] * s5[:, None]).T               # (256, 64)
    kp['fb2'] = (s5 * raw['fb2'] + t5).reshape(1, -1)

    # fc3: plain linear.
    kp['fw3'] = raw['fw3'].T                               # (64, 4)
    kp['fb3'] = raw['fb3'].reshape(1, -1)

    return raw, kp


# ------------------------------ JAX reference ------------------------------ #

def reference_forward(x, raw):
    x = x.astype(jnp.float32)

    def conv(h, w, b):
        y = jax.lax.conv_general_dilated(
            h, w, window_strides=(1,), padding='VALID',
            dimension_numbers=('NCH', 'OIH', 'NCH'),
            precision=jax.lax.Precision.HIGHEST)
        return y + b[None, :, None]

    def bn_c(h, stats):
        g, be, m, v = stats
        return (h - m[None, :, None]) * (g / jnp.sqrt(v + EPS))[None, :, None] \
            + be[None, :, None]

    def bn_f(h, stats):
        g, be, m, v = stats
        return (h - m) * (g / jnp.sqrt(v + EPS)) + be

    h = jax.nn.relu(bn_c(conv(x, raw['w1'], raw['b1']), raw['bn1']))
    h = jax.nn.relu(bn_c(conv(h, raw['w2'], raw['b2']), raw['bn2']))
    h = jax.nn.relu(bn_c(conv(h, raw['w3'], raw['b3']), raw['bn3']))
    h = h.reshape(h.shape[0], -1)
    mm = lambda a, b: jnp.dot(a, b, precision=jax.lax.Precision.HIGHEST)
    h = jax.nn.relu(bn_f(mm(h, raw['fw1'].T) + raw['fb1'], raw['bn4']))
    h = jax.nn.relu(bn_f(mm(h, raw['fw2'].T) + raw['fb2'], raw['bn5']))
    return mm(h, raw['fw3'].T) + raw['fb3']


# ---------------------------------- main ----------------------------------- #

if __name__ == "__main__":
    key = jax.random.PRNGKey(0)
    k_x, k_p = jax.random.split(key)

    # Input length 60: 60 -> 56 -> 52 -> 48 after three valid 5-tap convs, so
    # the flatten yields exactly 48 channels * 48 positions = 2304 features.
    x = jax.random.normal(k_x, (2, 6, 60), dtype=jnp.float32)
    raw_params, kernel_params = init_params(k_p)

    out = cnn_norm_dropout_forward(x, kernel_params)
    out = jax.block_until_ready(out)
    assert out.shape == (2, 4), out.shape

    ref = reference_forward(x, raw_params)
    assert jnp.allclose(out, ref, atol=2e-3, rtol=2e-3), (
        float(jnp.max(jnp.abs(out - ref))))

    print("KERNEL_OK")
</pallas_src>

<mosaic_0001>
module attributes {stable_mosaic.version = 11 : i64} {
  func.func @fused_kernel(%arg0: memref<2x6x60xf32, #tpu.memory_space<vmem>>, %arg1: memref<30x12xf32, #tpu.memory_space<vmem>>, %arg2: memref<1x12xf32, #tpu.memory_space<vmem>>, %arg3: memref<60x24xf32, #tpu.memory_space<vmem>>, %arg4: memref<1x24xf32, #tpu.memory_space<vmem>>, %arg5: memref<120x48xf32, #tpu.memory_space<vmem>>, %arg6: memref<1x48xf32, #tpu.memory_space<vmem>>, %arg7: memref<2304x256xf32, #tpu.memory_space<vmem>>, %arg8: memref<1x256xf32, #tpu.memory_space<vmem>>, %arg9: memref<256x64xf32, #tpu.memory_space<vmem>>, %arg10: memref<1x64xf32, #tpu.memory_space<vmem>>, %arg11: memref<64x4xf32, #tpu.memory_space<vmem>>, %arg12: memref<1x4xf32, #tpu.memory_space<vmem>>, %arg13: memref<2x4xf32, #tpu.memory_space<vmem>>) attributes {dimension_semantics = [], scalar_prefetch = 0 : i64, scratch_operands = 0 : i64, tpu.core_type = #tpu.core_type<tc>} {
    %c0 = arith.constant 0 : index
    %c0_0 = arith.constant 0 : index
    %c0_1 = arith.constant 0 : index
    %0 = vector.load %arg0[%c0, %c0_0, %c0_1] : memref<2x6x60xf32, #tpu.memory_space<vmem>>, vector<1x6x60xf32>
    %1 = vector.shape_cast %0 : vector<1x6x60xf32> to vector<6x60xf32>
    %2 = tpu.transpose %1, [1, 0] : vector<6x60xf32> -> vector<60x6xf32>
    %3 = vector.extract_strided_slice %2 {offsets = [0, 0], sizes = [56, 6], strides = [1, 1]} : vector<60x6xf32> to vector<56x6xf32>
    %4 = vector.extract_strided_slice %2 {offsets = [1, 0], sizes = [56, 6], strides = [1, 1]} : vector<60x6xf32> to vector<56x6xf32>
    %5 = vector.extract_strided_slice %2 {offsets = [2, 0], sizes = [56, 6], strides = [1, 1]} : vector<60x6xf32> to vector<56x6xf32>
    %6 = vector.extract_strided_slice %2 {offsets = [3, 0], sizes = [56, 6], strides = [1, 1]} : vector<60x6xf32> to vector<56x6xf32>
    %7 = vector.extract_strided_slice %2 {offsets = [4, 0], sizes = [56, 6], strides = [1, 1]} : vector<60x6xf32> to vector<56x6xf32>
    %8 = tpu.concatenate %3, %4, %5, %6, %7 in 1 : vector<56x6xf32>, vector<56x6xf32>, vector<56x6xf32>, vector<56x6xf32>, vector<56x6xf32> -> vector<56x30xf32>
    %c0_2 = arith.constant 0 : index
    %c0_3 = arith.constant 0 : index
    %9 = vector.load %arg1[%c0_2, %c0_3] : memref<30x12xf32, #tpu.memory_space<vmem>>, vector<30x12xf32>
    %cst = arith.constant dense<0.000000e+00> : vector<56x12xf32>
    %10 = tpu.matmul %8, %9, %cst {dimension_numbers = #tpu.dot_dimension_numbers<[1], [0], [0], [1], [0, 0, 1, 1], [], []>} : vector<56x30xf32>, vector<30x12xf32>, vector<56x12xf32> -> vector<56x12xf32>
    %c0_4 = arith.constant 0 : index
    %c0_5 = arith.constant 0 : index
    %11 = vector.load %arg2[%c0_4, %c0_5] : memref<1x12xf32, #tpu.memory_space<vmem>>, vector<1x12xf32>
    %12 = vector.broadcast %11 : vector<1x12xf32> to vector<56x12xf32>
    %13 = arith.addf %10, %12 : vector<56x12xf32>
    %cst_6 = arith.constant 0.000000e+00 : f32
    %14 = vector.broadcast %cst_6 : f32 to vector<56x12xf32>
    %15 = arith.maximumf %13, %14 : vector<56x12xf32>
    %16 = vector.extract_strided_slice %15 {offsets = [0, 0], sizes = [52, 12], strides = [1, 1]} : vector<56x12xf32> to vector<52x12xf32>
    %17 = vector.extract_strided_slice %15 {offsets = [1, 0], sizes = [52, 12], strides = [1, 1]} : vector<56x12xf32> to vector<52x12xf32>
    %18 = vector.extract_strided_slice %15 {offsets = [2, 0], sizes = [52, 12], strides = [1, 1]} : vector<56x12xf32> to vector<52x12xf32>
    %19 = vector.extract_strided_slice %15 {offsets = [3, 0], sizes = [52, 12], strides = [1, 1]} : vector<56x12xf32> to vector<52x12xf32>
    %20 = vector.extract_strided_slice %15 {offsets = [4, 0], sizes = [52, 12], strides = [1, 1]} : vector<56x12xf32> to vector<52x12xf32>
    %21 = tpu.concatenate %16, %17, %18, %19, %20 in 1 : vector<52x12xf32>, vector<52x12xf32>, vector<52x12xf32>, vector<52x12xf32>, vector<52x12xf32> -> vector<52x60xf32>
    %c0_7 = arith.constant 0 : index
    %c0_8 = arith.constant 0 : index
    %22 = vector.load %arg3[%c0_7, %c0_8] : memref<60x24xf32, #tpu.memory_space<vmem>>, vector<60x24xf32>
    %cst_9 = arith.constant dense<0.000000e+00> : vector<52x24xf32>
    %23 = tpu.matmul %21, %22, %cst_9 {dimension_numbers = #tpu.dot_dimension_numbers<[1], [0], [0], [1], [0, 0, 1, 1], [], []>} : vector<52x60xf32>, vector<60x24xf32>, vector<52x24xf32> -> vector<52x24xf32>
    %c0_10 = arith.constant 0 : index
    %c0_11 = arith.constant 0 : index
    %24 = vector.load %arg4[%c0_10, %c0_11] : memref<1x24xf32, #tpu.memory_space<vmem>>, vector<1x24xf32>
    %25 = vector.broadcast %24 : vector<1x24xf32> to vector<52x24xf32>
    %26 = arith.addf %23, %25 : vector<52x24xf32>
    %cst_12 = arith.constant 0.000000e+00 : f32
    %27 = vector.broadcast %cst_12 : f32 to vector<52x24xf32>
    %28 = arith.maximumf %26, %27 : vector<52x24xf32>
    %29 = vector.extract_strided_slice %28 {offsets = [0, 0], sizes = [48, 24], strides = [1, 1]} : vector<52x24xf32> to vector<48x24xf32>
    %30 = vector.extract_strided_slice %28 {offsets = [1, 0], sizes = [48, 24], strides = [1, 1]} : vector<52x24xf32> to vector<48x24xf32>
    %31 = vector.extract_strided_slice %28 {offsets = [2, 0], sizes = [48, 24], strides = [1, 1]} : vector<52x24xf32> to vector<48x24xf32>
    %32 = vector.extract_strided_slice %28 {offsets = [3, 0], sizes = [48, 24], strides = [1, 1]} : vector<52x24xf32> to vector<48x24xf32>
    %33 = vector.extract_strided_slice %28 {offsets = [4, 0], sizes = [48, 24], strides = [1, 1]} : vector<52x24xf32> to vector<48x24xf32>
    %34 = tpu.concatenate %29, %30, %31, %32, %33 in 1 : vector<48x24xf32>, vector<48x24xf32>, vector<48x24xf32>, vector<48x24xf32>, vector<48x24xf32> -> vector<48x120xf32>
    %c0_13 = arith.constant 0 : index
    %c0_14 = arith.constant 0 : index
    %35 = vector.load %arg5[%c0_13, %c0_14] : memref<120x48xf32, #tpu.memory_space<vmem>>, vector<120x48xf32>
    %cst_15 = arith.constant dense<0.000000e+00> : vector<48x48xf32>
    %36 = tpu.matmul %34, %35, %cst_15 {dimension_numbers = #tpu.dot_dimension_numbers<[1], [0], [0], [1], [0, 0, 1, 1], [], []>} : vector<48x120xf32>, vector<120x48xf32>, vector<48x48xf32> -> vector<48x48xf32>
    %c0_16 = arith.constant 0 : index
    %c0_17 = arith.constant 0 : index
    %37 = vector.load %arg6[%c0_16, %c0_17] : memref<1x48xf32, #tpu.memory_space<vmem>>, vector<1x48xf32>
    %38 = vector.broadcast %37 : vector<1x48xf32> to vector<48x48xf32>
    %39 = arith.addf %36, %38 : vector<48x48xf32>
    %cst_18 = arith.constant 0.000000e+00 : f32
    %40 = vector.broadcast %cst_18 : f32 to vector<48x48xf32>
    %41 = arith.maximumf %39, %40 : vector<48x48xf32>
    %42 = vector.extract_strided_slice %41 {offsets = [0, 0], sizes = [1, 48], strides = [1, 1]} : vector<48x48xf32> to vector<1x48xf32>
    %43 = vector.extract_strided_slice %41 {offsets = [1, 0], sizes = [1, 48], strides = [1, 1]} : vector<48x48xf32> to vector<1x48xf32>
    %44 = vector.extract_strided_slice %41 {offsets = [2, 0], sizes = [1, 48], strides = [1, 1]} : vector<48x48xf32> to vector<1x48xf32>
    %45 = vector.extract_strided_slice %41 {offsets = [3, 0], sizes = [1, 48], strides = [1, 1]} : vector<48x48xf32> to vector<1x48xf32>
    %46 = vector.extract_strided_slice %41 {offsets = [4, 0], sizes = [1, 48], strides = [1, 1]} : vector<48x48xf32> to vector<1x48xf32>
    %47 = vector.extract_strided_slice %41 {offsets = [5, 0], sizes = [1, 48], strides = [1, 1]} : vector<48x48xf32> to vector<1x48xf32>
    %48 = vector.extract_strided_slice %41 {offsets = [6, 0], sizes = [1, 48], strides = [1, 1]} : vector<48x48xf32> to vector<1x48xf32>
    %49 = vector.extract_strided_slice %41 {offsets = [7, 0], sizes = [1, 48], strides = [1, 1]} : vector<48x48xf32> to vector<1x48xf32>
    %50 = vector.extract_strided_slice %41 {offsets = [8, 0], sizes = [1, 48], strides = [1, 1]} : vector<48x48xf32> to vector<1x48xf32>
    %51 = vector.extract_strided_slice %41 {offsets = [9, 0], sizes = [1, 48], strides = [1, 1]} : vector<48x48xf32> to vector<1x48xf32>
    %52 = vector.extract_strided_slice %41 {offsets = [10, 0], sizes = [1, 48], strides = [1, 1]} : vector<48x48xf32> to vector<1x48xf32>
    %53 = vector.extract_strided_slice %41 {offsets = [11, 0], sizes = [1, 48], strides = [1, 1]} : vector<48x48xf32> to vector<1x48xf32>
    %54 = vector.extract_strided_slice %41 {offsets = [12, 0], sizes = [1, 48], strides = [1, 1]} : vector<48x48xf32> to vector<1x48xf32>
    %55 = vector.extract_strided_slice %41 {offsets = [13, 0], sizes = [1, 48], strides = [1, 1]} : vector<48x48xf32> to vector<1x48xf32>
    %56 = vector.extract_strided_slice %41 {offsets = [14, 0], sizes = [1, 48], strides = [1, 1]} : vector<48x48xf32> to vector<1x48xf32>
    %57 = vector.extract_strided_slice %41 {offsets = [15, 0], sizes = [1, 48], strides = [1, 1]} : vector<48x48xf32> to vector<1x48xf32>
    %58 = vector.extract_strided_slice %41 {offsets = [16, 0], sizes = [1, 48], strides = [1, 1]} : vector<48x48xf32> to vector<1x48xf32>
    %59 = vector.extract_strided_slice %41 {offsets = [17, 0], sizes = [1, 48], strides = [1, 1]} : vector<48x48xf32> to vector<1x48xf32>
    %60 = vector.extract_strided_slice %41 {offsets = [18, 0], sizes = [1, 48], strides = [1, 1]} : vector<48x48xf32> to vector<1x48xf32>
    %61 = vector.extract_strided_slice %41 {offsets = [19, 0], sizes = [1, 48], strides = [1, 1]} : vector<48x48xf32> to vector<1x48xf32>
    %62 = vector.extract_strided_slice %41 {offsets = [20, 0], sizes = [1, 48], strides = [1, 1]} : vector<48x48xf32> to vector<1x48xf32>
    %63 = vector.extract_strided_slice %41 {offsets = [21, 0], sizes = [1, 48], strides = [1, 1]} : vector<48x48xf32> to vector<1x48xf32>
    %64 = vector.extract_strided_slice %41 {offsets = [22, 0], sizes = [1, 48], strides = [1, 1]} : vector<48x48xf32> to vector<1x48xf32>
    %65 = vector.extract_strided_slice %41 {offsets = [23, 0], sizes = [1, 48], strides = [1, 1]} : vector<48x48xf32> to vector<1x48xf32>
    %66 = vector.extract_strided_slice %41 {offsets = [24, 0], sizes = [1, 48], strides = [1, 1]} : vector<48x48xf32> to vector<1x48xf32>
    %67 = vector.extract_strided_slice %41 {offsets = [25, 0], sizes = [1, 48], strides = [1, 1]} : vector<48x48xf32> to vector<1x48xf32>
    %68 = vector.extract_strided_slice %41 {offsets = [26, 0], sizes = [1, 48], strides = [1, 1]} : vector<48x48xf32> to vector<1x48xf32>
    %69 = vector.extract_strided_slice %41 {offsets = [27, 0], sizes = [1, 48], strides = [1, 1]} : vector<48x48xf32> to vector<1x48xf32>
    %70 = vector.extract_strided_slice %41 {offsets = [28, 0], sizes = [1, 48], strides = [1, 1]} : vector<48x48xf32> to vector<1x48xf32>
    %71 = vector.extract_strided_slice %41 {offsets = [29, 0], sizes = [1, 48], strides = [1, 1]} : vector<48x48xf32> to vector<1x48xf32>
    %72 = vector.extract_strided_slice %41 {offsets = [30, 0], sizes = [1, 48], strides = [1, 1]} : vector<48x48xf32> to vector<1x48xf32>
    %73 = vector.extract_strided_slice %41 {offsets = [31, 0], sizes = [1, 48], strides = [1, 1]} : vector<48x48xf32> to vector<1x48xf32>
    %74 = vector.extract_strided_slice %41 {offsets = [32, 0], sizes = [1, 48], strides = [1, 1]} : vector<48x48xf32> to vector<1x48xf32>
    %75 = vector.extract_strided_slice %41 {offsets = [33, 0], sizes = [1, 48], strides = [1, 1]} : vector<48x48xf32> to vector<1x48xf32>
    %76 = vector.extract_strided_slice %41 {offsets = [34, 0], sizes = [1, 48], strides = [1, 1]} : vector<48x48xf32> to vector<1x48xf32>
    %77 = vector.extract_strided_slice %41 {offsets = [35, 0], sizes = [1, 48], strides = [1, 1]} : vector<48x48xf32> to vector<1x48xf32>
    %78 = vector.extract_strided_slice %41 {offsets = [36, 0], sizes = [1, 48], strides = [1, 1]} : vector<48x48xf32> to vector<1x48xf32>
    %79 = vector.extract_strided_slice %41 {offsets = [37, 0], sizes = [1, 48], strides = [1, 1]} : vector<48x48xf32> to vector<1x48xf32>
    %80 = vector.extract_strided_slice %41 {offsets = [38, 0], sizes = [1, 48], strides = [1, 1]} : vector<48x48xf32> to vector<1x48xf32>
    %81 = vector.extract_strided_slice %41 {offsets = [39, 0], sizes = [1, 48], strides = [1, 1]} : vector<48x48xf32> to vector<1x48xf32>
    %82 = vector.extract_strided_slice %41 {offsets = [40, 0], sizes = [1, 48], strides = [1, 1]} : vector<48x48xf32> to vector<1x48xf32>
    %83 = vector.extract_strided_slice %41 {offsets = [41, 0], sizes = [1, 48], strides = [1, 1]} : vector<48x48xf32> to vector<1x48xf32>
    %84 = vector.extract_strided_slice %41 {offsets = [42, 0], sizes = [1, 48], strides = [1, 1]} : vector<48x48xf32> to vector<1x48xf32>
    %85 = vector.extract_strided_slice %41 {offsets = [43, 0], sizes = [1, 48], strides = [1, 1]} : vector<48x48xf32> to vector<1x48xf32>
    %86 = vector.extract_strided_slice %41 {offsets = [44, 0], sizes = [1, 48], strides = [1, 1]} : vector<48x48xf32> to vector<1x48xf32>
    %87 = vector.extract_strided_slice %41 {offsets = [45, 0], sizes = [1, 48], strides = [1, 1]} : vector<48x48xf32> to vector<1x48xf32>
    %88 = vector.extract_strided_slice %41 {offsets = [46, 0], sizes = [1, 48], strides = [1, 1]} : vector<48x48xf32> to vector<1x48xf32>
    %89 = vector.extract_strided_slice %41 {offsets = [47, 0], sizes = [1, 48], strides = [1, 1]} : vector<48x48xf32> to vector<1x48xf32>
    %90 = tpu.concatenate %42, %43, %44, %45, %46, %47, %48, %49, %50, %51, %52, %53, %54, %55, %56, %57 in 1 : vector<1x48xf32>, vector<1x48xf32>, vector<1x48xf32>, vector<1x48xf32>, vector<1x48xf32>, vector<1x48xf32>, vector<1x48xf32>, vector<1x48xf32>, vector<1x48xf32>, vector<1x48xf32>, vector<1x48xf32>, vector<1x48xf32>, vector<1x48xf32>, vector<1x48xf32>, vector<1x48xf32>, vector<1x48xf32> -> vector<1x768xf32>
    %91 = tpu.concatenate %58, %59, %60, %61, %62, %63, %64, %65, %66, %67, %68, %69, %70, %71, %72, %73 in 1 : vector<1x48xf32>, vector<1x48xf32>, vector<1x48xf32>, vector<1x48xf32>, vector<1x48xf32>, vector<1x48xf32>, vector<1x48xf32>, vector<1x48xf32>, vector<1x48xf32>, vector<1x48xf32>, vector<1x48xf32>, vector<1x48xf32>, vector<1x48xf32>, vector<1x48xf32>, vector<1x48xf32>, vector<1x48xf32> -> vector<1x768xf32>
    %92 = tpu.concatenate %74, %75, %76, %77, %78, %79, %80, %81, %82, %83, %84, %85, %86, %87, %88, %89 in 1 : vector<1x48xf32>, vector<1x48xf32>, vector<1x48xf32>, vector<1x48xf32>, vector<1x48xf32>, vector<1x48xf32>, vector<1x48xf32>, vector<1x48xf32>, vector<1x48xf32>, vector<1x48xf32>, vector<1x48xf32>, vector<1x48xf32>, vector<1x48xf32>, vector<1x48xf32>, vector<1x48xf32>, vector<1x48xf32> -> vector<1x768xf32>
    %93 = tpu.concatenate %90, %91, %92 in 1 : vector<1x768xf32>, vector<1x768xf32>, vector<1x768xf32> -> vector<1x2304xf32>
    %c1 = arith.constant 1 : index
    %c0_19 = arith.constant 0 : index
    %c0_20 = arith.constant 0 : index
    %94 = vector.load %arg0[%c1, %c0_19, %c0_20] : memref<2x6x60xf32, #tpu.memory_space<vmem>>, vector<1x6x60xf32>
    %95 = vector.shape_cast %94 : vector<1x6x60xf32> to vector<6x60xf32>
    %96 = tpu.transpose %95, [1, 0] : vector<6x60xf32> -> vector<60x6xf32>
    %97 = vector.extract_strided_slice %96 {offsets = [0, 0], sizes = [56, 6], strides = [1, 1]} : vector<60x6xf32> to vector<56x6xf32>
    %98 = vector.extract_strided_slice %96 {offsets = [1, 0], sizes = [56, 6], strides = [1, 1]} : vector<60x6xf32> to vector<56x6xf32>
    %99 = vector.extract_strided_slice %96 {offsets = [2, 0], sizes = [56, 6], strides = [1, 1]} : vector<60x6xf32> to vector<56x6xf32>
    %100 = vector.extract_strided_slice %96 {offsets = [3, 0], sizes = [56, 6], strides = [1, 1]} : vector<60x6xf32> to vector<56x6xf32>
    %101 = vector.extract_strided_slice %96 {offsets = [4, 0], sizes = [56, 6], strides = [1, 1]} : vector<60x6xf32> to vector<56x6xf32>
    %102 = tpu.concatenate %97, %98, %99, %100, %101 in 1 : vector<56x6xf32>, vector<56x6xf32>, vector<56x6xf32>, vector<56x6xf32>, vector<56x6xf32> -> vector<56x30xf32>
    %c0_21 = arith.constant 0 : index
    %c0_22 = arith.constant 0 : index
    %103 = vector.load %arg1[%c0_21, %c0_22] : memref<30x12xf32, #tpu.memory_space<vmem>>, vector<30x12xf32>
    %cst_23 = arith.constant dense<0.000000e+00> : vector<56x12xf32>
    %104 = tpu.matmul %102, %103, %cst_23 {dimension_numbers = #tpu.dot_dimension_numbers<[1], [0], [0], [1], [0, 0, 1, 1], [], []>} : vector<56x30xf32>, vector<30x12xf32>, vector<56x12xf32> -> vector<56x12xf32>
    %c0_24 = arith.constant 0 : index
    %c0_25 = arith.constant 0 : index
    %105 = vector.load %arg2[%c0_24, %c0_25] : memref<1x12xf32, #tpu.memory_space<vmem>>, vector<1x12xf32>
    %106 = vector.broadcast %105 : vector<1x12xf32> to vector<56x12xf32>
    %107 = arith.addf %104, %106 : vector<56x12xf32>
    %cst_26 = arith.constant 0.000000e+00 : f32
    %108 = vector.broadcast %cst_26 : f32 to vector<56x12xf32>
    %109 = arith.maximumf %107, %108 : vector<56x12xf32>
    %110 = vector.extract_strided_slice %109 {offsets = [0, 0], sizes = [52, 12], strides = [1, 1]} : vector<56x12xf32> to vector<52x12xf32>
    %111 = vector.extract_strided_slice %109 {offsets = [1, 0], sizes = [52, 12], strides = [1, 1]} : vector<56x12xf32> to vector<52x12xf32>
    %112 = vector.extract_strided_slice %109 {offsets = [2, 0], sizes = [52, 12], strides = [1, 1]} : vector<56x12xf32> to vector<52x12xf32>
    %113 = vector.extract_strided_slice %109 {offsets = [3, 0], sizes = [52, 12], strides = [1, 1]} : vector<56x12xf32> to vector<52x12xf32>
    %114 = vector.extract_strided_slice %109 {offsets = [4, 0], sizes = [52, 12], strides = [1, 1]} : vector<56x12xf32> to vector<52x12xf32>
    %115 = tpu.concatenate %110, %111, %112, %113, %114 in 1 : vector<52x12xf32>, vector<52x12xf32>, vector<52x12xf32>, vector<52x12xf32>, vector<52x12xf32> -> vector<52x60xf32>
    %c0_27 = arith.constant 0 : index
    %c0_28 = arith.constant 0 : index
    %116 = vector.load %arg3[%c0_27, %c0_28] : memref<60x24xf32, #tpu.memory_space<vmem>>, vector<60x24xf32>
    %cst_29 = arith.constant dense<0.000000e+00> : vector<52x24xf32>
    %117 = tpu.matmul %115, %116, %cst_29 {dimension_numbers = #tpu.dot_dimension_numbers<[1], [0], [0], [1], [0, 0, 1, 1], [], []>} : vector<52x60xf32>, vector<60x24xf32>, vector<52x24xf32> -> vector<52x24xf32>
    %c0_30 = arith.constant 0 : index
    %c0_31 = arith.constant 0 : index
    %118 = vector.load %arg4[%c0_30, %c0_31] : memref<1x24xf32, #tpu.memory_space<vmem>>, vector<1x24xf32>
    %119 = vector.broadcast %118 : vector<1x24xf32> to vector<52x24xf32>
    %120 = arith.addf %117, %119 : vector<52x24xf32>
    %cst_32 = arith.constant 0.000000e+00 : f32
    %121 = vector.broadcast %cst_32 : f32 to vector<52x24xf32>
    %122 = arith.maximumf %120, %121 : vector<52x24xf32>
    %123 = vector.extract_strided_slice %122 {offsets = [0, 0], sizes = [48, 24], strides = [1, 1]} : vector<52x24xf32> to vector<48x24xf32>
    %124 = vector.extract_strided_slice %122 {offsets = [1, 0], sizes = [48, 24], strides = [1, 1]} : vector<52x24xf32> to vector<48x24xf32>
    %125 = vector.extract_strided_slice %122 {offsets = [2, 0], sizes = [48, 24], strides = [1, 1]} : vector<52x24xf32> to vector<48x24xf32>
    %126 = vector.extract_strided_slice %122 {offsets = [3, 0], sizes = [48, 24], strides = [1, 1]} : vector<52x24xf32> to vector<48x24xf32>
    %127 = vector.extract_strided_slice %122 {offsets = [4, 0], sizes = [48, 24], strides = [1, 1]} : vector<52x24xf32> to vector<48x24xf32>
    %128 = tpu.concatenate %123, %124, %125, %126, %127 in 1 : vector<48x24xf32>, vector<48x24xf32>, vector<48x24xf32>, vector<48x24xf32>, vector<48x24xf32> -> vector<48x120xf32>
    %c0_33 = arith.constant 0 : index
    %c0_34 = arith.constant 0 : index
    %129 = vector.load %arg5[%c0_33, %c0_34] : memref<120x48xf32, #tpu.memory_space<vmem>>, vector<120x48xf32>
    %cst_35 = arith.constant dense<0.000000e+00> : vector<48x48xf32>
    %130 = tpu.matmul %128, %129, %cst_35 {dimension_numbers = #tpu.dot_dimension_numbers<[1], [0], [0], [1], [0, 0, 1, 1], [], []>} : vector<48x120xf32>, vector<120x48xf32>, vector<48x48xf32> -> vector<48x48xf32>
    %c0_36 = arith.constant 0 : index
    %c0_37 = arith.constant 0 : index
    %131 = vector.load %arg6[%c0_36, %c0_37] : memref<1x48xf32, #tpu.memory_space<vmem>>, vector<1x48xf32>
    %132 = vector.broadcast %131 : vector<1x48xf32> to vector<48x48xf32>
    %133 = arith.addf %130, %132 : vector<48x48xf32>
    %cst_38 = arith.constant 0.000000e+00 : f32
    %134 = vector.broadcast %cst_38 : f32 to vector<48x48xf32>
    %135 = arith.maximumf %133, %134 : vector<48x48xf32>
    %136 = vector.extract_strided_slice %135 {offsets = [0, 0], sizes = [1, 48], strides = [1, 1]} : vector<48x48xf32> to vector<1x48xf32>
    %137 = vector.extract_strided_slice %135 {offsets = [1, 0], sizes = [1, 48], strides = [1, 1]} : vector<48x48xf32> to vector<1x48xf32>
    %138 = vector.extract_strided_slice %135 {offsets = [2, 0], sizes = [1, 48], strides = [1, 1]} : vector<48x48xf32> to vector<1x48xf32>
    %139 = vector.extract_strided_slice %135 {offsets = [3, 0], sizes = [1, 48], strides = [1, 1]} : vector<48x48xf32> to vector<1x48xf32>
    %140 = vector.extract_strided_slice %135 {offsets = [4, 0], sizes = [1, 48], strides = [1, 1]} : vector<48x48xf32> to vector<1x48xf32>
    %141 = vector.extract_strided_slice %135 {offsets = [5, 0], sizes = [1, 48], strides = [1, 1]} : vector<48x48xf32> to vector<1x48xf32>
    %142 = vector.extract_strided_slice %135 {offsets = [6, 0], sizes = [1, 48], strides = [1, 1]} : vector<48x48xf32> to vector<1x48xf32>
    %143 = vector.extract_strided_slice %135 {offsets = [7, 0], sizes = [1, 48], strides = [1, 1]} : vector<48x48xf32> to vector<1x48xf32>
    %144 = vector.extract_strided_slice %135 {offsets = [8, 0], sizes = [1, 48], strides = [1, 1]} : vector<48x48xf32> to vector<1x48xf32>
    %145 = vector.extract_strided_slice %135 {offsets = [9, 0], sizes = [1, 48], strides = [1, 1]} : vector<48x48xf32> to vector<1x48xf32>
    %146 = vector.extract_strided_slice %135 {offsets = [10, 0], sizes = [1, 48], strides = [1, 1]} : vector<48x48xf32> to vector<1x48xf32>
    %147 = vector.extract_strided_slice %135 {offsets = [11, 0], sizes = [1, 48], strides = [1, 1]} : vector<48x48xf32> to vector<1x48xf32>
    %148 = vector.extract_strided_slice %135 {offsets = [12, 0], sizes = [1, 48], strides = [1, 1]} : vector<48x48xf32> to vector<1x48xf32>
    %149 = vector.extract_strided_slice %135 {offsets = [13, 0], sizes = [1, 48], strides = [1, 1]} : vector<48x48xf32> to vector<1x48xf32>
    %150 = vector.extract_strided_slice %135 {offsets = [14, 0], sizes = [1, 48], strides = [1, 1]} : vector<48x48xf32> to vector<1x48xf32>
    %151 = vector.extract_strided_slice %135 {offsets = [15, 0], sizes = [1, 48], strides = [1, 1]} : vector<48x48xf32> to vector<1x48xf32>
    %152 = vector.extract_strided_slice %135 {offsets = [16, 0], sizes = [1, 48], strides = [1, 1]} : vector<48x48xf32> to vector<1x48xf32>
    %153 = vector.extract_strided_slice %135 {offsets = [17, 0], sizes = [1, 48], strides = [1, 1]} : vector<48x48xf32> to vector<1x48xf32>
    %154 = vector.extract_strided_slice %135 {offsets = [18, 0], sizes = [1, 48], strides = [1, 1]} : vector<48x48xf32> to vector<1x48xf32>
    %155 = vector.extract_strided_slice %135 {offsets = [19, 0], sizes = [1, 48], strides = [1, 1]} : vector<48x48xf32> to vector<1x48xf32>
    %156 = vector.extract_strided_slice %135 {offsets = [20, 0], sizes = [1, 48], strides = [1, 1]} : vector<48x48xf32> to vector<1x48xf32>
    %157 = vector.extract_strided_slice %135 {offsets = [21, 0], sizes = [1, 48], strides = [1, 1]} : vector<48x48xf32> to vector<1x48xf32>
    %158 = vector.extract_strided_slice %135 {offsets = [22, 0], sizes = [1, 48], strides = [1, 1]} : vector<48x48xf32> to vector<1x48xf32>
    %159 = vector.extract_strided_slice %135 {offsets = [23, 0], sizes = [1, 48], strides = [1, 1]} : vector<48x48xf32> to vector<1x48xf32>
    %160 = vector.extract_strided_slice %135 {offsets = [24, 0], sizes = [1, 48], strides = [1, 1]} : vector<48x48xf32> to vector<1x48xf32>
    %161 = vector.extract_strided_slice %135 {offsets = [25, 0], sizes = [1, 48], strides = [1, 1]} : vector<48x48xf32> to vector<1x48xf32>
    %162 = vector.extract_strided_slice %135 {offsets = [26, 0], sizes = [1, 48], strides = [1, 1]} : vector<48x48xf32> to vector<1x48xf32>
    %163 = vector.extract_strided_slice %135 {offsets = [27, 0], sizes = [1, 48], strides = [1, 1]} : vector<48x48xf32> to vector<1x48xf32>
    %164 = vector.extract_strided_slice %135 {offsets = [28, 0], sizes = [1, 48], strides = [1, 1]} : vector<48x48xf32> to vector<1x48xf32>
    %165 = vector.extract_strided_slice %135 {offsets = [29, 0], sizes = [1, 48], strides = [1, 1]} : vector<48x48xf32> to vector<1x48xf32>
    %166 = vector.extract_strided_slice %135 {offsets = [30, 0], sizes = [1, 48], strides = [1, 1]} : vector<48x48xf32> to vector<1x48xf32>
    %167 = vector.extract_strided_slice %135 {offsets = [31, 0], sizes = [1, 48], strides = [1, 1]} : vector<48x48xf32> to vector<1x48xf32>
    %168 = vector.extract_strided_slice %135 {offsets = [32, 0], sizes = [1, 48], strides = [1, 1]} : vector<48x48xf32> to vector<1x48xf32>
    %169 = vector.extract_strided_slice %135 {offsets = [33, 0], sizes = [1, 48], strides = [1, 1]} : vector<48x48xf32> to vector<1x48xf32>
    %170 = vector.extract_strided_slice %135 {offsets = [34, 0], sizes = [1, 48], strides = [1, 1]} : vector<48x48xf32> to vector<1x48xf32>
    %171 = vector.extract_strided_slice %135 {offsets = [35, 0], sizes = [1, 48], strides = [1, 1]} : vector<48x48xf32> to vector<1x48xf32>
    %172 = vector.extract_strided_slice %135 {offsets = [36, 0], sizes = [1, 48], strides = [1, 1]} : vector<48x48xf32> to vector<1x48xf32>
    %173 = vector.extract_strided_slice %135 {offsets = [37, 0], sizes = [1, 48], strides = [1, 1]} : vector<48x48xf32> to vector<1x48xf32>
    %174 = vector.extract_strided_slice %135 {offsets = [38, 0], sizes = [1, 48], strides = [1, 1]} : vector<48x48xf32> to vector<1x48xf32>
    %175 = vector.extract_strided_slice %135 {offsets = [39, 0], sizes = [1, 48], strides = [1, 1]} : vector<48x48xf32> to vector<1x48xf32>
    %176 = vector.extract_strided_slice %135 {offsets = [40, 0], sizes = [1, 48], strides = [1, 1]} : vector<48x48xf32> to vector<1x48xf32>
    %177 = vector.extract_strided_slice %135 {offsets = [41, 0], sizes = [1, 48], strides = [1, 1]} : vector<48x48xf32> to vector<1x48xf32>
    %178 = vector.extract_strided_slice %135 {offsets = [42, 0], sizes = [1, 48], strides = [1, 1]} : vector<48x48xf32> to vector<1x48xf32>
    %179 = vector.extract_strided_slice %135 {offsets = [43, 0], sizes = [1, 48], strides = [1, 1]} : vector<48x48xf32> to vector<1x48xf32>
    %180 = vector.extract_strided_slice %135 {offsets = [44, 0], sizes = [1, 48], strides = [1, 1]} : vector<48x48xf32> to vector<1x48xf32>
    %181 = vector.extract_strided_slice %135 {offsets = [45, 0], sizes = [1, 48], strides = [1, 1]} : vector<48x48xf32> to vector<1x48xf32>
    %182 = vector.extract_strided_slice %135 {offsets = [46, 0], sizes = [1, 48], strides = [1, 1]} : vector<48x48xf32> to vector<1x48xf32>
    %183 = vector.extract_strided_slice %135 {offsets = [47, 0], sizes = [1, 48], strides = [1, 1]} : vector<48x48xf32> to vector<1x48xf32>
    %184 = tpu.concatenate %136, %137, %138, %139, %140, %141, %142, %143, %144, %145, %146, %147, %148, %149, %150, %151 in 1 : vector<1x48xf32>, vector<1x48xf32>, vector<1x48xf32>, vector<1x48xf32>, vector<1x48xf32>, vector<1x48xf32>, vector<1x48xf32>, vector<1x48xf32>, vector<1x48xf32>, vector<1x48xf32>, vector<1x48xf32>, vector<1x48xf32>, vector<1x48xf32>, vector<1x48xf32>, vector<1x48xf32>, vector<1x48xf32> -> vector<1x768xf32>
    %185 = tpu.concatenate %152, %153, %154, %155, %156, %157, %158, %159, %160, %161, %162, %163, %164, %165, %166, %167 in 1 : vector<1x48xf32>, vector<1x48xf32>, vector<1x48xf32>, vector<1x48xf32>, vector<1x48xf32>, vector<1x48xf32>, vector<1x48xf32>, vector<1x48xf32>, vector<1x48xf32>, vector<1x48xf32>, vector<1x48xf32>, vector<1x48xf32>, vector<1x48xf32>, vector<1x48xf32>, vector<1x48xf32>, vector<1x48xf32> -> vector<1x768xf32>
    %186 = tpu.concatenate %168, %169, %170, %171, %172, %173, %174, %175, %176, %177, %178, %179, %180, %181, %182, %183 in 1 : vector<1x48xf32>, vector<1x48xf32>, vector<1x48xf32>, vector<1x48xf32>, vector<1x48xf32>, vector<1x48xf32>, vector<1x48xf32>, vector<1x48xf32>, vector<1x48xf32>, vector<1x48xf32>, vector<1x48xf32>, vector<1x48xf32>, vector<1x48xf32>, vector<1x48xf32>, vector<1x48xf32>, vector<1x48xf32> -> vector<1x768xf32>
    %187 = tpu.concatenate %184, %185, %186 in 1 : vector<1x768xf32>, vector<1x768xf32>, vector<1x768xf32> -> vector<1x2304xf32>
    %188 = tpu.iota {dimensions = array<i32: 0>} : vector<2x2304xi32>
    %189 = vector.shape_cast %93 : vector<1x2304xf32> to vector<1x2304xf32>
    %190 = vector.broadcast %189 : vector<1x2304xf32> to vector<2x2304xf32>
    %c1_i32 = arith.constant 1 : i32
    %191 = vector.broadcast %c1_i32 : i32 to vector<2x2304xi32>
    %192 = arith.cmpi eq, %188, %191 : vector<2x2304xi32>
    %193 = vector.shape_cast %187 : vector<1x2304xf32> to vector<1x2304xf32>
    %194 = vector.broadcast %193 : vector<1x2304xf32> to vector<2x2304xf32>
    %195 = arith.select %192, %194, %190 : vector<2x2304xi1>, vector<2x2304xf32>
    %c0_39 = arith.constant 0 : index
    %c0_40 = arith.constant 0 : index
    %196 = vector.load %arg7[%c0_39, %c0_40] : memref<2304x256xf32, #tpu.memory_space<vmem>>, vector<2304x256xf32>
    %cst_41 = arith.constant dense<0.000000e+00> : vector<2x256xf32>
    %197 = tpu.matmul %195, %196, %cst_41 {dimension_numbers = #tpu.dot_dimension_numbers<[1], [0], [0], [1], [0, 0, 1, 1], [], []>} : vector<2x2304xf32>, vector<2304x256xf32>, vector<2x256xf32> -> vector<2x256xf32>
    %c0_42 = arith.constant 0 : index
    %c0_43 = arith.constant 0 : index
    %198 = vector.load %arg8[%c0_42, %c0_43] : memref<1x256xf32, #tpu.memory_space<vmem>>, vector<1x256xf32>
    %199 = vector.broadcast %198 : vector<1x256xf32> to vector<2x256xf32>
    %200 = arith.addf %197, %199 : vector<2x256xf32>
    %cst_44 = arith.constant 0.000000e+00 : f32
    %201 = vector.broadcast %cst_44 : f32 to vector<2x256xf32>
    %202 = arith.maximumf %200, %201 : vector<2x256xf32>
    %c0_45 = arith.constant 0 : index
    %c0_46 = arith.constant 0 : index
    %203 = vector.load %arg9[%c0_45, %c0_46] : memref<256x64xf32, #tpu.memory_space<vmem>>, vector<256x64xf32>
    %cst_47 = arith.constant dense<0.000000e+00> : vector<2x64xf32>
    %204 = tpu.matmul %202, %203, %cst_47 {dimension_numbers = #tpu.dot_dimension_numbers<[1], [0], [0], [1], [0, 0, 1, 1], [], []>} : vector<2x256xf32>, vector<256x64xf32>, vector<2x64xf32> -> vector<2x64xf32>
    %c0_48 = arith.constant 0 : index
    %c0_49 = arith.constant 0 : index
    %205 = vector.load %arg10[%c0_48, %c0_49] : memref<1x64xf32, #tpu.memory_space<vmem>>, vector<1x64xf32>
    %206 = vector.broadcast %205 : vector<1x64xf32> to vector<2x64xf32>
    %207 = arith.addf %204, %206 : vector<2x64xf32>
    %cst_50 = arith.constant 0.000000e+00 : f32
    %208 = vector.broadcast %cst_50 : f32 to vector<2x64xf32>
    %209 = arith.maximumf %207, %208 : vector<2x64xf32>
    %c0_51 = arith.constant 0 : index
    %c0_52 = arith.constant 0 : index
    %210 = vector.load %arg11[%c0_51, %c0_52] : memref<64x4xf32, #tpu.memory_space<vmem>>, vector<64x4xf32>
    %cst_53 = arith.constant dense<0.000000e+00> : vector<2x4xf32>
    %211 = tpu.matmul %209, %210, %cst_53 {dimension_numbers = #tpu.dot_dimension_numbers<[1], [0], [0], [1], [0, 0, 1, 1], [], []>} : vector<2x64xf32>, vector<64x4xf32>, vector<2x4xf32> -> vector<2x4xf32>
    %c0_54 = arith.constant 0 : index
    %c0_55 = arith.constant 0 : index
    %212 = vector.load %arg12[%c0_54, %c0_55] : memref<1x4xf32, #tpu.memory_space<vmem>>, vector<1x4xf32>
    %213 = vector.broadcast %212 : vector<1x4xf32> to vector<2x4xf32>
    %214 = arith.addf %211, %213 : vector<2x4xf32>
    %c0_56 = arith.constant 0 : index
    %c0_57 = arith.constant 0 : index
    %215 = vector.load %arg13[%c0_56, %c0_57] : memref<2x4xf32, #tpu.memory_space<vmem>>, vector<2x4xf32>
    tpu.vector_store %arg13[%c0_56, %c0_57], %214 {strides = array<i32>} : memref<2x4xf32, #tpu.memory_space<vmem>>, vector<2x4xf32>,
    return
  }
}

</mosaic_0001>

<bundles_post_ra>
// kernel: cnn_norm_dropout_forward.1
= control target key start
LH: loop header
LB: loop body
LE: loop exit
PB: predicated region body
PF: predicated region fallthrough
CT: control target
= control target key end

     0   :  { %18 = vsyncpa [#allocation3], 0  ;;  %s5790_s0 = inlined_call_operand.vmem [shape: f32[2,6,60], index: 0, kind: input, shape index: {}]   ;;  %s5791_s1 = inlined_call_operand.vmem [shape: f32[30,12], index: 1, kind: input, shape index: {}]   ;;  %s5792_s2 = inlined_call_operand.hbm [shape: f32[1,12], index: 2, kind: input, shape index: {}]   ;;  %s5793_s3 = inlined_call_operand.vmem [shape: f32[60,24], index: 3, kind: input, shape index: {}]   ;;  %s5794_s4 = inlined_call_operand.hbm [shape: f32[1,24], index: 4, kind: input, shape index: {}]   ;;  %s5795_s5 = inlined_call_operand.vmem [shape: f32[120,48], index: 5, kind: input, shape index: {}]   ;;  %s5796_s6 = inlined_call_operand.hbm [shape: f32[1,48], index: 6, kind: input, shape index: {}]   ;;  %s5797_s7 = inlined_call_operand.hbm [shape: f32[2304,256], index: 7, kind: input, shape index: {}]   ;;  %s5798_s8 = inlined_call_operand.hbm [shape: f32[1,256], index: 8, kind: input, shape index: {}]   ;;  %s5799_s9 = inlined_call_operand.vmem [shape: f32[256,64], index: 9, kind: input, shape index: {}]   ;;  %s5800_s10 = inlined_call_operand.hbm [shape: f32[1,64], index: 10, kind: input, shape index: {}]   ;;  %s5801_s11 = inlined_call_operand.vmem [shape: f32[64,4], index: 11, kind: input, shape index: {}]   ;;  %s5802_s12 = inlined_call_operand.hbm [shape: f32[1,4], index: 12, kind: input, shape index: {}]   ;;  %s5803_s13 = inlined_call_operand.hbm [shape: f32[2,4], index: 13, kind: output, shape index: {}]  }
   0x1   :  { %19 = vsyncpa [#allocation6], 0 }
   0x2   :  { %20 = vsyncpa [#allocation9], 0 }
   0x3   :  { %21 = vsyncpa [#allocation12], 0  ;;  %s45_s27 = sshll.u32 %s5794_s4, 4  ;;  %s46_s27 = int_to_ptr.hbm [resolvable:$true] %s45_s27 }
   0x4   :  { %22 = vsyncpa [#allocation4], 0  ;;  %s4081_s28 = smov [#allocation5]   ;;  %s68_s15 = sshll.u32 %s5797_s7, 4  ;;  %s69_s15 = int_to_ptr.hbm [resolvable:$true] %s68_s15 }
   0x5   :  { %s47_s29 = sshll.u32 %s4081_s28, 4  ;;  %s4082_s16 = smov [#allocation8]   ;;  %s48_s29 = int_to_ptr.vmem [resolvable:$true] %s47_s29 }
   0x6   :  { %50 = dma.hbm_to_vmem [thread:$0]  %s46_s27, 16, %s48_s29, [#allocation6]  }
   0x7   :  { %s70_s17 = sshll.u32 %s4082_s16, 4  ;;  %s4083_s18 = smov 256   ;;  %s71_s17 = int_to_ptr.vmem [resolvable:$true] %s70_s17 }
   0x8   :  { %s4084_s19 = smov 16   ;;  %s95_s21 = sshll.u32 %s5800_s10, 4  ;;  %s96_s21 = int_to_ptr.hbm [resolvable:$true] %s95_s21 }
   0x9   :  { %76 = dma.hbm_to_vmem [thread:$0]  %s69_s15, 73728, %s71_s17, [#allocation9], %s4083_s18, %s4083_s18, %s4084_s19  }
   0xa   :  { %s4085_s22 = smov [#allocation11]   ;;  %s32_s7 = sshll.u32 %s5792_s2, 4  ;;  %s33_s7 = int_to_ptr.hbm [resolvable:$true] %s32_s7 }
   0xb   :  { %s97_s23 = sshll.u32 %s4085_s22, 4  ;;  %s4086_s26 = smov [#allocation2]   ;;  %s98_s23 = int_to_ptr.vmem [resolvable:$true] %s97_s23 }
   0xc   :  { %100 = dma.hbm_to_vmem [thread:$0]  %s96_s21, 16, %s98_s23, [#allocation12]  }
   0xd   :  { %s34_s27 = sshll.u32 %s4086_s26, 4  ;;  %s58_s30 = sshll.u32 %s5796_s6, 4  ;;  %s35_s27 = int_to_ptr.vmem [resolvable:$true] %s34_s27  ;;  %s59_s30 = int_to_ptr.hbm [resolvable:$true] %s58_s30 }
   0xe   :  { %37 = dma.hbm_to_vmem [thread:$0]  %s33_s7, 16, %s35_s27, [#allocation3]  }
   0xf   :  { %s82_s15 = sshll.u32 %s5798_s8, 4  ;;  %s4087_s16 = smov [#allocation7]   ;;  %s83_s15 = int_to_ptr.hbm [resolvable:$true] %s82_s15 }
  0x10   :  { %s60_s17 = sshll.u32 %s4087_s16, 4  ;;  %s4088_s2 = smov [#allocation10]   ;;  %s61_s17 = int_to_ptr.vmem [resolvable:$true] %s60_s17 }
  0x11   :  { %63 = dma.hbm_to_vmem [thread:$0]  %s59_s30, 16, %s61_s17, [#allocation6]  }
  0x12   :  { %s84_s18 = sshll.u32 %s4088_s2, 4  ;;  %s108_s21 = sshll.u32 %s5802_s12, 4  ;;  %s85_s18 = int_to_ptr.vmem [resolvable:$true] %s84_s18  ;;  %s109_s21 = int_to_ptr.hbm [resolvable:$true] %s108_s21 }
  0x13   :  { %87 = dma.hbm_to_vmem [thread:$0]  %s83_s15, 32, %s85_s18, [#allocation9]  }
  0x14   :  { %s4089_s6 = smov [#allocation13]  }
  0x15   :  { %s110_s22 = sshll.u32 %s4089_s6, 4  ;;  %s111_s22 = int_to_ptr.vmem [resolvable:$true] %s110_s22 }
  0x16   :  { %113 = dma.hbm_to_vmem [thread:$0]  %s109_s21, 16, %s111_s22, [#allocation12]  }
  0x17   :  { %4071 = dma.done.wait [#allocation3], 16  }
  0x18   :  { %4072 = vsyncadd [#allocation3], 4294967280 }
  0x19   :  { %4073 = dma.done.wait [#allocation6], 32  }
  0x1a   :  { %4074 = vsyncadd [#allocation6], 4294967264 }
  0x1b   :  { %4075 = dma.done.wait [#allocation9], 73760  }
  0x1c   :  { %4076 = vsyncadd [#allocation9], 4294893536 }
  0x1d   :  { %4077 = dma.done.wait [#allocation12], 32  }
  0x1e   :  { %4078 = vsyncadd [#allocation12], 4294967264  ;;  %v3617_v0 = vld [vmem:[%s5790_s0 + $0x8] sm:$0x3f]  ;;  %v142_v1 = vld [vmem:[%s5790_s0] sm:$0x3f] }
  0x1f   :  { %1155 = vxpose.xlu0.b32.start.end [1/1] (short) (narrow) %v3617_v0, 64  ;;  %vm257_vm0 = vcmask 1044480   ;;  %vm183_vm1 = vcmask 1046528   ;;  %s4090_s0 = smov 18   ;;  %s4091_s25 = smov 6   ;;  %vm294_vm2 = vcmask 1043456  }
  0x20   :  { %vm220_vm3 = vcmask 1045504   ;;  %s4092_s7 = smov 24   ;;  %s4093_s26 = smov 12   ;;  %v366_v44 = vld [vmem:[%s5791_s1 + $0x18] sm:$0x3f]  ;;  %v365_v48 = vld [vmem:[%s5791_s1 + $0x10] sm:$0xff] }
  0x21   :  { %3618 = vmatpush.msk.msra.mxu3 %vm220_vm3, %v366_v44  ;;  %3595 = vmatpush.msk.msra.mxu0 %vm220_vm3, %v366_v44  ;;  %v364_v49 = vld [vmem:[%s5791_s1 + $0x8] sm:$0xff]  ;;  %v363_v52 = vld [vmem:[%s5791_s1] sm:$0xff]  ;;  %vm331_vm4 = vcmask 48128   ;;  %vm339_vm5 = vcmask 97280   ;;  %vm347_vm6 = vcmask 146432   ;;  %vm355_vm7 = vcmask 195584  }
  0x22   :  { %vm371_vm8 = vcmask 244736   ;;  %s4094_s1 = smov 36   ;;  %s4095_s17 = smov 48   ;;  %vm598_vm9 = vcmask 293888   ;;  %vm606_vm10 = vcmask 392192   ;;  %vm626_vm11 = vcmask 490496  }
  0x23   :  { %1401 = vmatpush.msra.mxu3 %v365_v48  ;;  %409 = vmatpush.msra.mxu0 %v365_v48  ;;  %vm839_vm12 = vcmask 588800   ;;  %vm846_vm13 = vcmask 785408   ;;  %vm872_vm14 = vcmask 982016   ;;  %s4101_s20 = smov 32   ;;  %vm992_vm15 = vcmask 130048   ;;  %s4102_s18 = smov [#allocation14]  }
  0x25   :  { %1402 = vmatpush.msra.mxu3 %v364_v49  ;;  %410 = vmatpush.msra.mxu0 %v364_v49 }
  0x27   :  { %1403 = vmatpush.msra.mxu3 %v363_v52  ;;  %411 = vmatpush.msra.mxu0 %v363_v52 }
  0x5f   :  { %143 = vxpose.xlu0.b32.start.end [1/1] (short) (narrow) %v142_v1, 64 }
  0xc3   :  { %v4201_v2 = vpop.trf.xlu0 }
  0xc4   :  { %v1267_v4 = vrot.slane %v4201_v2, 3  ;;  %v1195_v6 = vrot.slane %v4201_v2, 1  ;;  %v1303_v13 = vrot.slane %v4201_v2, 4  ;;  %v1231_v14 = vrot.slane %v4201_v2, 2 }
  0xcb   :  { %v4203_v3 = vpop.trf.xlu0 }
  0xcc   :  { %v1268_v5 = vrot.slane %v4203_v3, 3  ;;  %v1196_v7 = vrot.slane %v4203_v3, 1  ;;  %v1304_v10 = vrot.slane %v4203_v3, 4  ;;  %v1232_v11 = vrot.slane %v4203_v3, 2 }
  0xce   :  { %v1269_v8 = vsel %vm257_vm0, %v1267_v4, %v1268_v5  ;;  %v1197_v9 = vsel %vm183_vm1, %v1195_v6, %v1196_v7  ;;  %v1305_v15 = vsel %vm294_vm2, %v1303_v13, %v1304_v10  ;;  %v1233_v16 = vsel %vm220_vm3, %v1231_v14, %v1232_v11 }
  0xcf   :  { %1282 = vrot.lane.b32.xlu2 %v1269_v8, %s4090_s0  ;;  %1210 = vrot.lane.b32.xlu1 %v1197_v9, %s4091_s25 }
  0xd3   :  { %v4215_v12 = vpop.trf.xlu0 }
  0xd4   :  { %v1270_v23 = vrot.slane %v4215_v12, 3  ;;  %v1198_v33 = vrot.slane %v4215_v12, 1  ;;  %v1234_v38 = vrot.slane %v4215_v12, 2  ;;  %v1306_v43 = vrot.slane %v4215_v12, 4 }
  0xd6   :  { %v1199_v36 = vsel %vm183_vm1, %v1196_v7, %v1198_v33  ;;  %v1235_v41 = vsel %vm220_vm3, %v1232_v11, %v1234_v38  ;;  %v1307_v45 = vsel %vm294_vm2, %v1304_v10, %v1306_v43  ;;  %v1271_v46 = vsel %vm257_vm0, %v1268_v5, %v1270_v23 }
  0xd7   :  { %1318 = vrot.lane.b32.xlu2 %v1305_v15, %s4092_s7  ;;  %1246 = vrot.lane.b32.xlu1 %v1233_v16, %s4093_s26 }
  0xdb   :  { %v4223_v17 = vpop.trf.xlu0 }
  0xdc   :  { %v1272_v22 = vrot.slane %v4223_v17, 3  ;;  %v1200_v55 = vrot.slane %v4223_v17, 1  ;;  %v1236_v59 = vrot.slane %v4223_v17, 2  ;;  %v1308_v4 = vrot.slane %v4223_v17, 4 }
  0xde   :  { %v1273_v25 = vsel %vm257_vm0, %v1270_v23, %v1272_v22  ;;  %v1201_v57 = vsel %vm183_vm1, %v1198_v33, %v1200_v55  ;;  %v1237_v61 = vsel %vm220_vm3, %v1234_v38, %v1236_v59  ;;  %v1309_v6 = vsel %vm294_vm2, %v1306_v43, %v1308_v4 }
  0xe3   :  { %v4225_v18 = vpop.trf.xlu0 }
  0xeb   :  { %v4227_v19 = vpop.trf.xlu0 }
  0xf3   :  { %v4229_v20 = vpop.trf.xlu0 }
  0xfb   :  { %v4231_v21 = vpop.trf.xlu0 }
 0x103   :  { %v4235_v24 = vpop.trf.xlu0 }
 0x104   :  { %v221_v27 = vrot.slane %v4235_v24, 2  ;;  %v184_v29 = vrot.slane %v4235_v24, 1  ;;  %v258_v35 = vrot.slane %v4235_v24, 3  ;;  %v295_v40 = vrot.slane %v4235_v24, 4 }
 0x105   :  { %1286 = vrot.lane.b32.xlu0 %v1273_v25, %s4090_s0 }
 0x10b   :  { %v4241_v26 = vpop.trf.xlu0 }
 0x10c   :  { %v222_v28 = vrot.slane %v4241_v26, 2  ;;  %v185_v30 = vrot.slane %v4241_v26, 1  ;;  %v259_v34 = vrot.slane %v4241_v26, 3  ;;  %v296_v39 = vrot.slane %v4241_v26, 4 }
 0x10e   :  { %v223_v31 = vsel %vm220_vm3, %v221_v27, %v222_v28  ;;  %v186_v32 = vsel %vm183_vm1, %v184_v29, %v185_v30  ;;  %v260_v37 = vsel %vm257_vm0, %v258_v35, %v259_v34  ;;  %v297_v42 = vsel %vm294_vm2, %v295_v40, %v296_v39 }
 0x10f   :  { %236 = vrot.lane.b32.xlu2 %v223_v31, %s4093_s26  ;;  %199 = vrot.lane.b32.xlu1 %v186_v32, %s4091_s25  ;;  %v1202_v27 = vrot.slane %v4225_v18, 1  ;;  %v1274_v31 = vrot.slane %v4225_v18, 3  ;;  %v1310_v35 = vrot.slane %v4225_v18, 4 }
 0x111   :  { %v1203_v29 = vsel %vm183_vm1, %v1200_v55, %v1202_v27  ;;  %v1275_v33 = vsel %vm257_vm0, %v1272_v22, %v1274_v31 }
 0x113   :  { %v4273_v47 = vpop.trf.xlu0 }
 0x114   :  { %v224_v50 = vrot.slane %v4273_v47, 2  ;;  %v187_v51 = vrot.slane %v4273_v47, 1  ;;  %v261_v56 = vrot.slane %v4273_v47, 3  ;;  %v298_v60 = vrot.slane %v4273_v47, 4 }
 0x116   :  { %v225_v53 = vsel %vm220_vm3, %v222_v28, %v224_v50  ;;  %v188_v54 = vsel %vm183_vm1, %v185_v30, %v187_v51  ;;  %v262_v58 = vsel %vm257_vm0, %v259_v34, %v261_v56  ;;  %v299_v62 = vsel %vm294_vm2, %v296_v39, %v298_v60 }
 0x117   :  { %1212 = vrot.lane.b32.xlu2 %v1199_v36, %s4091_s25  ;;  %273 = vrot.lane.b32.xlu1 %v260_v37, %s4090_s0  ;;  %v1238_v30 = vrot.slane %v4225_v18, 2  ;;  %v1311_v37 = vsel %vm294_vm2, %v1308_v4, %v1310_v35 }
 0x119   :  { %v1239_v32 = vsel %vm220_vm3, %v1236_v59, %v1238_v30 }
 0x11b   :  { %v4302_v63 = vpop.trf.xlu0 }
 0x11c   :  { %v189_v5 = vrot.slane %v4302_v63, 1  ;;  %v226_v11 = vrot.slane %v4302_v63, 2  ;;  %v263_v13 = vrot.slane %v4302_v63, 3  ;;  %v300_v25 = vrot.slane %v4302_v63, 4 }
 0x11e   :  { %v190_v7 = vsel %vm183_vm1, %v187_v51, %v189_v5  ;;  %v227_v23 = vsel %vm220_vm3, %v224_v50, %v226_v11  ;;  %v301_v28 = vsel %vm294_vm2, %v298_v60, %v300_v25  ;;  %v1240_v50 = vrot.slane %v4227_v19, 2 }
 0x11f   :  { %1248 = vrot.lane.b32.xlu2 %v1235_v41, %s4093_s26  ;;  %310 = vrot.lane.b32.xlu1 %v297_v42, %s4092_s7  ;;  %v1276_v51 = vrot.slane %v4227_v19, 3 }
 0x120   :  { %v1241_v52 = vsel %vm220_vm3, %v1238_v30, %v1240_v50 }
 0x123   :  { %v4336_v34 = vpop.trf.xlu0 }
 0x124   :  { %v191_v36 = vrot.slane %v4336_v34, 1  ;;  %v228_v22 = vrot.slane %v4336_v34, 2  ;;  %v265_v40 = vrot.slane %v4336_v34, 3  ;;  %v302_v44 = vrot.slane %v4336_v34, 4 }
 0x126   :  { %v192_v38 = vsel %vm183_vm1, %v189_v5, %v191_v36  ;;  %v229_v41 = vsel %vm220_vm3, %v226_v11, %v228_v22  ;;  %v266_v42 = vsel %vm257_vm0, %v263_v13, %v265_v40 }
 0x127   :  { %1320 = vrot.lane.b32.xlu2 %v1307_v45, %s4092_s7  ;;  %1284 = vrot.lane.b32.xlu1 %v1271_v46, %s4090_s0  ;;  %v1204_v45 = vrot.slane %v4227_v19, 1  ;;  %v303_v46 = vsel %vm294_vm2, %v300_v25, %v302_v44 }
 0x129   :  { %v1283_v0 = vpop.permute.xlu2 %1282  ;;  %v1205_v48 = vsel %vm183_vm1, %v1202_v27, %v1204_v45 }
 0x12f   :  { %238 = vrot.lane.b32.xlu2 %v225_v53, %s4093_s26  ;;  %201 = vrot.lane.b32.xlu1 %v188_v54, %s4091_s25  ;;  %v1277_v53 = vsel %vm257_vm0, %v1274_v31, %v1276_v51  ;;  %v4364_v54 = vpop.trf.xlu0 }
 0x131   :  { %v1319_v14 = vpop.permute.xlu2 %1318 }
 0x137   :  { %1214 = vrot.lane.b32.xlu2 %v1201_v57, %s4091_s25  ;;  %275 = vrot.lane.b32.xlu1 %v262_v58, %s4090_s0  ;;  %v1312_v57 = vrot.slane %v4227_v19, 4  ;;  %v193_v58 = vrot.slane %v4364_v54, 1 }
 0x139   :  { %v1313_v59 = vsel %vm294_vm2, %v1310_v35, %v1312_v57  ;;  %v194_v60 = vsel %vm183_vm1, %v191_v36, %v193_v58  ;;  %v1314_v36 = vrot.slane %v4229_v20, 4 }
 0x13f   :  { %1250 = vrot.lane.b32.xlu2 %v1237_v61, %s4093_s26  ;;  %312 = vrot.lane.b32.xlu1 %v299_v62, %s4092_s7 }
 0x141   :  { %v1211_v1 = vpop.permute.xlu1 %1210 }
 0x142   :  { %v1339_v8 = vsel %vm331_vm4, %v4201_v2, %v1211_v1  ;;  %v264_v2 = vsel %vm257_vm0, %v261_v56, %v263_v13  ;;  %v267_v1 = vrot.slane %v4364_v54, 3  ;;  %v304_v13 = vrot.slane %v4364_v54, 4 }
 0x147   :  { %1322 = vrot.lane.b32.xlu1 %v1309_v6, %s4092_s7  ;;  %203 = vrot.lane.b32.xlu2 %v190_v7, %s4091_s25  ;;  %v268_v6 = vsel %vm257_vm0, %v265_v40, %v267_v1 }
 0x149   :  { %v1247_v9 = vpop.permute.xlu1 %1246 }
 0x14a   :  { %v1346_v10 = vsel %vm339_vm5, %v1339_v8, %v1247_v9 }
 0x14b   :  { %v1353_v15 = vsel %vm347_vm6, %v1346_v10, %v1283_v0  ;;  %v230_v0 = vrot.slane %v4364_v54, 2 }
 0x14c   :  { %v1360_v16 = vsel %vm355_vm7, %v1353_v15, %v1319_v14  ;;  %v305_v14 = vsel %vm294_vm2, %v302_v44, %v304_v13 }
 0x14d   :  { %3619 = vmatmul.msk.f32.vlgmr.msra.gmra.mxu3 %vm371_vm8, %v1360_v16  ;;  %v231_v5 = vsel %vm220_vm3, %v228_v22, %v230_v0 }
 0x14f   :  { %240 = vrot.lane.b32.xlu1 %v227_v23, %s4093_s26  ;;  %277 = vrot.lane.b32.xlu2 %v264_v2, %s4090_s0 }
 0x157   :  { %314 = vrot.lane.b32.xlu1 %v301_v28, %s4092_s7  ;;  %1216 = vrot.lane.b32.xlu2 %v1203_v29, %s4091_s25  ;;  %v1242_v28 = vrot.slane %v4229_v20, 2  ;;  %v1278_v29 = vrot.slane %v4229_v20, 3 }
 0x159   :  { %v1243_v31 = vsel %vm220_vm3, %v1240_v50, %v1242_v28 }
 0x15f   :  { %1252 = vrot.lane.b32.xlu1 %v1239_v32, %s4093_s26  ;;  %1288 = vrot.lane.b32.xlu2 %v1275_v33, %s4090_s0  ;;  %v1279_v32 = vsel %vm257_vm0, %v1276_v51, %v1278_v29 }
 0x167   :  { %1324 = vrot.lane.b32.xlu1 %v1311_v37, %s4092_s7  ;;  %205 = vrot.lane.b32.xlu2 %v192_v38, %s4091_s25  ;;  %v1315_v38 = vsel %vm294_vm2, %v1312_v57, %v1314_v36 }
 0x169   :  { %v237_v39 = vpop.permute.xlu2 %236 }
 0x16f   :  { %242 = vrot.lane.b32.xlu1 %v229_v41, %s4093_s26  ;;  %279 = vrot.lane.b32.xlu2 %v266_v42, %s4090_s0 }
 0x171   :  { %v1213_v43 = vpop.permute.xlu2 %1212 }
 0x172   :  { %v1340_v16 = vsel %vm331_vm4, %v4203_v3, %v1213_v43  ;;  %v4402_v3 = vpop.trf.xlu0 }
 0x173   :  { %v195_v37 = vrot.slane %v4402_v3, 1  ;;  %v232_v41 = vrot.slane %v4402_v3, 2  ;;  %v269_v42 = vrot.slane %v4402_v3, 3 }
 0x177   :  { %316 = vrot.lane.b32.xlu1 %v303_v46, %s4092_s7  ;;  %1218 = vrot.lane.b32.xlu2 %v1205_v48, %s4091_s25  ;;  %v270_v46 = vsel %vm257_vm0, %v267_v1, %v269_v42 }
 0x179   :  { %v1249_v49 = vpop.permute.xlu2 %1248 }
 0x17a   :  { %v1347_v23 = vsel %vm339_vm5, %v1340_v16, %v1249_v49  ;;  %v166_v44 = vpop.trf.xlu0 }
 0x17b   :  { %v234_v16 = vrot.slane %v166_v44, 2 }
 0x17f   :  { %1254 = vrot.lane.b32.xlu1 %v1241_v52, %s4093_s26  ;;  %1290 = vrot.lane.b32.xlu2 %v1277_v53, %s4090_s0  ;;  %v306_v53 = vrot.slane %v4402_v3, 4 }
 0x181   :  { %v1321_v55 = vpop.permute.xlu2 %1320  ;;  %v200_v56 = vpop.permute.xlu1 %199  ;;  %v307_v57 = vsel %vm294_vm2, %v304_v13, %v306_v53 }
 0x182   :  { %v332_v4 = vsel %vm331_vm4, %v4235_v24, %v200_v56  ;;  %v1206_v24 = vrot.slane %v4229_v20, 1 }
 0x183   :  { %v340_v7 = vsel %vm339_vm5, %v332_v4, %v237_v39  ;;  %v196_v39 = vsel %vm183_vm1, %v193_v58, %v195_v37 }
 0x184   :  { %v1207_v15 = vsel %vm183_vm1, %v1204_v45, %v1206_v24  ;;  %v233_v45 = vsel %vm220_vm3, %v230_v0, %v232_v41  ;;  %v1244_v0 = vrot.slane %v4231_v21, 2 }
 0x186   :  { %v1245_v4 = vsel %vm220_vm3, %v1242_v28, %v1244_v0  ;;  %v308_v28 = vrot.slane %v166_v44, 4 }
 0x187   :  { %1326 = vrot.lane.b32.xlu1 %v1313_v59, %s4092_s7  ;;  %207 = vrot.lane.b32.xlu2 %v194_v60, %s4091_s25  ;;  %v1287_v59 = vpop.permute.xlu0 %1286 }
 0x189   :  { %v274_v61 = vpop.permute.xlu1 %273  ;;  %v239_v62 = vpop.permute.xlu2 %238 }
 0x18a   :  { %v348_v8 = vsel %vm347_vm6, %v340_v7, %v274_v61  ;;  %v197_v7 = vrot.slane %v166_v44, 1 }
 0x18f   :  { %244 = vrot.lane.b32.xlu1 %v231_v5, %s4093_s26  ;;  %281 = vrot.lane.b32.xlu2 %v268_v6, %s4090_s0 }
 0x191   :  { %v311_v9 = vpop.permute.xlu1 %310  ;;  %v1215_v10 = vpop.permute.xlu2 %1214 }
 0x192   :  { %v356_v11 = vsel %vm355_vm7, %v348_v8, %v311_v9  ;;  %v1316_v8 = vrot.slane %v4231_v21, 4 }
 0x193   :  { %3596 = vmatmul.msk.f32.vlgmr.msra.gmra.mxu0 %vm371_vm8, %v356_v11 }
 0x194   :  { %v1317_v13 = vsel %vm294_vm2, %v1314_v36, %v1316_v8 }
 0x197   :  { %318 = vrot.lane.b32.xlu1 %v305_v14, %s4092_s7  ;;  %1220 = vrot.lane.b32.xlu2 %v1207_v15, %s4091_s25 }
 0x199   :  { %v1285_v2 = vpop.permute.xlu1 %1284  ;;  %v1251_v25 = vpop.permute.xlu2 %1250 }
 0x19a   :  { %v1354_v27 = vsel %vm347_vm6, %v1347_v23, %v1285_v2  ;;  %v271_v23 = vrot.slane %v166_v44, 3 }
 0x19b   :  { %v1361_v30 = vsel %vm355_vm7, %v1354_v27, %v1321_v55  ;;  %v1341_v55 = vsel %vm331_vm4, %v4215_v12, %v1215_v10  ;;  %v1280_v12 = vrot.slane %v4231_v21, 3 }
 0x19c   :  { %3620 = vmatmul.msk.f32.gmra.mxu3 %vm371_vm8, %v1361_v30  ;;  %v1348_v56 = vsel %vm339_vm5, %v1341_v55, %v1251_v25  ;;  %v272_v2 = vsel %vm257_vm0, %v269_v42, %v271_v23 }
 0x19d   :  { %v1355_v61 = vsel %vm347_vm6, %v1348_v56, %v1287_v59  ;;  %v1281_v5 = vsel %vm257_vm0, %v1278_v29, %v1280_v12 }
 0x19f   :  { %1256 = vrot.lane.b32.xlu1 %v1243_v31, %s4093_s26  ;;  %1292 = vrot.lane.b32.xlu2 %v1279_v32, %s4090_s0  ;;  %v309_v31 = vsel %vm294_vm2, %v306_v53, %v308_v28 }
 0x1a1   :  { %v202_v33 = vpop.permute.xlu1 %201  ;;  %v204_v35 = vpop.permute.xlu2 %203 }
 0x1a2   :  { %v333_v43 = vsel %vm331_vm4, %v4241_v26, %v202_v33  ;;  %v1208_v26 = vrot.slane %v4231_v21, 1  ;;  %v334_v9 = vsel %vm331_vm4, %v4273_v47, %v204_v35  ;;  %v235_v47 = vsel %vm220_vm3, %v232_v41, %v234_v16 }
 0x1a3   :  { %v341_v48 = vsel %vm339_vm5, %v333_v43, %v239_v62 }
 0x1a4   :  { %v1209_v58 = vsel %vm183_vm1, %v1206_v24, %v1208_v26  ;;  %v198_v24 = vsel %vm183_vm1, %v195_v37, %v197_v7 }
 0x1a7   :  { %1328 = vrot.lane.b32.xlu1 %v1315_v38, %s4092_s7  ;;  %209 = vrot.lane.b32.xlu2 %v196_v39, %s4091_s25 }
 0x1a9   :  { %v276_v22 = vpop.permute.xlu1 %275  ;;  %v278_v40 = vpop.permute.xlu2 %277 }
 0x1aa   :  { %v349_v49 = vsel %vm347_vm6, %v341_v48, %v276_v22 }
 0x1af   :  { %246 = vrot.lane.b32.xlu1 %v233_v45, %s4093_s26  ;;  %283 = vrot.lane.b32.xlu2 %v270_v46, %s4090_s0 }
 0x1b1   :  { %v313_v50 = vpop.permute.xlu1 %312  ;;  %v1217_v51 = vpop.permute.xlu2 %1216 }
 0x1b2   :  { %v357_v52 = vsel %vm355_vm7, %v349_v49, %v313_v50  ;;  %v1342_v29 = vsel %vm331_vm4, %v4223_v17, %v1217_v51 }
 0x1b3   :  { %3597 = vmatmul.msk.f32.gmra.mxu0 %vm371_vm8, %v357_v52 }
 0x1b7   :  { %320 = vrot.lane.b32.xlu1 %v307_v57, %s4092_s7  ;;  %1222 = vrot.lane.b32.xlu2 %v1209_v58, %s4091_s25 }
 0x1b9   :  { %v1323_v60 = vpop.permute.xlu1 %1322  ;;  %v1289_v1 = vpop.permute.xlu2 %1288 }
 0x1ba   :  { %v1362_v62 = vsel %vm355_vm7, %v1355_v61, %v1323_v60 }
 0x1bb   :  { %3621 = vmatmul.msk.f32.gmra.mxu3 %vm371_vm8, %v1362_v62  ;;  %v4484_v62 = vld [vmem:[#allocation2] ss:$0 sm:$0xff] }
 0x1bf   :  { %1258 = vrot.lane.b32.xlu1 %v1245_v4, %s4093_s26  ;;  %1294 = vrot.lane.b32.xlu2 %v1281_v5, %s4090_s0 }
 0x1c1   :  { %v241_v6 = vpop.permute.xlu1 %240  ;;  %v206_v10 = vpop.permute.xlu2 %205 }
 0x1c2   :  { %v342_v11 = vsel %vm339_vm5, %v334_v9, %v241_v6  ;;  %v335_v39 = vsel %vm331_vm4, %v4302_v63, %v206_v10 }
 0x1c3   :  { %v350_v15 = vsel %vm347_vm6, %v342_v11, %v278_v40 }
 0x1c7   :  { %1330 = vrot.lane.b32.xlu1 %v1317_v13, %s4092_s7  ;;  %211 = vrot.lane.b32.xlu2 %v198_v24, %s4091_s25 }
 0x1c9   :  { %v315_v14 = vpop.permute.xlu1 %314  ;;  %v280_v25 = vpop.permute.xlu2 %279 }
 0x1ca   :  { %v358_v21 = vsel %vm355_vm7, %v350_v15, %v315_v14 }
 0x1cb   :  { %3598 = vmatmul.msk.f32.gmra.mxu0 %vm371_vm8, %v358_v21 }
 0x1cf   :  { %248 = vrot.lane.b32.xlu1 %v235_v47, %s4093_s26  ;;  %285 = vrot.lane.b32.xlu2 %v272_v2, %s4090_s0 }
 0x1d0   :  { %v1405_v61 = vpop.f32.mrf.mxu3 }
 0x1d1   :  { %v1253_v27 = vpop.permute.xlu1 %1252  ;;  %v1219_v32 = vpop.permute.xlu2 %1218 }
 0x1d2   :  { %v1349_v30 = vsel %vm339_vm5, %v1342_v29, %v1253_v27  ;;  %v1343_v44 = vsel %vm331_vm4, %v4225_v18, %v1219_v32 }
 0x1d3   :  { %v1356_v35 = vsel %vm347_vm6, %v1349_v30, %v1289_v1  ;;  %v1406_v1 = vadd.f32 %v4484_v62, %v1405_v61 }
 0x1d5   :  { %v4490_v6 = vmax.f32 %v1406_v1, 0.0 }
 0x1d7   :  { %322 = vrot.lane.b32.xlu1 %v309_v31, %s4092_s7  ;;  %v1508_v9 = vrot.slane %v4490_v6, 3  ;;  %v1542_v1 = vrot.slane %v4490_v6, 4 }
 0x1d9   :  { %v1325_v33 = vpop.permute.xlu1 %1324  ;;  %v1291_v38 = vpop.permute.xlu2 %1290 }
 0x1da   :  { %v1363_v36 = vsel %vm355_vm7, %v1356_v35, %v1325_v33 }
 0x1db   :  { %3622 = vmatmul.msk.f32.gmra.mxu3 %vm371_vm8, %v1363_v36 }
 0x1e1   :  { %v243_v37 = vpop.permute.xlu1 %242  ;;  %v208_v42 = vpop.permute.xlu2 %207 }
 0x1e2   :  { %v343_v17 = vsel %vm339_vm5, %v335_v39, %v243_v37  ;;  %v336_v52 = vsel %vm331_vm4, %v4336_v34, %v208_v42  ;;  %v1440_v42 = vrot.slane %v4490_v6, 1 }
 0x1e3   :  { %v351_v40 = vsel %vm347_vm6, %v343_v17, %v280_v25 }
 0x1e9   :  { %v317_v22 = vpop.permute.xlu1 %316  ;;  %v282_v46 = vpop.permute.xlu2 %281 }
 0x1ea   :  { %v359_v41 = vsel %vm355_vm7, %v351_v40, %v317_v22 }
 0x1eb   :  { %3599 = vmatmul.msk.f32.gmra.mxu0 %vm371_vm8, %v359_v41 }
 0x1f1   :  { %v1255_v43 = vpop.permute.xlu1 %1254  ;;  %v1221_v50 = vpop.permute.xlu2 %1220 }
 0x1f2   :  { %v1350_v45 = vsel %vm339_vm5, %v1343_v44, %v1255_v43  ;;  %v1344_v58 = vsel %vm331_vm4, %v4227_v19, %v1221_v50  ;;  %v1474_v50 = vrot.slane %v4490_v6, 2 }
 0x1f3   :  { %v1357_v63 = vsel %vm347_vm6, %v1350_v45, %v1291_v38 }
 0x1f9   :  { %v1327_v48 = vpop.permute.xlu1 %1326  ;;  %v1293_v56 = vpop.permute.xlu2 %1292 }
 0x1fa   :  { %v1364_v49 = vsel %vm355_vm7, %v1357_v63, %v1327_v48 }
 0x1fb   :  { %3623 = vmatmul.msk.f32.gmra.mxu3 %vm371_vm8, %v1364_v49 }
 0x201   :  { %v245_v51 = vpop.permute.xlu1 %244  ;;  %v210_v59 = vpop.permute.xlu2 %209 }
 0x202   :  { %v344_v53 = vsel %vm339_vm5, %v336_v52, %v245_v51  ;;  %v337_v11 = vsel %vm331_vm4, %v4364_v54, %v210_v59 }
 0x203   :  { %v352_v18 = vsel %vm347_vm6, %v344_v53, %v282_v46 }
 0x209   :  { %v319_v26 = vpop.permute.xlu1 %318  ;;  %v284_v4 = vpop.permute.xlu2 %283 }
 0x20a   :  { %v360_v55 = vsel %vm355_vm7, %v352_v18, %v319_v26 }
 0x20b   :  { %3600 = vmatmul.msk.f32.gmra.mxu0 %vm371_vm8, %v360_v55 }
 0x210   :  { %v413_v14 = vpop.f32.mrf.mxu0 }
 0x211   :  { %v1257_v57 = vpop.permute.xlu1 %1256  ;;  %v1223_v15 = vpop.permute.xlu2 %1222  ;;  %v414_v54 = vadd.f32 %v4484_v62, %v413_v14 }
 0x212   :  { %v1351_v60 = vsel %vm339_vm5, %v1344_v58, %v1257_v57  ;;  %v1345_v30 = vsel %vm331_vm4, %v4229_v20, %v1223_v15 }
 0x213   :  { %v1358_v0 = vsel %vm347_vm6, %v1351_v60, %v1293_v56  ;;  %v4508_v2 = vmax.f32 %v414_v54, 0.0 }
 0x215   :  { %v550_v31 = vrot.slane %v4508_v2, 4  ;;  %v448_v33 = vrot.slane %v4508_v2, 1  ;;  %v482_v43 = vrot.slane %v4508_v2, 2  ;;  %v516_v51 = vrot.slane %v4508_v2, 3 }
 0x219   :  { %v1329_v34 = vpop.permute.xlu1 %1328  ;;  %v1295_v28 = vpop.permute.xlu2 %1294 }
 0x21a   :  { %v1365_v12 = vsel %vm355_vm7, %v1358_v0, %v1329_v34 }
 0x21b   :  { %3624 = vmatmul.msk.f32.gmra.mxu3 %vm371_vm8, %v1365_v12 }
 0x21f   :  { %v1408_v5 = vpop.f32.mrf.mxu3 }
 0x220   :  { %v1409_v19 = vadd.f32 %v4484_v62, %v1408_v5 }
 0x221   :  { %v247_v7 = vpop.permute.xlu1 %246  ;;  %v212_v41 = vpop.permute.xlu2 %211 }
 0x222   :  { %v4493_v8 = vmax.f32 %v1409_v19, 0.0  ;;  %v345_v13 = vsel %vm339_vm5, %v337_v11, %v247_v7  ;;  %v338_v49 = vsel %vm331_vm4, %v4402_v3, %v212_v41  ;;  %vm1000_vm4 = vcmask 654336  }
 0x223   :  { %v353_v23 = vsel %vm347_vm6, %v345_v13, %v284_v4 }
 0x224   :  { %v1509_v10 = vrot.slane %v4493_v8, 3  ;;  %v1441_v22 = vrot.slane %v4493_v8, 1  ;;  %v1475_v48 = vrot.slane %v4493_v8, 2  ;;  %v1543_v34 = vrot.slane %v4493_v8, 4 }
 0x226   :  { %v1510_v24 = vsel %vm257_vm0, %v1508_v9, %v1509_v10  ;;  %v1442_v44 = vsel %vm183_vm1, %v1440_v42, %v1441_v22  ;;  %v1476_v26 = vsel %vm220_vm3, %v1474_v50, %v1475_v48  ;;  %v1544_v7 = vsel %vm294_vm2, %v1542_v1, %v1543_v34  ;;  %v618_v50 = vld [vmem:[%s5793_s3 + $0x20] sm:$0xff] }
 0x227   :  { %1521 = vrot.lane.b32.xlu0 %v1510_v24, %s4094_s1 }
 0x229   :  { %v321_v16 = vpop.permute.xlu1 %320  ;;  %v286_v53 = vpop.permute.xlu2 %285 }
 0x22a   :  { %v361_v21 = vsel %vm355_vm7, %v353_v23, %v321_v16 }
 0x22b   :  { %3601 = vmatmul.msk.f32.gmra.mxu0 %vm371_vm8, %v361_v21 }
 0x230   :  { %v416_v47 = vpop.f32.mrf.mxu0 }
 0x231   :  { %v417_v25 = vadd.f32 %v4484_v62, %v416_v47  ;;  %v1259_v27 = vpop.permute.xlu1 %1258 }
 0x232   :  { %v1352_v36 = vsel %vm339_vm5, %v1345_v30, %v1259_v27 }
 0x233   :  { %v4511_v29 = vmax.f32 %v417_v25, 0.0  ;;  %v1359_v39 = vsel %vm347_vm6, %v1352_v36, %v1295_v28 }
 0x235   :  { %v551_v32 = vrot.slane %v4511_v29, 4  ;;  %v449_v35 = vrot.slane %v4511_v29, 1  ;;  %v483_v40 = vrot.slane %v4511_v29, 2  ;;  %v517_v63 = vrot.slane %v4511_v29, 3 }
 0x237   :  { %v552_v37 = vsel %vm294_vm2, %v550_v31, %v551_v32  ;;  %v450_v38 = vsel %vm183_vm1, %v448_v33, %v449_v35  ;;  %v484_v45 = vsel %vm220_vm3, %v482_v43, %v483_v40  ;;  %v518_v18 = vsel %vm257_vm0, %v516_v51, %v517_v63  ;;  %v617_v51 = vld [vmem:[%s5793_s3 + $0x18] sm:$0xff] }
 0x238   :  { %563 = vrot.lane.b32.xlu1 %v552_v37, %s4095_s17  ;;  %461 = vrot.lane.b32.xlu2 %v450_v38, %s4093_s26 }
 0x239   :  { %v1331_v20 = vpop.permute.xlu1 %1330 }
 0x23a   :  { %v1366_v17 = vsel %vm355_vm7, %v1359_v39, %v1331_v20 }
 0x23b   :  { %3625 = vmatmul.msk.f32.gmra.mxu3 %vm371_vm8, %v1366_v17 }
 0x23e   :  { %v1411_v55 = vpop.f32.mrf.mxu3 }
 0x23f   :  { %v1412_v60 = vadd.f32 %v4484_v62, %v1411_v55  ;;  %v615_v55 = vld [vmem:[%s5793_s3 + $0x8] sm:$0xff] }
 0x240   :  { %1453 = vrot.lane.b32.xlu1 %v1442_v44, %s4093_s26  ;;  %495 = vrot.lane.b32.xlu2 %v484_v45, %s4092_s7  ;;  %v621_v45 = vld [vmem:[%s5793_s3 + $0x38] sm:$0xf] }
 0x241   :  { %v249_v46 = vpop.permute.xlu1 %248  ;;  %v4557_v4 = vmax.f32 %v1412_v60, 0.0  ;;  %3603 = vmatpush.msk.msra.mxu1 %vm294_vm2, %v621_v45  ;;  %3626 = vmatpush.msk.msrb.mxu0 %vm294_vm2, %v621_v45 }
 0x242   :  { %v346_v52 = vsel %vm339_vm5, %v338_v49, %v249_v46  ;;  %v619_v49 = vld [vmem:[%s5793_s3 + $0x28] sm:$0xff] }
 0x243   :  { %v354_v58 = vsel %vm347_vm6, %v346_v52, %v286_v53  ;;  %v1443_v11 = vrot.slane %v4557_v4, 1  ;;  %v1477_v16 = vrot.slane %v4557_v4, 2  ;;  %v1545_v23 = vrot.slane %v4557_v4, 4  ;;  %v616_v52 = vld [vmem:[%s5793_s3 + $0x10] sm:$0xff] }
 0x244   :  { %v1511_v21 = vrot.slane %v4557_v4, 3 }
 0x245   :  { %v1444_v14 = vsel %vm183_vm1, %v1441_v22, %v1443_v11  ;;  %v1478_v54 = vsel %vm220_vm3, %v1475_v48, %v1477_v16  ;;  %v1546_v47 = vsel %vm294_vm2, %v1543_v34, %v1545_v23 }
 0x246   :  { %v1512_v25 = vsel %vm257_vm0, %v1509_v10, %v1511_v21 }
 0x248   :  { %v419_v56 = vpop.f32.mrf.mxu0  ;;  %1487 = vrot.lane.b32.xlu1 %v1476_v26, %s4092_s7  ;;  %529 = vrot.lane.b32.xlu2 %v518_v18, %s4094_s1 }
 0x249   :  { %v420_v57 = vadd.f32 %v4484_v62, %v419_v56  ;;  %v323_v3 = vpop.permute.xlu1 %322 }
 0x24a   :  { %v362_v59 = vsel %vm355_vm7, %v354_v58, %v323_v3  ;;  %v614_v3 = vld [vmem:[%s5793_s3] sm:$0xff] }
 0x24b   :  { %v4550_v61 = vmax.f32 %v420_v57, 0.0  ;;  %3602 = vmatmul.msk.f32.gmra.mxu0 %vm371_vm8, %v362_v59 }
 0x24d   :  { %v451_v0 = vrot.slane %v4550_v61, 1  ;;  %v519_v12 = vrot.slane %v4550_v61, 3  ;;  %v553_v9 = vrot.slane %v4550_v61, 4  ;;  %v485_v13 = vrot.slane %v4550_v61, 2 }
 0x24f   :  { %v452_v5 = vsel %vm183_vm1, %v449_v35, %v451_v0  ;;  %v520_v19 = vsel %vm257_vm0, %v517_v63, %v519_v12  ;;  %v554_v24 = vsel %vm294_vm2, %v551_v32, %v553_v9  ;;  %v486_v15 = vsel %vm220_vm3, %v483_v40, %v485_v13  ;;  %v620_v63 = vld [vmem:[%s5793_s3 + $0x30] sm:$0xff]  ;;  %s4096_s3 = smov 72  }
 0x250   :  { %463 = vrot.lane.b32.xlu0 %v452_v5, %s4093_s26  ;;  %531 = vrot.lane.b32.xlu1 %v520_v19, %s4094_s1 }
 0x251   :  { %1555 = vrot.lane.b32.xlu2 %v1544_v7, %s4095_s17  ;;  %660 = vmatpush.msra.mxu1 %v620_v63 }
 0x252   :  { %1634 = vmatpush.msrb.mxu0 %v620_v63 }
 0x253   :  { %661 = vmatpush.msra.mxu1 %v619_v49 }
 0x254   :  { %1635 = vmatpush.msrb.mxu0 %v619_v49 }
 0x255   :  { %662 = vmatpush.msra.mxu1 %v618_v50 }
 0x256   :  { %1636 = vmatpush.msrb.mxu0 %v618_v50 }
 0x257   :  { %663 = vmatpush.msra.mxu1 %v617_v51 }
 0x258   :  { %565 = vrot.lane.b32.xlu0 %v554_v24, %s4095_s17  ;;  %1455 = vrot.lane.b32.xlu1 %v1444_v14, %s4093_s26 }
 0x259   :  { %497 = vrot.lane.b32.xlu2 %v486_v15, %s4092_s7  ;;  %1637 = vmatpush.msrb.mxu0 %v617_v51 }
 0x25a   :  { %664 = vmatpush.msra.mxu1 %v616_v52 }
 0x25b   :  { %1638 = vmatpush.msrb.mxu0 %v616_v52 }
 0x25c   :  { %665 = vmatpush.msra.mxu1 %v615_v55 }
 0x25d   :  { %1639 = vmatpush.msrb.mxu0 %v615_v55 }
 0x25e   :  { %v1414_v27 = vpop.f32.mrf.mxu3  ;;  %666 = vmatpush.msra.mxu1 %v614_v3 }
 0x25f   :  { %v1415_v31 = vadd.f32 %v4484_v62, %v1414_v27  ;;  %1640 = vmatpush.msrb.mxu0 %v614_v3 }
 0x260   :  { %1489 = vrot.lane.b32.xlu0 %v1478_v54, %s4092_s7  ;;  %1557 = vrot.lane.b32.xlu1 %v1546_v47, %s4095_s17 }
 0x261   :  { %1523 = vrot.lane.b32.xlu2 %v1512_v25, %s4094_s1  ;;  %v4592_v36 = vmax.f32 %v1415_v31, 0.0 }
 0x263   :  { %v1445_v17 = vrot.slane %v4592_v36, 1  ;;  %v1513_v22 = vrot.slane %v4592_v36, 3  ;;  %v1479_v43 = vrot.slane %v4592_v36, 2  ;;  %v1547_v44 = vrot.slane %v4592_v36, 4 }
 0x265   :  { %v1446_v41 = vsel %vm183_vm1, %v1443_v11, %v1445_v17  ;;  %v1514_v42 = vsel %vm257_vm0, %v1511_v21, %v1513_v22  ;;  %v1480_v46 = vsel %vm220_vm3, %v1477_v16, %v1479_v43  ;;  %v1548_v48 = vsel %vm294_vm2, %v1545_v23, %v1547_v44 }
 0x268   :  { %v422_v28 = vpop.f32.mrf.mxu0 }
 0x269   :  { %v423_v30 = vadd.f32 %v4484_v62, %v422_v28 }
 0x26b   :  { %v4587_v32 = vmax.f32 %v423_v30, 0.0 }
 0x26d   :  { %v453_v33 = vrot.slane %v4587_v32, 1  ;;  %v521_v35 = vrot.slane %v4587_v32, 3  ;;  %v487_v10 = vrot.slane %v4587_v32, 2  ;;  %v555_v39 = vrot.slane %v4587_v32, 4 }
 0x26f   :  { %v454_v37 = vsel %vm183_vm1, %v451_v0, %v453_v33  ;;  %v522_v38 = vsel %vm257_vm0, %v519_v12, %v521_v35  ;;  %v488_v20 = vsel %vm220_vm3, %v485_v13, %v487_v10  ;;  %v556_v40 = vsel %vm294_vm2, %v553_v9, %v555_v39 }
 0x270   :  { %465 = vrot.lane.b32.xlu2 %v454_v37, %s4093_s26  ;;  %533 = vrot.lane.b32.xlu0 %v522_v38, %s4094_s1 }
 0x271   :  { %499 = vrot.lane.b32.xlu1 %v488_v20, %s4092_s7 }
 0x278   :  { %567 = vrot.lane.b32.xlu2 %v556_v40, %s4095_s17  ;;  %1457 = vrot.lane.b32.xlu0 %v1446_v41, %s4093_s26 }
 0x279   :  { %1525 = vrot.lane.b32.xlu1 %v1514_v42, %s4094_s1 }
 0x27e   :  { %v1417_v53 = vpop.f32.mrf.mxu3 }
 0x27f   :  { %v1418_v56 = vadd.f32 %v4484_v62, %v1417_v53 }
 0x280   :  { %1491 = vrot.lane.b32.xlu2 %v1480_v46, %s4092_s7  ;;  %1559 = vrot.lane.b32.xlu0 %v1548_v48, %s4095_s17 }
 0x281   :  { %v4650_v34 = vmax.f32 %v1418_v56, 0.0 }
 0x283   :  { %v1447_v19 = vrot.slane %v4650_v34, 1  ;;  %v1515_v7 = vrot.slane %v4650_v34, 3  ;;  %v1549_v14 = vrot.slane %v4650_v34, 4  ;;  %v1481_v15 = vrot.slane %v4650_v34, 2 }
 0x285   :  { %v1448_v11 = vsel %vm183_vm1, %v1445_v17, %v1447_v19  ;;  %v1516_v13 = vsel %vm257_vm0, %v1513_v22, %v1515_v7  ;;  %v1550_v23 = vsel %vm294_vm2, %v1547_v44, %v1549_v14  ;;  %v1482_v21 = vsel %vm220_vm3, %v1479_v43, %v1481_v15 }
 0x288   :  { %v425_v26 = vpop.f32.mrf.mxu0 }
 0x289   :  { %v426_v18 = vadd.f32 %v4484_v62, %v425_v26 }
 0x28b   :  { %v4642_v57 = vmax.f32 %v426_v18, 0.0 }
 0x28d   :  { %v523_v58 = vrot.slane %v4642_v57, 3  ;;  %v489_v59 = vrot.slane %v4642_v57, 2  ;;  %v455_v60 = vrot.slane %v4642_v57, 1  ;;  %v557_v9 = vrot.slane %v4642_v57, 4 }
 0x28f   :  { %v524_v0 = vsel %vm257_vm0, %v521_v35, %v523_v58  ;;  %v490_v12 = vsel %vm220_vm3, %v487_v10, %v489_v59  ;;  %v456_v1 = vsel %vm183_vm1, %v453_v33, %v455_v60  ;;  %v558_v24 = vsel %vm294_vm2, %v555_v39, %v557_v9 }
 0x290   :  { %535 = vrot.lane.b32.xlu2 %v524_v0, %s4094_s1  ;;  %501 = vrot.lane.b32.xlu0 %v490_v12, %s4092_s7 }
 0x291   :  { %467 = vrot.lane.b32.xlu1 %v456_v1, %s4093_s26 }
 0x292   :  { %v462_v5 = vpop.permute.xlu2 %461 }
 0x293   :  { %v584_v47 = vsel %vm339_vm5, %v4508_v2, %v462_v5 }
 0x298   :  { %1459 = vrot.lane.b32.xlu2 %v1448_v11, %s4093_s26  ;;  %1527 = vrot.lane.b32.xlu0 %v1516_v13, %s4094_s1 }
 0x299   :  { %569 = vrot.lane.b32.xlu1 %v558_v24, %s4095_s17  ;;  %v1522_v63 = vpop.permute.xlu0 %1521 }
 0x29a   :  { %v496_v16 = vpop.permute.xlu2 %495 }
 0x29b   :  { %v591_v28 = vsel %vm355_vm7, %v584_v47, %v496_v16 }
 0x29e   :  { %v1420_v25 = vpop.f32.mrf.mxu3 }
 0x29f   :  { %v1421_v35 = vadd.f32 %v4484_v62, %v1420_v25 }
 0x2a0   :  { %1561 = vrot.lane.b32.xlu2 %v1550_v23, %s4095_s17 }
 0x2a1   :  { %1493 = vrot.lane.b32.xlu1 %v1482_v21, %s4092_s7  ;;  %v4688_v39 = vmax.f32 %v1421_v35, 0.0 }
 0x2a2   :  { %v530_v54 = vpop.permute.xlu2 %529 }
 0x2a3   :  { %v599_v31 = vsel %vm598_vm9, %v591_v28, %v530_v54  ;;  %v1517_v42 = vrot.slane %v4688_v39, 3  ;;  %v1449_v44 = vrot.slane %v4688_v39, 1  ;;  %v1483_v52 = vrot.slane %v4688_v39, 2 }
 0x2a4   :  { %v1551_v18 = vrot.slane %v4688_v39, 4 }
 0x2a5   :  { %v1518_v45 = vsel %vm257_vm0, %v1515_v7, %v1517_v42  ;;  %v1450_v48 = vsel %vm183_vm1, %v1447_v19, %v1449_v44  ;;  %v1484_v56 = vsel %vm220_vm3, %v1481_v15, %v1483_v52 }
 0x2a8   :  { %v428_v27 = vpop.f32.mrf.mxu0 }
 0x2a9   :  { %v429_v30 = vadd.f32 %v4484_v62, %v428_v27 }
 0x2aa   :  { %v564_v33 = vpop.permute.xlu1 %563 }
 0x2ab   :  { %v4681_v10 = vmax.f32 %v429_v30, 0.0  ;;  %v607_v37 = vsel %vm606_vm10, %v599_v31, %v564_v33  ;;  %v1556_v53 = vpop.permute.xlu2 %1555 }
 0x2ac   :  { %3604 = vmatmul.msk.f32.vlgmr.msra.gmra.mxu1 %vm626_vm11, %v607_v37 }
 0x2ad   :  { %v491_v2 = vrot.slane %v4681_v10, 2  ;;  %v457_v38 = vrot.slane %v4681_v10, 1  ;;  %v525_v20 = vrot.slane %v4681_v10, 3  ;;  %v559_v43 = vrot.slane %v4681_v10, 4 }
 0x2af   :  { %v492_v17 = vsel %vm220_vm3, %v489_v59, %v491_v2  ;;  %v458_v22 = vsel %vm183_vm1, %v455_v60, %v457_v38  ;;  %v526_v40 = vsel %vm257_vm0, %v523_v58, %v525_v20  ;;  %v560_v46 = vsel %vm294_vm2, %v557_v9, %v559_v43 }
 0x2b0   :  { %503 = vrot.lane.b32.xlu2 %v492_v17, %s4092_s7  ;;  %469 = vrot.lane.b32.xlu0 %v458_v22, %s4093_s26 }
 0x2b1   :  { %537 = vrot.lane.b32.xlu1 %v526_v40, %s4094_s1 }
 0x2b2   :  { %v1454_v41 = vpop.permute.xlu1 %1453 }
 0x2b3   :  { %v1576_v49 = vsel %vm339_vm5, %v4490_v6, %v1454_v41  ;;  %v1552_v6 = vsel %vm294_vm2, %v1549_v14, %v1551_v18  ;;  %v498_v60 = vpop.permute.xlu2 %497 }
 0x2b8   :  { %1529 = vrot.lane.b32.xlu2 %v1518_v45, %s4094_s1  ;;  %571 = vrot.lane.b32.xlu0 %v560_v46, %s4095_s17 }
 0x2b9   :  { %1461 = vrot.lane.b32.xlu1 %v1450_v48, %s4093_s26 }
 0x2ba   :  { %v1488_v50 = vpop.permute.xlu1 %1487 }
 0x2bb   :  { %v1583_v51 = vsel %vm355_vm7, %v1576_v49, %v1488_v50  ;;  %v1524_v15 = vpop.permute.xlu2 %1523 }
 0x2bc   :  { %v1590_v26 = vsel %vm598_vm9, %v1583_v51, %v1522_v63 }
 0x2bd   :  { %v1597_v55 = vsel %vm606_vm10, %v1590_v26, %v1556_v53 }
 0x2be   :  { %3627 = vmatmul.msk.f32.vlgmr.msrb.gmra.mxu0 %vm626_vm11, %v1597_v55  ;;  %v1423_v24 = vpop.f32.mrf.mxu3 }
 0x2bf   :  { %v1424_v16 = vadd.f32 %v4484_v62, %v1423_v24 }
 0x2c0   :  { %1495 = vrot.lane.b32.xlu0 %v1484_v56, %s4092_s7 }
 0x2c1   :  { %1563 = vrot.lane.b32.xlu1 %v1552_v6, %s4095_s17  ;;  %v4751_v30 = vmax.f32 %v1424_v16, 0.0 }
 0x2c2   :  { %v532_v3 = vpop.permute.xlu1 %531  ;;  %v464_v58 = vpop.permute.xlu0 %463 }
 0x2c3   :  { %v585_v59 = vsel %vm339_vm5, %v4511_v29, %v464_v58  ;;  %v1451_v37 = vrot.slane %v4751_v30, 1  ;;  %v1553_v22 = vrot.slane %v4751_v30, 4 }
 0x2c4   :  { %v592_v0 = vsel %vm355_vm7, %v585_v59, %v498_v60 }
 0x2c5   :  { %v600_v9 = vsel %vm598_vm9, %v592_v0, %v532_v3  ;;  %v1554_v48 = vsel %vm294_vm2, %v1551_v18, %v1553_v22 }
 0x2c8   :  { %v431_v12 = vpop.f32.mrf.mxu0 }
 0x2c9   :  { %v432_v1 = vadd.f32 %v4484_v62, %v431_v12 }
 0x2ca   :  { %v1456_v19 = vpop.permute.xlu1 %1455  ;;  %v566_v7 = vpop.permute.xlu0 %565 }
 0x2cb   :  { %v4733_v5 = vmax.f32 %v432_v1, 0.0  ;;  %v608_v11 = vsel %vm606_vm10, %v600_v9, %v566_v7  ;;  %v1577_v21 = vsel %vm339_vm5, %v4493_v8, %v1456_v19  ;;  %v466_v35 = vpop.permute.xlu2 %465 }
 0x2cc   :  { %3605 = vmatmul.msk.f32.gmra.mxu1 %vm626_vm11, %v608_v11  ;;  %v586_v40 = vsel %vm339_vm5, %v4550_v61, %v466_v35 }
 0x2cd   :  { %v493_v13 = vrot.slane %v4733_v5, 2  ;;  %v459_v29 = vrot.slane %v4733_v5, 1  ;;  %v527_v23 = vrot.slane %v4733_v5, 3  ;;  %v561_v47 = vrot.slane %v4733_v5, 4 }
 0x2cf   :  { %507 = vrot.lane.b32.xlu0 %v493_v13, %s4092_s7  ;;  %473 = vrot.lane.b32.xlu1 %v459_v29, %s4093_s26  ;;  %v460_v14 = vsel %vm183_vm1, %v457_v38, %v459_v29  ;;  %v528_v62 = vsel %vm257_vm0, %v525_v20, %v527_v23  ;;  %v494_v8 = vsel %vm220_vm3, %v491_v2, %v493_v13  ;;  %v1519_v38 = vrot.slane %v4751_v30, 3 }
 0x2d0   :  { %471 = vrot.lane.b32.xlu2 %v460_v14, %s4093_s26  ;;  %v562_v33 = vsel %vm294_vm2, %v559_v43, %v561_v47  ;;  %v1452_v20 = vsel %vm183_vm1, %v1449_v44, %v1451_v37  ;;  %v1485_v43 = vrot.slane %v4751_v30, 2 }
 0x2d1   :  { %v1520_v2 = vsel %vm257_vm0, %v1517_v42, %v1519_v38 }
 0x2d2   :  { %v1490_v54 = vpop.permute.xlu0 %1489  ;;  %v1558_v27 = vpop.permute.xlu1 %1557  ;;  %v1486_v61 = vsel %vm220_vm3, %v1483_v52, %v1485_v43 }
 0x2d3   :  { %v1584_v25 = vsel %vm355_vm7, %v1577_v21, %v1490_v54  ;;  %v568_v44 = vpop.permute.xlu2 %567 }
 0x2d4   :  { %v1591_v28 = vsel %vm598_vm9, %v1584_v25, %v1524_v15 }
 0x2d5   :  { %v1598_v31 = vsel %vm606_vm10, %v1591_v28, %v1558_v27 }
 0x2d6   :  { %3628 = vmatmul.msk.f32.gmra.mxu0 %vm626_vm11, %v1598_v31 }
 0x2d7   :  { %539 = vrot.lane.b32.xlu0 %v528_v62, %s4094_s1  ;;  %505 = vrot.lane.b32.xlu1 %v494_v8, %s4092_s7 }
 0x2d8   :  { %573 = vrot.lane.b32.xlu2 %v562_v33, %s4095_s17 }
 0x2db   :  { %v1492_v50 = vpop.permute.xlu2 %1491 }
 0x2df   :  { %1463 = vrot.lane.b32.xlu0 %v1452_v20, %s4093_s26  ;;  %1531 = vrot.lane.b32.xlu1 %v1520_v2, %s4094_s1 }
 0x2e0   :  { %1465 = vrot.lane.b32.xlu2 %v1451_v37, %s4093_s26  ;;  %v4829_v37 = vld [vmem:[#allocation5] ss:$0 sm:$0xff]  ;;  %s4097_s26 = smov 96  }
 0x2e2   :  { %v534_v17 = vpop.permute.xlu0 %533 }
 0x2e3   :  { %v500_v41 = vpop.permute.xlu1 %499 }
 0x2e4   :  { %v593_v45 = vsel %vm355_vm7, %v586_v40, %v500_v41 }
 0x2e5   :  { %v601_v46 = vsel %vm598_vm9, %v593_v45, %v534_v17 }
 0x2e6   :  { %v609_v42 = vsel %vm606_vm10, %v601_v46, %v568_v44 }
 0x2e7   :  { %3606 = vmatmul.msk.f32.gmra.mxu1 %vm626_vm11, %v609_v42  ;;  %1565 = vrot.lane.b32.xlu0 %v1554_v48, %s4095_s17 }
 0x2e8   :  { %1499 = vrot.lane.b32.xlu1 %v1485_v43, %s4092_s7  ;;  %1497 = vrot.lane.b32.xlu2 %v1486_v61, %s4092_s7 }
 0x2ea   :  { %v1458_v63 = vpop.permute.xlu0 %1457 }
 0x2eb   :  { %v1578_v49 = vsel %vm339_vm5, %v4557_v4, %v1458_v63  ;;  %v1526_v53 = vpop.permute.xlu1 %1525  ;;  %v536_v4 = vpop.permute.xlu2 %535 }
 0x2ec   :  { %v1585_v51 = vsel %vm355_vm7, %v1578_v49, %v1492_v50 }
 0x2ed   :  { %v1592_v52 = vsel %vm598_vm9, %v1585_v51, %v1526_v53 }
 0x2ef   :  { %1533 = vrot.lane.b32.xlu0 %v1519_v38, %s4094_s1 }
 0x2f0   :  { %575 = vrot.lane.b32.xlu1 %v561_v47, %s4095_s17  ;;  %541 = vrot.lane.b32.xlu2 %v527_v23, %s4094_s1 }
 0x2f2   :  { %v1560_v26 = vpop.permute.xlu0 %1559 }
 0x2f3   :  { %v1599_v18 = vsel %vm606_vm10, %v1592_v52, %v1560_v26  ;;  %v1460_v58 = vpop.permute.xlu2 %1459 }
 0x2f4   :  { %3629 = vmatmul.msk.f32.gmra.mxu0 %vm626_vm11, %v1599_v18  ;;  %v1579_v12 = vsel %vm339_vm5, %v4592_v36, %v1460_v58 }
 0x2f8   :  { %1567 = vrot.lane.b32.xlu2 %v1553_v22, %s4095_s17 }
 0x2fb   :  { %v1562_v9 = vpop.permute.xlu2 %1561 }
 0x302   :  { %v502_v6 = vpop.permute.xlu0 %501 }
 0x303   :  { %v468_v55 = vpop.permute.xlu1 %467 }
 0x304   :  { %v587_v56 = vsel %vm339_vm5, %v4587_v32, %v468_v55 }
 0x305   :  { %v594_v3 = vsel %vm355_vm7, %v587_v56, %v502_v6 }
 0x306   :  { %v602_v60 = vsel %vm598_vm9, %v594_v3, %v536_v4 }
 0x30a   :  { %v1528_v19 = vpop.permute.xlu0 %1527  ;;  %v504_v13 = vpop.permute.xlu2 %503 }
 0x30b   :  { %v570_v59 = vpop.permute.xlu1 %569 }
 0x30c   :  { %v610_v0 = vsel %vm606_vm10, %v602_v60, %v570_v59 }
 0x30d   :  { %3607 = vmatmul.msk.f32.gmra.mxu1 %vm626_vm11, %v610_v0 }
 0x312   :  { %v1530_v36 = vpop.permute.xlu2 %1529 }
 0x313   :  { %v1494_v1 = vpop.permute.xlu1 %1493 }
 0x314   :  { %v1586_v7 = vsel %vm355_vm7, %v1579_v12, %v1494_v1 }
 0x315   :  { %v1593_v32 = vsel %vm598_vm9, %v1586_v7, %v1528_v19 }
 0x316   :  { %v1600_v11 = vsel %vm606_vm10, %v1593_v32, %v1562_v9 }
 0x317   :  { %3630 = vmatmul.msk.f32.gmra.mxu0 %vm626_vm11, %v1600_v11 }
 0x322   :  { %v470_v29 = vpop.permute.xlu0 %469 }
 0x323   :  { %v538_v24 = vpop.permute.xlu1 %537  ;;  %v588_v14 = vsel %vm339_vm5, %v4642_v57, %v470_v29 }
 0x324   :  { %v595_v15 = vsel %vm355_vm7, %v588_v14, %v504_v13 }
 0x325   :  { %v603_v23 = vsel %vm598_vm9, %v595_v15, %v538_v24 }
 0x329   :  { %v668_v38 = vpop.f32.mrf.mxu1 }
 0x32a   :  { %v572_v16 = vpop.permute.xlu0 %571  ;;  %v472_v47 = vpop.permute.xlu2 %471 }
 0x32b   :  { %v1462_v21 = vpop.permute.xlu1 %1461  ;;  %v611_v54 = vsel %vm606_vm10, %v603_v23, %v572_v16  ;;  %v589_v22 = vsel %vm339_vm5, %v4681_v10, %v472_v47 }
 0x32c   :  { %3608 = vmatmul.msk.f32.gmra.mxu1 %vm626_vm11, %v611_v54  ;;  %v1580_v25 = vsel %vm339_vm5, %v4650_v34, %v1462_v21  ;;  %v669_v34 = vadd.f32 %v4829_v37, %v668_v38 }
 0x32e   :  { %v4832_v17 = vmax.f32 %v669_v34, 0.0 }
 0x330   :  { %v765_v63 = vrot.slane %v4832_v17, 3  ;;  %v734_v10 = vrot.slane %v4832_v17, 2  ;;  %v703_v51 = vrot.slane %v4832_v17, 1  ;;  %v796_v19 = vrot.slane %v4832_v17, 4 }
 0x332   :  { %v1496_v27 = vpop.permute.xlu0 %1495  ;;  %v574_v8 = vpop.permute.xlu2 %573 }
 0x333   :  { %v1587_v28 = vsel %vm355_vm7, %v1580_v25, %v1496_v27  ;;  %v1564_v31 = vpop.permute.xlu1 %1563 }
 0x334   :  { %v1594_v57 = vsel %vm598_vm9, %v1587_v28, %v1530_v36 }
 0x335   :  { %v1601_v62 = vsel %vm606_vm10, %v1594_v57, %v1564_v31 }
 0x336   :  { %3631 = vmatmul.msk.f32.gmra.mxu0 %vm626_vm11, %v1601_v62 }
 0x33a   :  { %v1466_v20 = vpop.permute.xlu2 %1465 }
 0x33b   :  { %v1642_v45 = vpop.f32.mrf.mxu0  ;;  %v1582_v54 = vsel %vm339_vm5, %v4751_v30, %v1466_v20 }
 0x33c   :  { %v1643_v26 = vadd.f32 %v4829_v37, %v1642_v45 }
 0x33e   :  { %v4864_v3 = vmax.f32 %v1643_v26, 0.0 }
 0x340   :  { %v1739_v7 = vrot.slane %v4864_v3, 3  ;;  %v1708_v47 = vrot.slane %v4864_v3, 2  ;;  %v1770_v31 = vrot.slane %v4864_v3, 4 }
 0x341   :  { %v474_v33 = vpop.permute.xlu1 %473  ;;  %v4827_v35 = vpop.permute.xlu0 %507 }
 0x342   :  { %v1498_v61 = vpop.permute.xlu2 %1497  ;;  %v590_v16 = vsel %vm339_vm5, %v4733_v5, %v474_v33 }
 0x343   :  { %v597_v25 = vsel %vm355_vm7, %v590_v16, %v4827_v35 }
 0x349   :  { %v540_v2 = vpop.permute.xlu0 %539  ;;  %v506_v40 = vpop.permute.xlu1 %505 }
 0x34a   :  { %v671_v41 = vpop.f32.mrf.mxu1  ;;  %v596_v43 = vsel %vm355_vm7, %v589_v22, %v506_v40  ;;  %v542_v1 = vpop.permute.xlu2 %541 }
 0x34b   :  { %v672_v44 = vadd.f32 %v4829_v37, %v671_v41  ;;  %v604_v46 = vsel %vm598_vm9, %v596_v43, %v540_v2  ;;  %v605_v57 = vsel %vm598_vm9, %v597_v25, %v542_v1 }
 0x34c   :  { %v612_v48 = vsel %vm606_vm10, %v604_v46, %v574_v8 }
 0x34d   :  { %v4839_v42 = vmax.f32 %v672_v44, 0.0  ;;  %3609 = vmatmul.msk.f32.gmra.mxu1 %vm626_vm11, %v612_v48 }
 0x34f   :  { %v766_v49 = vrot.slane %v4839_v42, 3  ;;  %v735_v50 = vrot.slane %v4839_v42, 2  ;;  %v704_v53 = vrot.slane %v4839_v42, 1  ;;  %v797_v0 = vrot.slane %v4839_v42, 4 }
 0x351   :  { %v767_v52 = vsel %vm257_vm0, %v765_v63, %v766_v49  ;;  %v736_v18 = vsel %vm220_vm3, %v734_v10, %v735_v50  ;;  %v705_v4 = vsel %vm183_vm1, %v703_v51, %v704_v53  ;;  %v1464_v55 = vpop.permute.xlu0 %1463  ;;  %v1532_v56 = vpop.permute.xlu1 %1531  ;;  %v798_v24 = vsel %vm294_vm2, %v796_v19, %v797_v0 }
 0x352   :  { %778 = vrot.lane.b32.xlu1 %v767_v52, %s4096_s3  ;;  %747 = vrot.lane.b32.xlu2 %v736_v18, %s4095_s17  ;;  %v1581_v6 = vsel %vm339_vm5, %v4688_v39, %v1464_v55  ;;  %v1677_v39 = vrot.slane %v4864_v3, 1  ;;  %v1568_v5 = vpop.permute.xlu2 %1567  ;;  %vm3573_vm5 = vcmask 25600  }
 0x353   :  { %716 = vrot.lane.b32.xlu0 %v705_v4, %s4092_s7  ;;  %v1645_v58 = vpop.f32.mrf.mxu0  ;;  %v1588_v60 = vsel %vm355_vm7, %v1581_v6, %v1498_v61  ;;  %v867_v6 = vld [vmem:[%s5795_s5 + $0x70] sm:$0xff] }
 0x354   :  { %v1646_v59 = vadd.f32 %v4829_v37, %v1645_v58  ;;  %v1595_v13 = vsel %vm598_vm9, %v1588_v60, %v1532_v56  ;;  %892 = vmatpush.msra.mxu2 %v867_v6  ;;  %1844 = vmatpush.msrb.mxu3 %v867_v6 }
 0x356   :  { %v4869_v12 = vmax.f32 %v1646_v59, 0.0 }
 0x358   :  { %v1740_v32 = vrot.slane %v4869_v12, 3  ;;  %v1678_v11 = vrot.slane %v4869_v12, 1  ;;  %v1709_v23 = vrot.slane %v4869_v12, 2  ;;  %v1771_v21 = vrot.slane %v4869_v12, 4 }
 0x359   :  { %v1566_v9 = vpop.permute.xlu0 %1565 }
 0x35a   :  { %v1500_v29 = vpop.permute.xlu1 %1499  ;;  %v1602_v14 = vsel %vm606_vm10, %v1595_v13, %v1566_v9  ;;  %v1741_v15 = vsel %vm257_vm0, %v1739_v7, %v1740_v32  ;;  %v1679_v36 = vsel %vm183_vm1, %v1677_v39, %v1678_v11  ;;  %v1710_v8 = vsel %vm220_vm3, %v1708_v47, %v1709_v23  ;;  %v866_v9 = vld [vmem:[%s5795_s5 + $0x68] sm:$0xff]  ;;  %v861_v47 = vld [vmem:[%s5795_s5 + $0x40] sm:$0xff] }
 0x35b   :  { %809 = vrot.lane.b32.xlu0 %v798_v24, %s4097_s26  ;;  %3632 = vmatmul.msk.f32.gmra.mxu0 %vm626_vm11, %v1602_v14  ;;  %v1589_v27 = vsel %vm355_vm7, %v1582_v54, %v1500_v29  ;;  %v1772_v30 = vsel %vm294_vm2, %v1770_v31, %v1771_v21  ;;  %v864_v29 = vld [vmem:[%s5795_s5 + $0x58] sm:$0xff]  ;;  %v863_v14 = vld [vmem:[%s5795_s5 + $0x50] sm:$0xff] }
 0x35c   :  { %1752 = vrot.lane.b32.xlu2 %v1741_v15, %s4096_s3  ;;  %1690 = vrot.lane.b32.xlu1 %v1679_v36, %s4092_s7  ;;  %v859_v31 = vld [vmem:[%s5795_s5 + $0x30] sm:$0xff] }
 0x35d   :  { %893 = vmatpush.msra.mxu2 %v866_v9  ;;  %1845 = vmatpush.msrb.mxu3 %v866_v9 }
 0x361   :  { %v1534_v28 = vpop.permute.xlu0 %1533 }
 0x362   :  { %v576_v62 = vpop.permute.xlu1 %575  ;;  %v1596_v33 = vsel %vm598_vm9, %v1589_v27, %v1534_v28  ;;  %v860_v27 = vld [vmem:[%s5795_s5 + $0x38] sm:$0xff] }
 0x363   :  { %1721 = vrot.lane.b32.xlu0 %v1710_v8, %s4095_s17  ;;  %v613_v38 = vsel %vm606_vm10, %v605_v57, %v576_v62  ;;  %v1603_v35 = vsel %vm606_vm10, %v1596_v33, %v1568_v5  ;;  %v858_v5 = vld [vmem:[%s5795_s5 + $0x28] sm:$0xff]  ;;  %v857_v8 = vld [vmem:[%s5795_s5 + $0x20] sm:$0xff]  ;;  %v856_v33 = vld [vmem:[%s5795_s5 + $0x18] sm:$0xff] }
 0x364   :  { %1783 = vrot.lane.b32.xlu1 %v1772_v30, %s4097_s26  ;;  %v674_v20 = vpop.f32.mrf.mxu1  ;;  %3610 = vmatmul.msk.f32.gmra.mxu1 %vm626_vm11, %v613_v38  ;;  %v855_v30 = vld [vmem:[%s5795_s5 + $0x10] sm:$0xff] }
 0x365   :  { %v675_v34 = vadd.f32 %v4829_v37, %v674_v20  ;;  %3633 = vmatmul.msk.f32.gmra.mxu0 %vm626_vm11, %v1603_v35  ;;  %v854_v20 = vld [vmem:[%s5795_s5 + $0x8] sm:$0xff] }
 0x367   :  { %v4907_v2 = vmax.f32 %v675_v34, 0.0 }
 0x369   :  { %v768_v22 = vrot.slane %v4907_v2, 3  ;;  %v737_v40 = vrot.slane %v4907_v2, 2  ;;  %v706_v41 = vrot.slane %v4907_v2, 1  ;;  %v799_v46 = vrot.slane %v4907_v2, 4 }
 0x36b   :  { %v769_v43 = vsel %vm257_vm0, %v766_v49, %v768_v22  ;;  %v738_v44 = vsel %vm220_vm3, %v735_v50, %v737_v40  ;;  %v707_v45 = vsel %vm183_vm1, %v704_v53, %v706_v41  ;;  %v800_v10 = vsel %vm294_vm2, %v797_v0, %v799_v46 }
 0x36c   :  { %780 = vrot.lane.b32.xlu0 %v769_v43, %s4096_s3  ;;  %749 = vrot.lane.b32.xlu1 %v738_v44, %s4095_s17 }
 0x36d   :  { %718 = vrot.lane.b32.xlu2 %v707_v45, %s4092_s7 }
 0x371   :  { %v1648_v48 = vpop.f32.mrf.mxu0 }
 0x372   :  { %v1649_v61 = vadd.f32 %v4829_v37, %v1648_v48 }
 0x374   :  { %v4926_v63 = vmax.f32 %v1649_v61, 0.0 }
 0x375   :  { %811 = vrot.lane.b32.xlu2 %v800_v10, %s4097_s26 }
 0x376   :  { %v1742_v49 = vrot.slane %v4926_v63, 3  ;;  %v1680_v50 = vrot.slane %v4926_v63, 1  ;;  %v1711_v26 = vrot.slane %v4926_v63, 2  ;;  %v1773_v18 = vrot.slane %v4926_v63, 4 }
 0x378   :  { %v1743_v51 = vsel %vm257_vm0, %v1740_v32, %v1742_v49  ;;  %v1681_v53 = vsel %vm183_vm1, %v1678_v11, %v1680_v50  ;;  %v1712_v52 = vsel %vm220_vm3, %v1709_v23, %v1711_v26  ;;  %v1774_v4 = vsel %vm294_vm2, %v1771_v21, %v1773_v18  ;;  %v865_v11 = vld [vmem:[%s5795_s5 + $0x60] sm:$0xff]  ;;  %v862_v23 = vld [vmem:[%s5795_s5 + $0x48] sm:$0xff] }
 0x379   :  { %1754 = vrot.lane.b32.xlu1 %v1743_v51, %s4096_s3  ;;  %1692 = vrot.lane.b32.xlu0 %v1681_v53, %s4092_s7 }
 0x37a   :  { %894 = vmatpush.msra.mxu2 %v865_v11  ;;  %1846 = vmatpush.msrb.mxu3 %v865_v11 }
 0x37c   :  { %895 = vmatpush.msra.mxu2 %v864_v29  ;;  %1847 = vmatpush.msrb.mxu3 %v864_v29 }
 0x37d   :  { %1723 = vrot.lane.b32.xlu2 %v1712_v52, %s4095_s17 }
 0x37e   :  { %896 = vmatpush.msra.mxu2 %v863_v14  ;;  %1848 = vmatpush.msrb.mxu3 %v863_v14 }
 0x380   :  { %897 = vmatpush.msra.mxu2 %v862_v23  ;;  %1849 = vmatpush.msrb.mxu3 %v862_v23 }
 0x381   :  { %1785 = vrot.lane.b32.xlu0 %v1774_v4, %s4097_s26 }
 0x382   :  { %898 = vmatpush.msra.mxu2 %v861_v47  ;;  %1850 = vmatpush.msrb.mxu3 %v861_v47 }
 0x384   :  { %899 = vmatpush.msra.mxu2 %v860_v27  ;;  %1851 = vmatpush.msrb.mxu3 %v860_v27 }
 0x386   :  { %900 = vmatpush.msra.mxu2 %v859_v31  ;;  %1852 = vmatpush.msrb.mxu3 %v859_v31 }
 0x388   :  { %901 = vmatpush.msra.mxu2 %v858_v5  ;;  %1853 = vmatpush.msrb.mxu3 %v858_v5 }
 0x38a   :  { %v677_v55 = vpop.f32.mrf.mxu1  ;;  %902 = vmatpush.msra.mxu2 %v857_v8  ;;  %1854 = vmatpush.msrb.mxu3 %v857_v8 }
 0x38b   :  { %v678_v56 = vadd.f32 %v4829_v37, %v677_v55 }
 0x38c   :  { %903 = vmatpush.msra.mxu2 %v856_v33  ;;  %1855 = vmatpush.msrb.mxu3 %v856_v33 }
 0x38d   :  { %v4946_v58 = vmax.f32 %v678_v56, 0.0 }
 0x38e   :  { %904 = vmatpush.msra.mxu2 %v855_v30  ;;  %1856 = vmatpush.msrb.mxu3 %v855_v30 }
 0x38f   :  { %v770_v59 = vrot.slane %v4946_v58, 3  ;;  %v739_v60 = vrot.slane %v4946_v58, 2  ;;  %v708_v0 = vrot.slane %v4946_v58, 1  ;;  %v801_v13 = vrot.slane %v4946_v58, 4 }
 0x390   :  { %905 = vmatpush.msra.mxu2 %v854_v20  ;;  %1857 = vmatpush.msrb.mxu3 %v854_v20 }
 0x391   :  { %v771_v1 = vsel %vm257_vm0, %v768_v22, %v770_v59  ;;  %v740_v19 = vsel %vm220_vm3, %v737_v40, %v739_v60  ;;  %v709_v7 = vsel %vm183_vm1, %v706_v41, %v708_v0  ;;  %v802_v16 = vsel %vm294_vm2, %v799_v46, %v801_v13  ;;  %v853_v22 = vld [vmem:[%s5795_s5] sm:$0xff]  ;;  %s4098_s5 = smov 64  }
 0x392   :  { %782 = vrot.lane.b32.xlu2 %v771_v1, %s4096_s3  ;;  %751 = vrot.lane.b32.xlu0 %v740_v19, %s4095_s17 }
 0x393   :  { %720 = vrot.lane.b32.xlu1 %v709_v7, %s4092_s7  ;;  %906 = vmatpush.msra.mxu2 %v853_v22 }
 0x394   :  { %v1651_v32 = vpop.f32.mrf.mxu0  ;;  %1858 = vmatpush.msrb.mxu3 %v853_v22 }
 0x395   :  { %v1652_v39 = vadd.f32 %v4829_v37, %v1651_v32 }
 0x397   :  { %v4974_v24 = vmax.f32 %v1652_v39, 0.0 }
 0x399   :  { %v1744_v15 = vrot.slane %v4974_v24, 3  ;;  %v1682_v36 = vrot.slane %v4974_v24, 1  ;;  %v1713_v25 = vrot.slane %v4974_v24, 2  ;;  %v1775_v28 = vrot.slane %v4974_v24, 4 }
 0x39b   :  { %813 = vrot.lane.b32.xlu1 %v802_v16, %s4097_s26  ;;  %v1745_v21 = vsel %vm257_vm0, %v1742_v49, %v1744_v15  ;;  %v1683_v54 = vsel %vm183_vm1, %v1680_v50, %v1682_v36  ;;  %v1714_v57 = vsel %vm220_vm3, %v1711_v26, %v1713_v25  ;;  %v1776_v62 = vsel %vm294_vm2, %v1773_v18, %v1775_v28 }
 0x39c   :  { %1756 = vrot.lane.b32.xlu0 %v1745_v21, %s4096_s3  ;;  %1694 = vrot.lane.b32.xlu2 %v1683_v54, %s4092_s7 }
 0x3a3   :  { %1725 = vrot.lane.b32.xlu1 %v1714_v57, %s4095_s17 }
 0x3a4   :  { %1787 = vrot.lane.b32.xlu2 %v1776_v62, %s4097_s26 }
 0x3a9   :  { %v680_v38 = vpop.f32.mrf.mxu1 }
 0x3aa   :  { %v681_v35 = vadd.f32 %v4829_v37, %v680_v38 }
 0x3ac   :  { %v5027_v34 = vmax.f32 %v681_v35, 0.0 }
 0x3ae   :  { %v772_v40 = vrot.slane %v5027_v34, 3  ;;  %v741_v41 = vrot.slane %v5027_v34, 2  ;;  %v710_v43 = vrot.slane %v5027_v34, 1  ;;  %v803_v10 = vrot.slane %v5027_v34, 4 }
 0x3b0   :  { %v773_v44 = vsel %vm257_vm0, %v770_v59, %v772_v40  ;;  %v742_v45 = vsel %vm220_vm3, %v739_v60, %v741_v41  ;;  %v711_v46 = vsel %vm183_vm1, %v708_v0, %v710_v43  ;;  %v804_v53 = vsel %vm294_vm2, %v801_v13, %v803_v10  ;;  %v748_v59 = vpop.permute.xlu2 %747 }
 0x3b1   :  { %784 = vrot.lane.b32.xlu1 %v773_v44, %s4096_s3  ;;  %753 = vrot.lane.b32.xlu2 %v742_v45, %s4095_s17 }
 0x3b2   :  { %722 = vrot.lane.b32.xlu0 %v711_v46, %s4092_s7 }
 0x3b3   :  { %v1654_v48 = vpop.f32.mrf.mxu0 }
 0x3b4   :  { %v1655_v61 = vadd.f32 %v4829_v37, %v1654_v48 }
 0x3b6   :  { %v5049_v49 = vmax.f32 %v1655_v61, 0.0 }
 0x3b8   :  { %v1746_v50 = vrot.slane %v5049_v49, 3  ;;  %v1684_v51 = vrot.slane %v5049_v49, 1  ;;  %v1715_v18 = vrot.slane %v5049_v49, 2  ;;  %v1777_v4 = vrot.slane %v5049_v49, 4  ;;  %v1753_v39 = vpop.permute.xlu2 %1752 }
 0x3ba   :  { %815 = vrot.lane.b32.xlu0 %v804_v53, %s4097_s26  ;;  %v1747_v26 = vsel %vm257_vm0, %v1744_v15, %v1746_v50  ;;  %v1685_v52 = vsel %vm183_vm1, %v1682_v36, %v1684_v51  ;;  %v1716_v55 = vsel %vm220_vm3, %v1713_v25, %v1715_v18  ;;  %v1778_v56 = vsel %vm294_vm2, %v1775_v28, %v1777_v4 }
 0x3bb   :  { %1758 = vrot.lane.b32.xlu2 %v1747_v26, %s4096_s3  ;;  %1696 = vrot.lane.b32.xlu1 %v1685_v52, %s4092_s7 }
 0x3c2   :  { %1727 = vrot.lane.b32.xlu0 %v1716_v55, %s4095_s17 }
 0x3c3   :  { %1789 = vrot.lane.b32.xlu1 %v1778_v56, %s4097_s26 }
 0x3c4   :  { %v779_v60 = vpop.permute.xlu1 %778 }
 0x3c5   :  { %v717_v6 = vpop.permute.xlu0 %716 }
 0x3c6   :  { %v827_v0 = vsel %vm355_vm7, %v4832_v17, %v717_v6 }
 0x3c7   :  { %v833_v1 = vsel %vm606_vm10, %v827_v0, %v748_v59  ;;  %v719_v47 = vpop.permute.xlu2 %718 }
 0x3c8   :  { %v840_v32 = vsel %vm839_vm12, %v833_v1, %v779_v60  ;;  %v828_v38 = vsel %vm355_vm7, %v4839_v42, %v719_v47 }
 0x3ca   :  { %v683_v19 = vpop.f32.mrf.mxu1 }
 0x3cb   :  { %v684_v7 = vadd.f32 %v4829_v37, %v683_v19 }
 0x3cd   :  { %v810_v9 = vpop.permute.xlu0 %809  ;;  %v5080_v11 = vmax.f32 %v684_v7, 0.0 }
 0x3ce   :  { %v1691_v13 = vpop.permute.xlu1 %1690  ;;  %v847_v29 = vsel %vm846_vm13, %v840_v32, %v810_v9 }
 0x3cf   :  { %3611 = vmatmul.msk.f32.vlgmr.msra.gmra.mxu2 %vm872_vm14, %v847_v29  ;;  %v774_v17 = vrot.slane %v5080_v11, 3  ;;  %v743_v14 = vrot.slane %v5080_v11, 2  ;;  %v712_v15 = vrot.slane %v5080_v11, 1  ;;  %v1801_v21 = vsel %vm355_vm7, %v4864_v3, %v1691_v13  ;;  %v812_v44 = vpop.permute.xlu2 %811 }
 0x3d0   :  { %v805_v31 = vrot.slane %v5080_v11, 4 }
 0x3d1   :  { %v775_v36 = vsel %vm257_vm0, %v772_v40, %v774_v17  ;;  %v744_v16 = vsel %vm220_vm3, %v741_v41, %v743_v14  ;;  %v713_v23 = vsel %vm183_vm1, %v710_v43, %v712_v15 }
 0x3d2   :  { %786 = vrot.lane.b32.xlu0 %v775_v36, %s4096_s3  ;;  %755 = vrot.lane.b32.xlu1 %v744_v16, %s4095_s17  ;;  %v806_v3 = vsel %vm294_vm2, %v803_v10, %v805_v31 }
 0x3d3   :  { %724 = vrot.lane.b32.xlu2 %v713_v23, %s4092_s7 }
 0x3d5   :  { %v1722_v54 = vpop.permute.xlu0 %1721 }
 0x3d6   :  { %v1807_v25 = vsel %vm606_vm10, %v1801_v21, %v1722_v54  ;;  %v1784_v27 = vpop.permute.xlu1 %1783 }
 0x3d7   :  { %v1813_v28 = vsel %vm839_vm12, %v1807_v25, %v1753_v39  ;;  %v1724_v1 = vpop.permute.xlu2 %1723 }
 0x3d8   :  { %v1819_v57 = vsel %vm846_vm13, %v1813_v28, %v1784_v27  ;;  %v1657_v5 = vpop.f32.mrf.mxu0 }
 0x3d9   :  { %3634 = vmatmul.msk.f32.vlgmr.msrb.gmra.mxu3 %vm872_vm14, %v1819_v57  ;;  %v1658_v62 = vadd.f32 %v4829_v37, %v1657_v5 }
 0x3db   :  { %v5101_v8 = vmax.f32 %v1658_v62, 0.0  ;;  %817 = vrot.lane.b32.xlu2 %v806_v3, %s4097_s26 }
 0x3dd   :  { %v1748_v33 = vrot.slane %v5101_v8, 3  ;;  %v1686_v30 = vrot.slane %v5101_v8, 1  ;;  %v1717_v43 = vrot.slane %v5101_v8, 2 }
 0x3de   :  { %v750_v35 = vpop.permute.xlu1 %749  ;;  %v781_v20 = vpop.permute.xlu0 %780 }
 0x3df   :  { %v834_v22 = vsel %vm606_vm10, %v828_v38, %v750_v35  ;;  %v1749_v40 = vsel %vm257_vm0, %v1746_v50, %v1748_v33  ;;  %v1687_v41 = vsel %vm183_vm1, %v1684_v51, %v1686_v30  ;;  %v1718_v10 = vsel %vm220_vm3, %v1715_v18, %v1717_v43 }
 0x3e0   :  { %v841_v45 = vsel %vm839_vm12, %v834_v22, %v781_v20  ;;  %1760 = vrot.lane.b32.xlu1 %v1749_v40, %s4096_s3  ;;  %1698 = vrot.lane.b32.xlu0 %v1687_v41, %s4092_s7  ;;  %v1779_v50 = vrot.slane %v5101_v8, 4 }
 0x3e1   :  { %v686_v46 = vpop.f32.mrf.mxu1  ;;  %v848_v42 = vsel %vm846_vm13, %v841_v45, %v812_v44 }
 0x3e2   :  { %v687_v48 = vadd.f32 %v4829_v37, %v686_v46  ;;  %3612 = vmatmul.msk.f32.gmra.mxu2 %vm872_vm14, %v848_v42  ;;  %v1660_v61 = vpop.f32.mrf.mxu0  ;;  %v1780_v52 = vsel %vm294_vm2, %v1777_v4, %v1779_v50 }
 0x3e3   :  { %v1661_v53 = vadd.f32 %v4829_v37, %v1660_v61  ;;  %1729 = vrot.lane.b32.xlu2 %v1718_v10, %s4095_s17 }
 0x3e4   :  { %v695_v51 = vmax.f32 %v687_v48, 0.0 }
 0x3e5   :  { %v1669_v56 = vmax.f32 %v1661_v53, 0.0 }
 0x3e6   :  { %v714_v26 = vrot.slane %v695_v51, 1  ;;  %v776_v55 = vrot.slane %v695_v51, 3  ;;  %v745_v60 = vrot.slane %v695_v51, 2 }
 0x3e7   :  { %v1719_v37 = vrot.slane %v1669_v56, 2  ;;  %v1688_v19 = vrot.slane %v1669_v56, 1  ;;  %v1781_v36 = vrot.slane %v1669_v56, 4 }
 0x3e8   :  { %v715_v6 = vsel %vm183_vm1, %v712_v15, %v714_v26  ;;  %1791 = vrot.lane.b32.xlu0 %v1780_v52, %s4097_s26  ;;  %v777_v18 = vsel %vm257_vm0, %v774_v17, %v776_v55  ;;  %v746_v4 = vsel %vm220_vm3, %v743_v14, %v745_v60  ;;  %v1750_v17 = vrot.slane %v1669_v56, 3 }
 0x3e9   :  { %726 = vrot.lane.b32.xlu1 %v715_v6, %s4092_s7  ;;  %v1720_v9 = vsel %vm220_vm3, %v1717_v43, %v1719_v37  ;;  %v1689_v39 = vsel %vm183_vm1, %v1686_v30, %v1688_v19  ;;  %v807_v14 = vrot.slane %v695_v51, 4  ;;  %v1782_v23 = vsel %vm294_vm2, %v1779_v50, %v1781_v36 }
 0x3ea   :  { %v1751_v15 = vsel %vm257_vm0, %v1748_v33, %v1750_v17  ;;  %vm994_vm0 = vcmask 523264   ;;  %vm996_vm1 = vcmask 916480   ;;  %vm998_vm3 = vcmask 261120  }
 0x3eb   :  { %v1693_v59 = vpop.permute.xlu0 %1692  ;;  %788 = vrot.lane.b32.xlu2 %v777_v18, %s4096_s3  ;;  %v1755_v32 = vpop.permute.xlu1 %1754  ;;  %v808_v16 = vsel %vm294_vm2, %v805_v31, %v807_v14 }
 0x3ec   :  { %v1802_v0 = vsel %vm355_vm7, %v4869_v12, %v1693_v59  ;;  %v783_v21 = vpop.permute.xlu2 %782 }
 0x3ed   :  { %v1808_v7 = vsel %vm606_vm10, %v1802_v0, %v1724_v1  ;;  %v5185_v0 = vld [vmem:[#allocation7] ss:$0 sm:$0xff] }
 0x3ee   :  { %v1814_v29 = vsel %vm839_vm12, %v1808_v7, %v1755_v32 }
 0x3f0   :  { %757 = vrot.lane.b32.xlu0 %v746_v4, %s4095_s17 }
 0x3f1   :  { %1731 = vrot.lane.b32.xlu1 %v1720_v9, %s4095_s17 }
 0x3f3   :  { %v1786_v13 = vpop.permute.xlu0 %1785  ;;  %1700 = vrot.lane.b32.xlu2 %v1689_v39, %s4092_s7  ;;  %s4099_s7 = smov 80  }
 0x3f4   :  { %v1820_v12 = vsel %vm846_vm13, %v1814_v29, %v1786_v13 }
 0x3f5   :  { %3635 = vmatmul.msk.f32.gmra.mxu3 %vm872_vm14, %v1820_v12 }
 0x3f6   :  { %v1695_v28 = vpop.permute.xlu2 %1694 }
 0x3f7   :  { %v1803_v62 = vsel %vm355_vm7, %v4926_v63, %v1695_v28 }
 0x3f8   :  { %1762 = vrot.lane.b32.xlu0 %v1751_v15, %s4096_s3  ;;  %s4100_s3 = smov 112  }
 0x3f9   :  { %819 = vrot.lane.b32.xlu1 %v808_v16, %s4097_s26 }
 0x3fb   :  { %1793 = vrot.lane.b32.xlu2 %v1782_v23, %s4097_s26 }
 0x3fe   :  { %v1788_v38 = vpop.permute.xlu2 %1787 }
 0x404   :  { %v752_v25 = vpop.permute.xlu0 %751 }
 0x405   :  { %v721_v54 = vpop.permute.xlu1 %720 }
 0x406   :  { %v829_v47 = vsel %vm355_vm7, %v4907_v2, %v721_v54 }
 0x407   :  { %v835_v27 = vsel %vm606_vm10, %v829_v47, %v752_v25 }
 0x408   :  { %v842_v5 = vsel %vm839_vm12, %v835_v27, %v783_v21 }
 0x40b   :  { %v754_v41 = vpop.permute.xlu2 %753 }
 0x40d   :  { %v814_v57 = vpop.permute.xlu1 %813 }
 0x40e   :  { %v849_v31 = vsel %vm846_vm13, %v842_v5, %v814_v57  ;;  %v1757_v33 = vpop.permute.xlu0 %1756 }
 0x40f   :  { %3613 = vmatmul.msk.f32.gmra.mxu2 %vm872_vm14, %v849_v31 }
 0x415   :  { %v1726_v3 = vpop.permute.xlu1 %1725  ;;  %v1759_v42 = vpop.permute.xlu2 %1758 }
 0x416   :  { %v1809_v30 = vsel %vm606_vm10, %v1803_v62, %v1726_v3 }
 0x417   :  { %v1815_v2 = vsel %vm839_vm12, %v1809_v30, %v1757_v33 }
 0x418   :  { %v1821_v35 = vsel %vm846_vm13, %v1815_v2, %v1788_v38 }
 0x419   :  { %3636 = vmatmul.msk.f32.gmra.mxu3 %vm872_vm14, %v1821_v35 }
 0x423   :  { %v785_v22 = vpop.permute.xlu1 %784 }
 0x424   :  { %v723_v20 = vpop.permute.xlu0 %722 }
 0x425   :  { %v830_v40 = vsel %vm355_vm7, %v4946_v58, %v723_v20 }
 0x426   :  { %v836_v43 = vsel %vm606_vm10, %v830_v40, %v754_v41 }
 0x427   :  { %v843_v44 = vsel %vm839_vm12, %v836_v43, %v785_v22 }
 0x42c   :  { %v816_v63 = vpop.permute.xlu0 %815 }
 0x42d   :  { %v1697_v45 = vpop.permute.xlu1 %1696  ;;  %v850_v46 = vsel %vm846_vm13, %v843_v44, %v816_v63  ;;  %v725_v53 = vpop.permute.xlu2 %724 }
 0x42e   :  { %3614 = vmatmul.msk.f32.gmra.mxu2 %vm872_vm14, %v850_v46  ;;  %v1804_v48 = vsel %vm355_vm7, %v4974_v24, %v1697_v45  ;;  %v831_v52 = vsel %vm355_vm7, %v5027_v34, %v725_v53 }
 0x434   :  { %v1728_v61 = vpop.permute.xlu0 %1727 }
 0x435   :  { %v1810_v10 = vsel %vm606_vm10, %v1804_v48, %v1728_v61  ;;  %v1790_v50 = vpop.permute.xlu1 %1789  ;;  %v818_v26 = vpop.permute.xlu2 %817 }
 0x436   :  { %v1816_v58 = vsel %vm839_vm12, %v1810_v10, %v1759_v42 }
 0x437   :  { %v1822_v51 = vsel %vm846_vm13, %v1816_v58, %v1790_v50 }
 0x438   :  { %3637 = vmatmul.msk.f32.gmra.mxu3 %vm872_vm14, %v1822_v51 }
 0x43d   :  { %v1730_v59 = vpop.permute.xlu2 %1729 }
 0x444   :  { %v756_v55 = vpop.permute.xlu1 %755  ;;  %v787_v56 = vpop.permute.xlu0 %786 }
 0x445   :  { %v837_v6 = vsel %vm606_vm10, %v831_v52, %v756_v55  ;;  %v789_v34 = vpop.permute.xlu2 %788 }
 0x446   :  { %v844_v24 = vsel %vm839_vm12, %v837_v6, %v787_v56 }
 0x447   :  { %v851_v18 = vsel %vm846_vm13, %v844_v24, %v818_v26 }
 0x448   :  { %3615 = vmatmul.msk.f32.gmra.mxu2 %vm872_vm14, %v851_v18 }
 0x44d   :  { %v1701_v54 = vpop.permute.xlu2 %1700 }
 0x44e   :  { %v1806_v2 = vsel %vm355_vm7, %v5101_v8, %v1701_v54 }
 0x452   :  { %v1761_v60 = vpop.permute.xlu1 %1760  ;;  %v1699_v37 = vpop.permute.xlu0 %1698 }
 0x453   :  { %v908_v1 = vpop.f32.mrf.mxu2  ;;  %v1805_v4 = vsel %vm355_vm7, %v5049_v49, %v1699_v37 }
 0x454   :  { %v909_v19 = vadd.f32 %v5185_v0, %v908_v1  ;;  %v1811_v7 = vsel %vm606_vm10, %v1805_v4, %v1730_v59 }
 0x455   :  { %v1817_v39 = vsel %vm839_vm12, %v1811_v7, %v1761_v60  ;;  %v1794_v63 = vpop.permute.xlu2 %1793 }
 0x456   :  { %v5192_v13 = vmax.f32 %v909_v19, 0.0 }
 0x458   :  { %v945_v49 = vrot.slane %v5192_v13, 4  ;;  %v941_v15 = vrot.slane %v5192_v13, 3  ;;  %v937_v23 = vrot.slane %v5192_v13, 2  ;;  %v957_v30 = vrot.slane %v5192_v13, 7 }
 0x459   :  { %v933_v38 = vrot.slane %v5192_v13, 1  ;;  %v949_v35 = vrot.slane %v5192_v13, 5  ;;  %v953_v61 = vrot.slane %v5192_v13, 6 }
 0x45a   :  { %v1792_v32 = vpop.permute.xlu0 %1791 }
 0x45b   :  { %v727_v9 = vpop.permute.xlu1 %726  ;;  %v1823_v17 = vsel %vm846_vm13, %v1817_v39, %v1792_v32  ;;  %v2187_v32 = vld [vmem:[#allocation8 + $0xf0] sm:$0xff] }
 0x45c   :  { %v1860_v29 = vpop.f32.mrf.mxu3  ;;  %3638 = vmatmul.msk.f32.gmra.mxu3 %vm872_vm14, %v1823_v17  ;;  %v832_v5 = vsel %vm355_vm7, %v5080_v11, %v727_v9  ;;  %2739 = vmatpush.msrb.mxu1 %v2187_v32  ;;  %v2185_v17 = vld [vmem:[#allocation8 + $0xe0] sm:$0xff] }
 0x45d   :  { %v1861_v12 = vadd.f32 %v5185_v0, %v1860_v29 }
 0x45e   :  { %2740 = vmatpush.msrb.mxu1 %v2185_v17 }
 0x45f   :  { %v5197_v14 = vmax.f32 %v1861_v12, 0.0  ;;  %v2183_v12 = vld [vmem:[#allocation8 + $0xd0] sm:$0xff] }
 0x460   :  { %2741 = vmatpush.msrb.mxu1 %v2183_v12  ;;  %v2197_v12 = vld [vmem:[#allocation8 + $0x140] sm:$0xff] }
 0x461   :  { %v1897_v36 = vrot.slane %v5197_v14, 4  ;;  %v1893_v16 = vrot.slane %v5197_v14, 3  ;;  %v1889_v21 = vrot.slane %v5197_v14, 2  ;;  %v1909_v31 = vrot.slane %v5197_v14, 7 }
 0x462   :  { %v758_v25 = vpop.permute.xlu0 %757  ;;  %v1885_v62 = vrot.slane %v5197_v14, 1  ;;  %v1901_v33 = vrot.slane %v5197_v14, 5  ;;  %v1905_v42 = vrot.slane %v5197_v14, 6 }
 0x463   :  { %v1732_v47 = vpop.permute.xlu1 %1731  ;;  %v3674_v27 = vpack.i.bf16 %v1897_v36, %v945_v49  ;;  %v3669_v28 = vpack.i.bf16 %v1893_v16, %v941_v15  ;;  %v3664_v57 = vpack.i.bf16 %v1889_v21, %v937_v23  ;;  %v838_v3 = vsel %vm606_vm10, %v832_v5, %v758_v25  ;;  %v2181_v15 = vld [vmem:[#allocation8 + $0xc0] sm:$0xff]  ;;  %v2179_v25 = vld [vmem:[#allocation8 + $0xb0] sm:$0xff] }
 0x464   :  { %v1812_v20 = vsel %vm606_vm10, %v1806_v2, %v1732_v47  ;;  %v3694_v40 = vpack.i.bf16 %v1909_v31, %v957_v30  ;;  %v3684_v41 = vpack.i.bf16 %v1885_v62, %v933_v38  ;;  %v845_v43 = vsel %vm839_vm12, %v838_v3, %v789_v34  ;;  %2742 = vmatpush.msrb.mxu1 %v2181_v15  ;;  %v2175_v5 = vld [vmem:[#allocation8 + $0x90] sm:$0xff]  ;;  %v2173_v3 = vld [vmem:[#allocation8 + $0x80] sm:$0xff] }
 0x465   :  { %3675 = vrot.lane.b32.xlu2 %v3674_v27, %s4098_s5  ;;  %3670 = vrot.lane.b32.xlu1 %v3669_v28, %s4084_s19  ;;  %v3679_v45 = vpack.i.bf16 %v1901_v33, %v949_v35  ;;  %v911_v48 = vpop.f32.mrf.mxu2  ;;  %v3689_v10 = vpack.i.bf16 %v1905_v42, %v953_v61  ;;  %v2177_v27 = vld [vmem:[#allocation8 + $0xa0] sm:$0xff]  ;;  %v2219_v31 = vld [vmem:[#allocation8 + $0x1f0] sm:$0xff] }
 0x466   :  { %3665 = vrot.lane.b32.xlu0 %v3664_v57, %s4097_s26  ;;  %v912_v50 = vadd.f32 %v5185_v0, %v911_v48  ;;  %2743 = vmatpush.msrb.mxu1 %v2179_v25  ;;  %v2217_v38 = vld [vmem:[#allocation8 + $0x1e0] sm:$0xff]  ;;  %v2215_v2 = vld [vmem:[#allocation8 + $0x1d0] sm:$0xff] }
 0x467   :  { %2759 = vmatpush.msrb.mxu2 %v2219_v31  ;;  %v2165_v61 = vld [vmem:[#allocation8 + $0x40] sm:$0xff]  ;;  %v2247_v15 = vld [vmem:[#allocation8 + $0x2d0] sm:$0xff] }
 0x468   :  { %v5233_v58 = vmax.f32 %v912_v50, 0.0  ;;  %2744 = vmatpush.msrb.mxu1 %v2177_v27  ;;  %v2209_v50 = vld [vmem:[#allocation8 + $0x1a0] sm:$0xff]  ;;  %v2191_v25 = vld [vmem:[#allocation8 + $0x110] sm:$0xff] }
 0x469   :  { %2760 = vmatpush.msrb.mxu2 %v2217_v38  ;;  %v2241_v27 = vld [vmem:[#allocation8 + $0x2a0] sm:$0xff]  ;;  %v2239_v31 = vld [vmem:[#allocation8 + $0x290] sm:$0xff] }
 0x46a   :  { %v1763_v22 = vpop.permute.xlu0 %1762  ;;  %v974_v52 = vrot.slane %v5233_v58, 4  ;;  %v966_v55 = vrot.slane %v5233_v58, 2  ;;  %v962_v24 = vrot.slane %v5233_v58, 1  ;;  %v970_v34 = vrot.slane %v5233_v58, 3  ;;  %2745 = vmatpush.msrb.mxu1 %v2175_v5  ;;  %v2189_v5 = vld [vmem:[#allocation8 + $0x100] sm:$0xff] }
 0x46b   :  { %v820_v11 = vpop.permute.xlu1 %819  ;;  %v1818_v44 = vsel %vm839_vm12, %v1812_v20, %v1763_v22  ;;  %v978_v19 = vrot.slane %v5233_v58, 5  ;;  %v986_v36 = vrot.slane %v5233_v58, 7  ;;  %v982_v23 = vrot.slane %v5233_v58, 6  ;;  %2761 = vmatpush.msrb.mxu2 %v2215_v2 }
 0x46c   :  { %v852_v46 = vsel %vm846_vm13, %v845_v43, %v820_v11  ;;  %v1824_v8 = vsel %vm846_vm13, %v1818_v44, %v1794_v63  ;;  %2746 = vmatpush.msrb.mxu1 %v2173_v3  ;;  %v2169_v44 = vld [vmem:[#allocation8 + $0x60] sm:$0xff] }
 0x46d   :  { %3695 = vrot.lane.b32.xlu2 %v3694_v40, %s4099_s7  ;;  %3685 = vrot.lane.b32.xlu1 %v3684_v41, %s4095_s17  ;;  %v2171_v40 = vld [vmem:[#allocation8 + $0x70] sm:$0xff] }
 0x46e   :  { %3680 = vrot.lane.b32.xlu0 %v3679_v45, %s4100_s3  ;;  %3616 = vmatmul.msk.f32.gmra.mxu2 %vm872_vm14, %v852_v46  ;;  %v2213_v45 = vld [vmem:[#allocation8 + $0x1c0] sm:$0xff]  ;;  %v2167_v46 = vld [vmem:[#allocation8 + $0x50] sm:$0xff] }
 0x46f   :  { %3639 = vmatmul.msk.f32.gmra.mxu3 %vm872_vm14, %v1824_v8  ;;  %2747 = vmatpush.msrb.mxu1 %v2171_v40  ;;  %v2211_v8 = vld [vmem:[#allocation8 + $0x1b0] sm:$0xff] }
 0x470   :  { %2762 = vmatpush.msrb.mxu2 %v2213_v45  ;;  %v2279_v45 = vld [vmem:[#allocation8 + $0x3d0] sm:$0xff] }
 0x471   :  { %2748 = vmatpush.msrb.mxu1 %v2169_v44 }
 0x472   :  { %2763 = vmatpush.msrb.mxu2 %v2211_v8  ;;  %v2277_v8 = vld [vmem:[#allocation8 + $0x3c0] sm:$0xff] }
 0x473   :  { %2749 = vmatpush.msrb.mxu1 %v2167_v46  ;;  %v2233_v46 = vld [vmem:[#allocation8 + $0x260] sm:$0xff] }
 0x474   :  { %2764 = vmatpush.msrb.mxu2 %v2209_v50  ;;  %v2275_v50 = vld [vmem:[#allocation8 + $0x3b0] sm:$0xff] }
 0x475   :  { %3690 = vrot.lane.b32.xlu1 %v3689_v10, %s4101_s20  ;;  %2750 = vmatpush.msrb.mxu1 %v2165_v61  ;;  %v2231_v61 = vld [vmem:[#allocation8 + $0x250] sm:$0xff] }
 0x478   :  { %v1863_v51 = vpop.f32.mrf.mxu3 }
 0x479   :  { %v1864_v53 = vadd.f32 %v5185_v0, %v1863_v51 }
 0x47b   :  { %v5236_v26 = vmax.f32 %v1864_v53, 0.0 }
 0x47d   :  { %v1926_v56 = vrot.slane %v5236_v26, 4  ;;  %v1918_v6 = vrot.slane %v5236_v26, 2  ;;  %v1914_v18 = vrot.slane %v5236_v26, 1  ;;  %v1922_v1 = vrot.slane %v5236_v26, 3 }
 0x47e   :  { %v1930_v4 = vrot.slane %v5236_v26, 5  ;;  %v1934_v51 = vrot.slane %v5236_v26, 6  ;;  %v1938_v53 = vrot.slane %v5236_v26, 7 }
 0x47f   :  { %v3714_v59 = vpack.i.bf16 %v1926_v56, %v974_v52  ;;  %v3704_v60 = vpack.i.bf16 %v1918_v6, %v966_v55  ;;  %v3699_v37 = vpack.i.bf16 %v1914_v18, %v962_v24  ;;  %v3709_v7 = vpack.i.bf16 %v1922_v1, %v970_v34  ;;  %v2163_v52 = vld [vmem:[#allocation8 + $0x30] sm:$0xff]  ;;  %v2157_v34 = vld [vmem:[#allocation8] sm:$0xff] }
 0x480   :  { %v3719_v9 = vpack.i.bf16 %v1930_v4, %v978_v19  ;;  %v2207_v24 = vld [vmem:[#allocation8 + $0x190] sm:$0xff]  ;;  %2751 = vmatpush.msrb.mxu1 %v2163_v52 }
 0x481   :  { %3715 = vrot.lane.b32.xlu1 %v3714_v59, %s4098_s5  ;;  %3705 = vrot.lane.b32.xlu0 %v3704_v60, %s4097_s26  ;;  %v2161_v59 = vld [vmem:[#allocation8 + $0x20] sm:$0xff]  ;;  %v2203_v4 = vld [vmem:[#allocation8 + $0x170] sm:$0xff] }
 0x482   :  { %3700 = vrot.lane.b32.xlu2 %v3699_v37, %s4095_s17  ;;  %v2205_v60 = vld [vmem:[#allocation8 + $0x180] sm:$0xff]  ;;  %2765 = vmatpush.msrb.mxu2 %v2207_v24  ;;  %v2159_v37 = vld [vmem:[#allocation8 + $0x10] sm:$0xff] }
 0x483   :  { %2752 = vmatpush.msrb.mxu1 %v2161_v59  ;;  %v2313_v59 = vld [vmem:[#allocation8 + $0x4e0] sm:$0xff] }
 0x484   :  { %2766 = vmatpush.msrb.mxu2 %v2205_v60 }
 0x485   :  { %2753 = vmatpush.msrb.mxu1 %v2159_v37  ;;  %v2227_v37 = vld [vmem:[#allocation8 + $0x230] sm:$0xff] }
 0x486   :  { %2767 = vmatpush.msrb.mxu2 %v2203_v4  ;;  %v2271_v4 = vld [vmem:[#allocation8 + $0x390] sm:$0xff] }
 0x487   :  { %2754 = vmatpush.msrb.mxu1 %v2157_v34  ;;  %v2225_v34 = vld [vmem:[#allocation8 + $0x220] sm:$0xff] }
 0x489   :  { %3710 = vrot.lane.b32.xlu0 %v3709_v7, %s4084_s19  ;;  %v2201_v7 = vld [vmem:[#allocation8 + $0x160] sm:$0xff] }
 0x48a   :  { %3720 = vrot.lane.b32.xlu2 %v3719_v9, %s4100_s3  ;;  %v2251_v9 = vld [vmem:[#allocation8 + $0x2f0] sm:$0xff]  ;;  %2768 = vmatpush.msrb.mxu2 %v2201_v7  ;;  %v2269_v7 = vld [vmem:[#allocation8 + $0x380] sm:$0xff] }
 0x48b   :  { %2779 = vmatpush.msra.mxu1 %v2251_v9 }
 0x492   :  { %v914_v39 = vpop.f32.mrf.mxu2 }
 0x493   :  { %v915_v29 = vadd.f32 %v5185_v0, %v914_v39  ;;  %v2199_v39 = vld [vmem:[#allocation8 + $0x150] sm:$0xff] }
 0x494   :  { %2769 = vmatpush.msrb.mxu2 %v2199_v39  ;;  %v2267_v39 = vld [vmem:[#allocation8 + $0x370] sm:$0xff] }
 0x495   :  { %v5254_v49 = vmax.f32 %v915_v29, 0.0  ;;  %v2249_v29 = vld [vmem:[#allocation8 + $0x2e0] sm:$0xff] }
 0x496   :  { %2780 = vmatpush.msra.mxu1 %v2249_v29  ;;  %2770 = vmatpush.msrb.mxu2 %v2197_v12  ;;  %v2307_v29 = vld [vmem:[#allocation8 + $0x4b0] sm:$0xff]  ;;  %v2221_v12 = vld [vmem:[#allocation8 + $0x200] sm:$0xff] }
 0x497   :  { %v1034_v16 = vrot.slane %v5254_v49, 7  ;;  %v1030_v21 = vrot.slane %v5254_v49, 6  ;;  %v1022_v33 = vrot.slane %v5254_v49, 4  ;;  %v1018_v30 = vrot.slane %v5254_v49, 3 }
 0x498   :  { %v1014_v11 = vrot.slane %v5254_v49, 2  ;;  %v1026_v55 = vrot.slane %v5254_v49, 5  ;;  %v1010_v19 = vrot.slane %v5254_v49, 1  ;;  %2781 = vmatpush.msra.mxu1 %v2247_v15  ;;  %v2265_v15 = vld [vmem:[#allocation8 + $0x360] sm:$0xff] }
 0x499   :  { %v3729_v54 = vpack.i.bf16 %v1034_v16, %v986_v36  ;;  %v3724_v47 = vpack.i.bf16 %v1030_v21, %v982_v23  ;;  %v2195_v36 = vld [vmem:[#allocation8 + $0x130] sm:$0xff]  ;;  %v2245_v16 = vld [vmem:[#allocation8 + $0x2c0] sm:$0xff] }
 0x49a   :  { %v2193_v21 = vld [vmem:[#allocation8 + $0x120] sm:$0xff]  ;;  %2771 = vmatpush.msrb.mxu2 %v2195_v36  ;;  %2782 = vmatpush.msra.mxu1 %v2245_v16 }
 0x49b   :  { %3730 = vrot.lane.b32.xlu0 %v3729_v54, %s4099_s7  ;;  %3725 = vrot.lane.b32.xlu1 %v3724_v47, %s4101_s20  ;;  %v2243_v54 = vld [vmem:[#allocation8 + $0x2b0] sm:$0xff]  ;;  %v2305_v36 = vld [vmem:[#allocation8 + $0x4a0] sm:$0xff] }
 0x49c   :  { %v1866_v28 = vpop.f32.mrf.mxu3  ;;  %2772 = vmatpush.msrb.mxu2 %v2193_v21  ;;  %2783 = vmatpush.msra.mxu1 %v2243_v54  ;;  %v2303_v21 = vld [vmem:[#allocation8 + $0x490] sm:$0xff]  ;;  %v2301_v54 = vld [vmem:[#allocation8 + $0x480] sm:$0xff] }
 0x49d   :  { %v1867_v57 = vadd.f32 %v5185_v0, %v1866_v28 }
 0x49e   :  { %2773 = vmatpush.msrb.mxu2 %v2191_v25  ;;  %2784 = vmatpush.msra.mxu1 %v2241_v27 }
 0x49f   :  { %v5263_v62 = vmax.f32 %v1867_v57, 0.0 }
 0x4a0   :  { %2774 = vmatpush.msrb.mxu2 %v2189_v5  ;;  %2785 = vmatpush.msra.mxu1 %v2239_v31  ;;  %v2259_v5 = vld [vmem:[#allocation8 + $0x330] sm:$0xff] }
 0x4a1   :  { %v1969_v35 = vrot.slane %v5263_v62, 4  ;;  %v1965_v20 = vrot.slane %v5263_v62, 3  ;;  %v1961_v22 = vrot.slane %v5263_v62, 2  ;;  %v1977_v42 = vrot.slane %v5263_v62, 6  ;;  %v2299_v31 = vld [vmem:[#allocation8 + $0x470] sm:$0xff] }
 0x4a2   :  { %v1981_v48 = vrot.slane %v5263_v62, 7  ;;  %v1973_v10 = vrot.slane %v5263_v62, 5  ;;  %v1957_v1 = vrot.slane %v5263_v62, 1 }
 0x4a3   :  { %v3744_v41 = vpack.i.bf16 %v1969_v35, %v1022_v33  ;;  %v3739_v43 = vpack.i.bf16 %v1965_v20, %v1018_v30  ;;  %v3734_v63 = vpack.i.bf16 %v1961_v22, %v1014_v11  ;;  %v3754_v56 = vpack.i.bf16 %v1977_v42, %v1934_v51  ;;  %v2283_v33 = vld [vmem:[#allocation8 + $0x3f0] sm:$0xff]  ;;  %v2237_v30 = vld [vmem:[#allocation8 + $0x280] sm:$0xff] }
 0x4a4   :  { %v3759_v6 = vpack.i.bf16 %v1981_v48, %v1938_v53  ;;  %v3749_v18 = vpack.i.bf16 %v1973_v10, %v1026_v55  ;;  %v3764_v32 = vpack.i.bf16 %v1957_v1, %v1010_v19  ;;  %v2281_v11 = vld [vmem:[#allocation8 + $0x3e0] sm:$0xff]  ;;  %2799 = vmatpush.msra.mxu2 %v2283_v33  ;;  %2786 = vmatpush.msra.mxu1 %v2237_v30  ;;  %v2315_v51 = vld [vmem:[#allocation8 + $0x4f0] sm:$0xff] }
 0x4a5   :  { %3745 = vrot.lane.b32.xlu2 %v3744_v41, %s4098_s5  ;;  %3740 = vrot.lane.b32.xlu1 %v3739_v43, %s4084_s19  ;;  %v2229_v55 = vld [vmem:[#allocation8 + $0x240] sm:$0xff]  ;;  %v2311_v1 = vld [vmem:[#allocation8 + $0x4d0] sm:$0xff] }
 0x4a6   :  { %3735 = vrot.lane.b32.xlu0 %v3734_v63, %s4097_s26  ;;  %v2235_v63 = vld [vmem:[#allocation8 + $0x270] sm:$0xff]  ;;  %2800 = vmatpush.msra.mxu2 %v2281_v11  ;;  %v2309_v19 = vld [vmem:[#allocation8 + $0x4c0] sm:$0xff] }
 0x4a7   :  { %2787 = vmatpush.msra.mxu1 %v2235_v63  ;;  %2819 = vmatpush.msra.mxu3 %v2315_v51  ;;  %v2297_v33 = vld [vmem:[#allocation8 + $0x460] sm:$0xff] }
 0x4a8   :  { %2801 = vmatpush.msra.mxu2 %v2279_v45  ;;  %v2253_v45 = vld [vmem:[#allocation8 + $0x300] sm:$0xff] }
 0x4a9   :  { %2788 = vmatpush.msra.mxu1 %v2233_v46  ;;  %2820 = vmatpush.msra.mxu3 %v2313_v59 }
 0x4aa   :  { %2802 = vmatpush.msra.mxu2 %v2277_v8 }
 0x4ab   :  { %2789 = vmatpush.msra.mxu1 %v2231_v61  ;;  %2821 = vmatpush.msra.mxu3 %v2311_v1 }
 0x4ac   :  { %2803 = vmatpush.msra.mxu2 %v2275_v50 }
 0x4ad   :  { %3755 = vrot.lane.b32.xlu2 %v3754_v56, %s4101_s20  ;;  %3760 = vrot.lane.b32.xlu1 %v3759_v6, %s4099_s7 }
 0x4ae   :  { %3750 = vrot.lane.b32.xlu0 %v3749_v18, %s4100_s3  ;;  %v2273_v18 = vld [vmem:[#allocation8 + $0x3a0] sm:$0xff]  ;;  %2790 = vmatpush.msra.mxu1 %v2229_v55 }
 0x4af   :  { %2804 = vmatpush.msra.mxu2 %v2273_v18  ;;  %2822 = vmatpush.msra.mxu3 %v2309_v19  ;;  %v2289_v18 = vld [vmem:[#allocation8 + $0x420] sm:$0xff] }
 0x4b0   :  { %2791 = vmatpush.msra.mxu1 %v2227_v37 }
 0x4b1   :  { %v917_v17 = vpop.f32.mrf.mxu2  ;;  %2805 = vmatpush.msra.mxu2 %v2271_v4  ;;  %2823 = vmatpush.msra.mxu3 %v2307_v29 }
 0x4b2   :  { %v918_v23 = vadd.f32 %v5185_v0, %v917_v17  ;;  %2792 = vmatpush.msra.mxu1 %v2225_v34 }
 0x4b3   :  { %2806 = vmatpush.msra.mxu2 %v2269_v7  ;;  %2824 = vmatpush.msra.mxu3 %v2305_v36 }
 0x4b4   :  { %v5287_v28 = vmax.f32 %v918_v23, 0.0  ;;  %v2263_v23 = vld [vmem:[#allocation8 + $0x350] sm:$0xff] }
 0x4b5   :  { %3765 = vrot.lane.b32.xlu2 %v3764_v32, %s4095_s17  ;;  %v2223_v32 = vld [vmem:[#allocation8 + $0x210] sm:$0xff]  ;;  %2807 = vmatpush.msra.mxu2 %v2267_v39 }
 0x4b6   :  { %v1063_v38 = vrot.slane %v5287_v28, 7  ;;  %v1059_v35 = vrot.slane %v5287_v28, 6  ;;  %v1055_v22 = vrot.slane %v5287_v28, 5  ;;  %v1047_v53 = vrot.slane %v5287_v28, 3  ;;  %2793 = vmatpush.msra.mxu1 %v2223_v32  ;;  %2825 = vmatpush.msra.mxu3 %v2303_v21 }
 0x4b7   :  { %v1043_v52 = vrot.slane %v5287_v28, 2  ;;  %v1039_v56 = vrot.slane %v5287_v28, 1  ;;  %v1051_v17 = vrot.slane %v5287_v28, 4  ;;  %2808 = vmatpush.msra.mxu2 %v2265_v15 }
 0x4b8   :  { %2794 = vmatpush.msra.mxu1 %v2221_v12  ;;  %2826 = vmatpush.msra.mxu3 %v2301_v54 }
 0x4b9   :  { %2809 = vmatpush.msra.mxu2 %v2263_v23 }
 0x4ba   :  { %2827 = vmatpush.msra.mxu3 %v2299_v31 }
 0x4bb   :  { %v1869_v47 = vpop.f32.mrf.mxu3 }
 0x4bc   :  { %v1870_v57 = vadd.f32 %v5185_v0, %v1869_v47  ;;  %v2261_v47 = vld [vmem:[#allocation8 + $0x340] sm:$0xff]  ;;  %2828 = vmatpush.msra.mxu3 %v2297_v33 }
 0x4bd   :  { %2810 = vmatpush.msra.mxu2 %v2261_v47  ;;  %v2379_v47 = vld [vmem:[#allocation8 + $0x6f0] sm:$0xff] }
 0x4be   :  { %v5290_v3 = vmax.f32 %v1870_v57, 0.0  ;;  %v2100_v57 = vlaneseq }
 0x4bf   :  { %2811 = vmatpush.msra.mxu2 %v2259_v5  ;;  %v2409_v5 = vld [vmem:[#allocation8 + $0x7e0] sm:$0xff] }
 0x4c0   :  { %v2010_v2 = vrot.slane %v5290_v3, 7  ;;  %v2006_v20 = vrot.slane %v5290_v3, 6  ;;  %v2002_v40 = vrot.slane %v5290_v3, 5  ;;  %v1994_v42 = vrot.slane %v5290_v3, 3 }
 0x4c1   :  { %v1990_v48 = vrot.slane %v5290_v3, 2  ;;  %v1986_v10 = vrot.slane %v5290_v3, 1  ;;  %v1998_v9 = vrot.slane %v5290_v3, 4 }
 0x4c2   :  { %v3779_v41 = vpack.i.bf16 %v2010_v2, %v1063_v38  ;;  %v3774_v43 = vpack.i.bf16 %v2006_v20, %v1059_v35  ;;  %v3769_v44 = vpack.i.bf16 %v2002_v40, %v1055_v22  ;;  %v3794_v6 = vpack.i.bf16 %v1994_v42, %v1047_v53  ;;  %v2257_v38 = vld [vmem:[#allocation8 + $0x320] sm:$0xff]  ;;  %v3676_v2 = vpop.permute.xlu2 %3675  ;;  %v2295_v40 = vld [vmem:[#allocation8 + $0x450] sm:$0xff] }
 0x4c3   :  { %v3789_v24 = vpack.i.bf16 %v1990_v48, %v1043_v52  ;;  %v3784_v60 = vpack.i.bf16 %v1986_v10, %v1039_v56  ;;  %v3799_v16 = vpack.i.bf16 %v1998_v9, %v1051_v17  ;;  %2812 = vmatpush.msra.mxu2 %v2257_v38  ;;  %2829 = vmatpush.msra.mxu3 %v2295_v40  ;;  %v3678_v46 = vunpack.i.h.bf16 %v3676_v2  ;;  %v2291_v10 = vld [vmem:[#allocation8 + $0x430] sm:$0xff]  ;;  %v2377_v38 = vld [vmem:[#allocation8 + $0x6e0] sm:$0xff] }
 0x4c4   :  { %3780 = vrot.lane.b32.xlu2 %v3779_v41, %s4099_s7  ;;  %3775 = vrot.lane.b32.xlu1 %v3774_v43, %s4101_s20  ;;  %v5313_v41 = vshrl.u32 %v2100_v57, 7  ;;  %v2255_v43 = vld [vmem:[#allocation8 + $0x310] sm:$0xff]  ;;  %v3677_v8 = vunpack.i.l.bf16 %v3676_v2  ;;  %v2285_v2 = vld [vmem:[#allocation8 + $0x400] sm:$0xff] }
 0x4c5   :  { %3770 = vrot.lane.b32.xlu0 %v3769_v44, %s4100_s3  ;;  %v2293_v44 = vld [vmem:[#allocation8 + $0x440] sm:$0xff]  ;;  %2813 = vmatpush.msra.mxu2 %v2255_v43  ;;  %v2287_v9 = vld [vmem:[#allocation8 + $0x410] sm:$0xff] }
 0x4c6   :  { %vm2120_vm2 = vcmp.eq.s32.totalorder %v5313_v41, 1  ;;  %2830 = vmatpush.msra.mxu3 %v2293_v44  ;;  %v2345_v44 = vld [vmem:[#allocation8 + $0x5e0] sm:$0xff]  ;;  %v2328_v41 = vld [vmem:[#allocation8 + $0x558] sm:$0xff] }
 0x4c7   :  { %2814 = vmatpush.msra.mxu2 %v2253_v45 }
 0x4c8   :  { %2831 = vmatpush.msra.mxu3 %v2291_v10  ;;  %v2373_v10 = vld [vmem:[#allocation8 + $0x6c0] sm:$0xff] }
 0x4ca   :  { %2832 = vmatpush.msra.mxu3 %v2289_v18  ;;  %v3696_v17 = vpop.permute.xlu2 %3695  ;;  %v2341_v18 = vld [vmem:[#allocation8 + $0x5c0] sm:$0xff] }
 0x4cb   :  { %v920_v30 = vpop.f32.mrf.mxu2 }
 0x4cc   :  { %3795 = vrot.lane.b32.xlu2 %v3794_v6, %s4084_s19  ;;  %3790 = vrot.lane.b32.xlu1 %v3789_v24, %s4097_s26  ;;  %v921_v63 = vadd.f32 %v5185_v0, %v920_v30 }
 0x4cd   :  { %3785 = vrot.lane.b32.xlu0 %v3784_v60, %s4095_s17  ;;  %2833 = vmatpush.msra.mxu3 %v2287_v9 }
 0x4ce   :  { %v5319_v55 = vmax.f32 %v921_v63, 0.0  ;;  %v2375_v63 = vld [vmem:[#allocation8 + $0x6d0] sm:$0xff] }
 0x4cf   :  { %2834 = vmatpush.msra.mxu3 %v2285_v2 }
 0x4d0   :  { %v1086_v15 = vrot.slane %v5319_v55, 2  ;;  %v1082_v21 = vrot.slane %v5319_v55, 1 }
 0x4d5   :  { %3800 = vrot.lane.b32.xlu0 %v3799_v16, %s4098_s5  ;;  %v2411_v16 = vld [vmem:[#allocation8 + $0x7f0] sm:$0xff] }
 0x4d7   :  { %v3671_v25 = vpop.permute.xlu1 %3670 }
 0x4d8   :  { %v3666_v27 = vpop.permute.xlu0 %3665  ;;  %v3673_v35 = vunpack.i.h.bf16 %v3671_v25  ;;  %v3672_v20 = vunpack.i.l.bf16 %v3671_v25 }
 0x4d9   :  { %v3668_v11 = vunpack.i.h.bf16 %v3666_v27  ;;  %v3667_v22 = vunpack.i.l.bf16 %v3666_v27 }
 0x4db   :  { %v1944_v42 = vsel %vm992_vm15, %v3668_v11, %v3673_v35  ;;  %v993_v48 = vsel %vm992_vm15, %v3667_v22, %v3672_v20  ;;  %v3698_v35 = vunpack.i.h.bf16 %v3696_v17  ;;  %v3697_v20 = vunpack.i.l.bf16 %v3696_v17  ;;  %v2397_v17 = vld [vmem:[#allocation8 + $0x780] sm:$0xff] }
 0x4dc   :  { %v995_v37 = vsel %vm994_vm0, %v993_v48, %v3677_v8  ;;  %v1945_v1 = vsel %vm994_vm0, %v1944_v42, %v3678_v46  ;;  %v2405_v8 = vld [vmem:[#allocation8 + $0x7c0] sm:$0xff] }
 0x4dd   :  { %v2441_v42 = vld [vmem:[#allocation8 + $0x8e0] sm:$0xff] }
 0x4df   :  { %v3686_v61 = vpop.permute.xlu1 %3685  ;;  %v1872_v52 = vpop.f32.mrf.mxu3 }
 0x4e0   :  { %v3688_v50 = vunpack.i.h.bf16 %v3686_v61  ;;  %v3687_v51 = vunpack.i.l.bf16 %v3686_v61  ;;  %v3681_v53 = vpop.permute.xlu0 %3680  ;;  %v1873_v24 = vadd.f32 %v5185_v0, %v1872_v52 }
 0x4e1   :  { %v3683_v56 = vunpack.i.h.bf16 %v3681_v53  ;;  %v3682_v6 = vunpack.i.l.bf16 %v3681_v53  ;;  %v2403_v53 = vld [vmem:[#allocation8 + $0x7b0] sm:$0xff] }
 0x4e2   :  { %v1942_v59 = vsel %vm606_vm10, %v5197_v14, %v3688_v50  ;;  %v990_v60 = vsel %vm606_vm10, %v5192_v13, %v3687_v51  ;;  %v5330_v19 = vmax.f32 %v1873_v24, 0.0  ;;  %v2347_v13 = vld [vmem:[#allocation8 + $0x5f0] sm:$0xff]  ;;  %v3701_v51 = vpop.permute.xlu2 %3700  ;;  %v2401_v24 = vld [vmem:[#allocation8 + $0x7a0] sm:$0xff] }
 0x4e3   :  { %v997_v4 = vsel %vm996_vm1, %v995_v37, %v3682_v6  ;;  %v1946_v34 = vsel %vm996_vm1, %v1945_v1, %v3683_v56  ;;  %v991_v7 = vsel %vm846_vm13, %v990_v60, %v3667_v22  ;;  %v1943_v14 = vsel %vm846_vm13, %v1942_v59, %v3668_v11  ;;  %2839 = vmatpush.msra.mxu0 %v2347_v13  ;;  %v2407_v11 = vld [vmem:[#allocation8 + $0x7d0] sm:$0xff]  ;;  %v2369_v59 = vld [vmem:[#allocation8 + $0x6a0] sm:$0xff] }
 0x4e4   :  { %v2103_v32 = vperm.slane %v997_v4, 0  ;;  %v2122_v39 = vperm.slane %v1946_v34, 0  ;;  %v2102_v29 = vperm.slane %v991_v7, 0  ;;  %v2121_v12 = vperm.slane %v1943_v14, 0  ;;  %v2443_v22 = vld [vmem:[#allocation8 + $0x8f0] sm:$0xff]  ;;  %v2437_v60 = vld [vmem:[#allocation8 + $0x8c0] sm:$0xff] }
 0x4e5   :  { %v2033_v36 = vrot.slane %v5330_v19, 2  ;;  %v2029_v54 = vrot.slane %v5330_v19, 1  ;;  %2899 = vmatpush.msrb.mxu3 %v2443_v22  ;;  %v2343_v50 = vld [vmem:[#allocation8 + $0x5d0] sm:$0xff]  ;;  %2840 = vmatpush.msra.mxu0 %v2345_v44  ;;  %v3703_v37 = vunpack.i.h.bf16 %v3701_v51  ;;  %v3702_v1 = vunpack.i.l.bf16 %v3701_v51 }
 0x4e6   :  { %v5338_v23 = vsel %vm2120_vm2, %v2122_v39, %v2103_v32  ;;  %v5345_v27 = vsel %vm2120_vm2, %v2121_v12, %v2102_v29  ;;  %v2399_v34 = vld [vmem:[#allocation8 + $0x790] sm:$0xff]  ;;  %v2337_v12 = vld [vmem:[#allocation8 + $0x5a0] sm:$0xff] }
 0x4e7   :  { %2775 = vmatmul.f32.vlgmr.msrb.gmra.mxu2 %v5338_v23  ;;  %v3691_v25 = vpop.permute.xlu1 %3690  ;;  %v3809_v57 = vpack.i.bf16 %v2033_v36, %v1086_v15  ;;  %2755 = vmatmul.f32.vlgmr.msrb.gmra.mxu1 %v5345_v27  ;;  %v3804_v30 = vpack.i.bf16 %v2029_v54, %v1082_v21  ;;  %v2339_v7 = vld [vmem:[#allocation8 + $0x5b0] sm:$0xff]  ;;  %v1090_v21 = vrot.slane %v5319_v55, 3  ;;  %v2365_v54 = vld [vmem:[#allocation8 + $0x680] sm:$0xff] }
 0x4e8   :  { %v3693_v31 = vunpack.i.h.bf16 %v3691_v25  ;;  %v3692_v33 = vunpack.i.l.bf16 %v3691_v25  ;;  %2879 = vmatpush.msrb.mxu2 %v2411_v16  ;;  %2859 = vmatpush.msrb.mxu1 %v2379_v47  ;;  %v2367_v39 = vld [vmem:[#allocation8 + $0x690] sm:$0xff]  ;;  %v1098_v16 = vrot.slane %v5319_v55, 5  ;;  %v2433_v47 = vld [vmem:[#allocation8 + $0x8a0] sm:$0xff]  ;;  %v1002_v25 = vsel %vm606_vm10, %v5233_v58, %v3702_v1 }
 0x4e9   :  { %3810 = vrot.lane.b32.xlu2 %v3809_v57, %s4097_s26  ;;  %3805 = vrot.lane.b32.xlu1 %v3804_v30, %s4095_s17  ;;  %v2435_v14 = vld [vmem:[#allocation8 + $0x8b0] sm:$0xff] }
 0x4ea   :  { %v999_v40 = vsel %vm998_vm3, %v3682_v6, %v3692_v33  ;;  %v1947_v43 = vsel %vm998_vm3, %v3683_v56, %v3693_v31  ;;  %2880 = vmatpush.msrb.mxu2 %v2409_v5  ;;  %2860 = vmatpush.msrb.mxu1 %v2377_v38  ;;  %v2371_v56 = vld [vmem:[#allocation8 + $0x6b0] sm:$0xff] }
 0x4eb   :  { %v1001_v45 = vsel %vm1000_vm4, %v999_v40, %v3697_v20  ;;  %v1948_v46 = vsel %vm1000_vm4, %v1947_v43, %v3698_v35  ;;  %2900 = vmatpush.msrb.mxu3 %v2441_v42  ;;  %v2439_v6 = vld [vmem:[#allocation8 + $0x8d0] sm:$0xff]  ;;  %2841 = vmatpush.msra.mxu0 %v2343_v50  ;;  %v5381_v20 = vpop.permute.xlu2 %3720 }
 0x4ec   :  { %v2104_v48 = vperm.slane %v1001_v45, 0  ;;  %v2123_v61 = vperm.slane %v1948_v46, 0  ;;  %2881 = vmatpush.msrb.mxu2 %v2407_v11  ;;  %2861 = vmatpush.msrb.mxu1 %v2375_v63  ;;  %v2395_v31 = vld [vmem:[#allocation8 + $0x770] sm:$0xff]  ;;  %v2361_v46 = vld [vmem:[#allocation8 + $0x660] sm:$0xff] }
 0x4ed   :  { %2901 = vmatpush.msrb.mxu3 %v2439_v6  ;;  %2842 = vmatpush.msra.mxu0 %v2341_v18  ;;  %v2335_v33 = vld [vmem:[#allocation8 + $0x590] sm:$0xff] }
 0x4ee   :  { %v5356_v52 = vsel %vm2120_vm2, %v2123_v61, %v2104_v48  ;;  %2882 = vmatpush.msrb.mxu2 %v2405_v8  ;;  %2862 = vmatpush.msrb.mxu1 %v2373_v10  ;;  %v2363_v58 = vld [vmem:[#allocation8 + $0x670] sm:$0xff]  ;;  %v2393_v8 = vld [vmem:[#allocation8 + $0x760] sm:$0xff] }
 0x4ef   :  { %2795 = vmatmul.f32.vlgmr.msra.gmra.mxu1 %v5356_v52  ;;  %2902 = vmatpush.msrb.mxu3 %v2437_v60  ;;  %v2431_v35 = vld [vmem:[#allocation8 + $0x890] sm:$0xff]  ;;  %v2333_v61 = vld [vmem:[#allocation8 + $0x580] sm:$0xff] }
 0x4f0   :  { %2883 = vmatpush.msrb.mxu2 %v2403_v53  ;;  %2863 = vmatpush.msrb.mxu1 %v2371_v56  ;;  %v2429_v10 = vld [vmem:[#allocation8 + $0x880] sm:$0xff]  ;;  %v2359_v53 = vld [vmem:[#allocation8 + $0x650] sm:$0xff] }
 0x4f1   :  { %v923_v4 = vpop.f32.mrf.mxu2  ;;  %2843 = vmatpush.msra.mxu0 %v2339_v7  ;;  %2903 = vmatpush.msrb.mxu3 %v2435_v14  ;;  %v2391_v56 = vld [vmem:[#allocation8 + $0x750] sm:$0xff]  ;;  %v3722_v14 = vunpack.i.l.bf16 %v5381_v20 }
 0x4f2   :  { %v924_v9 = vadd.f32 %v5185_v0, %v923_v4  ;;  %v1875_v32 = vpop.f32.mrf.mxu3  ;;  %2884 = vmatpush.msrb.mxu2 %v2401_v24  ;;  %2864 = vmatpush.msrb.mxu1 %v2369_v59  ;;  %v2331_v60 = vld [vmem:[#allocation8 + $0x570] sm:$0xff] }
 0x4f3   :  { %v1876_v29 = vadd.f32 %v5185_v0, %v1875_v32  ;;  %v5361_v13 = vpop.permute.xlu0 %3705  ;;  %v1949_v0 = vsel %vm606_vm10, %v5236_v26, %v3703_v37  ;;  %2844 = vmatpush.msra.mxu0 %v2337_v12  ;;  %2904 = vmatpush.msrb.mxu3 %v2433_v47  ;;  %v3716_v42 = vpop.permute.xlu1 %3715  ;;  %v2427_v37 = vld [vmem:[#allocation8 + $0x870] sm:$0xff]  ;;  %v2389_v32 = vld [vmem:[#allocation8 + $0x740] sm:$0xff] }
 0x4f4   :  { %v5363_v15 = vmax.f32 %v924_v9, 0.0  ;;  %v3708_v36 = vunpack.i.h.bf16 %v5361_v13  ;;  %2885 = vmatpush.msrb.mxu2 %v2399_v34  ;;  %v3707_v5 = vunpack.i.l.bf16 %v5361_v13  ;;  %2865 = vmatpush.msrb.mxu1 %v2367_v39  ;;  %v3718_v1 = vunpack.i.h.bf16 %v3716_v42  ;;  %v2357_v9 = vld [vmem:[#allocation8 + $0x640] sm:$0xff] }
 0x4f5   :  { %v5372_v57 = vmax.f32 %v1876_v29, 0.0  ;;  %2845 = vmatpush.msra.mxu0 %v2335_v33  ;;  %2905 = vmatpush.msrb.mxu3 %v2431_v35  ;;  %v3717_v4 = vunpack.i.l.bf16 %v3716_v42  ;;  %v1094_v34 = vrot.slane %v5319_v55, 4  ;;  %v3723_v39 = vunpack.i.h.bf16 %v5381_v20  ;;  %v2329_v12 = vld [vmem:[#allocation8 + $0x560] sm:$0xff] }
 0x4f6   :  { %v1950_v30 = vsel %vm846_vm13, %v1949_v0, %v3708_v36  ;;  %v1127_v38 = vrot.slane %v5363_v15, 5  ;;  %v1119_v2 = vrot.slane %v5363_v15, 3  ;;  %v1115_v26 = vrot.slane %v5363_v15, 2  ;;  %2886 = vmatpush.msrb.mxu2 %v2397_v17  ;;  %2866 = vmatpush.msrb.mxu1 %v2365_v54 }
 0x4f7   :  { %v2124_v11 = vperm.slane %v1950_v30, 0  ;;  %v1003_v22 = vsel %vm846_vm13, %v1002_v25, %v3707_v5  ;;  %v2062_v40 = vrot.slane %v5372_v57, 2  ;;  %v1123_v51 = vrot.slane %v5363_v15, 4  ;;  %2846 = vmatpush.msra.mxu0 %v2333_v61  ;;  %2906 = vmatpush.msrb.mxu3 %v2429_v10  ;;  %v2349_v10 = vld [vmem:[#allocation8 + $0x600] sm:$0xff] }
 0x4f8   :  { %v2105_v43 = vperm.slane %v1003_v22, 0  ;;  %v3824_v63 = vpack.i.bf16 %v1127_v38, %v1098_v16  ;;  %v3814_v44 = vpack.i.bf16 %v1119_v2, %v1090_v21  ;;  %2887 = vmatpush.msrb.mxu2 %v2395_v31  ;;  %2867 = vmatpush.msrb.mxu1 %v2363_v58  ;;  %v1111_v18 = vrot.slane %v5363_v15, 1  ;;  %v2425_v16 = vld [vmem:[#allocation8 + $0x860] sm:$0xff]  ;;  %v2355_v31 = vld [vmem:[#allocation8 + $0x630] sm:$0xff] }
 0x4f9   :  { %v3834_v45 = vpack.i.bf16 %v2062_v40, %v1115_v26  ;;  %v2058_v59 = vrot.slane %v5372_v57, 1  ;;  %v2070_v7 = vrot.slane %v5372_v57, 4  ;;  %v3819_v0 = vpack.i.bf16 %v1123_v51, %v1094_v34  ;;  %2847 = vmatpush.msra.mxu0 %v2331_v60  ;;  %2907 = vmatpush.msrb.mxu3 %v2427_v37  ;;  %v2387_v2 = vld [vmem:[#allocation8 + $0x730] sm:$0xff]  ;;  %v2353_v26 = vld [vmem:[#allocation8 + $0x620] sm:$0xff] }
 0x4fa   :  { %3825 = vrot.lane.b32.xlu0 %v3824_v63, %s4100_s3  ;;  %3815 = vrot.lane.b32.xlu1 %v3814_v44, %s4084_s19  ;;  %v5389_v48 = vsel %vm2120_vm2, %v2124_v11, %v2105_v43  ;;  %v2041_v25 = vrot.slane %v5330_v19, 4  ;;  %v2327_v58 = vld [vmem:[#allocation8 + $0x550] sm:$0xff]  ;;  %v2385_v11 = vld [vmem:[#allocation8 + $0x720] sm:$0xff]  ;;  %v2074_v40 = vrot.slane %v5372_v57, 5  ;;  %v2066_v43 = vrot.slane %v5372_v57, 3 }
 0x4fb   :  { %3835 = vrot.lane.b32.xlu2 %v3834_v45, %s4097_s26  ;;  %2815 = vmatmul.f32.vlgmr.msra.gmra.mxu2 %v5389_v48  ;;  %v3711_v50 = vpop.permute.xlu0 %3710  ;;  %v2423_v22 = vld [vmem:[#allocation8 + $0x850] sm:$0xff]  ;;  %v2325_v44 = vld [vmem:[#allocation8 + $0x540] sm:$0xff]  ;;  %v2049_v45 = vrot.slane %v5330_v19, 6  ;;  %v2045_v42 = vrot.slane %v5330_v19, 5  ;;  %v2037_v61 = vrot.slane %v5330_v19, 3  ;;  %v1102_v51 = vrot.slane %v5319_v55, 6 }
 0x4fc   :  { %v3713_v6 = vunpack.i.h.bf16 %v3711_v50  ;;  %v3712_v24 = vunpack.i.l.bf16 %v3711_v50  ;;  %2868 = vmatpush.msrb.mxu1 %v2361_v46  ;;  %2888 = vmatpush.msrb.mxu2 %v2393_v8  ;;  %v3844_v33 = vpack.i.bf16 %v2070_v7, %v2041_v25  ;;  %v2351_v63 = vld [vmem:[#allocation8 + $0x610] sm:$0xff]  ;;  %v2421_v8 = vld [vmem:[#allocation8 + $0x840] sm:$0xff]  ;;  %v1131_v34 = vrot.slane %v5363_v15, 6 }
 0x4fd   :  { %2848 = vmatpush.msra.mxu0 %v2329_v12  ;;  %2908 = vmatpush.msrb.mxu3 %v2425_v16  ;;  %v2383_v46 = vld [vmem:[#allocation8 + $0x710] sm:$0xff]  ;;  %v2321_v37 = vld [vmem:[#allocation8 + $0x520] sm:$0xff]  ;;  %v2078_v7 = vrot.slane %v5372_v57, 6  ;;  %v2082_v12 = vrot.slane %v5372_v57, 7 }
 0x4fe   :  { %v1004_v29 = vsel %vm992_vm15, %v3707_v5, %v3712_v24  ;;  %v1951_v17 = vsel %vm992_vm15, %v3708_v36, %v3713_v6  ;;  %2869 = vmatpush.msrb.mxu1 %v2359_v53  ;;  %2889 = vmatpush.msrb.mxu2 %v2391_v56  ;;  %v3829_v5 = vpack.i.bf16 %v2058_v59, %v1111_v18  ;;  %v2323_v50 = vld [vmem:[#allocation8 + $0x530] sm:$0xff]  ;;  %v2381_v6 = vld [vmem:[#allocation8 + $0x700] sm:$0xff] }
 0x4ff   :  { %v1005_v21 = vsel %vm994_vm0, %v1004_v29, %v3717_v4  ;;  %v1952_v54 = vsel %vm994_vm0, %v1951_v17, %v3718_v1  ;;  %v5406_v47 = vpop.permute.xlu2 %3745  ;;  %2849 = vmatpush.msra.mxu0 %v2327_v58  ;;  %2909 = vmatpush.msrb.mxu3 %v2423_v22  ;;  %v3854_v53 = vpack.i.bf16 %v2074_v40, %v2045_v42  ;;  %v2539_v59 = vld [vmem:[#allocation8 + $0xbf0] sm:$0xff]  ;;  %v2537_v1 = vld [vmem:[#allocation8 + $0xbe0] sm:$0xff]  ;;  %v1135_v17 = vrot.slane %v5363_v15, 7 }
 0x500   :  { %v1006_v13 = vsel %vm996_vm1, %v1005_v21, %v3722_v14  ;;  %v1953_v36 = vsel %vm996_vm1, %v1952_v54, %v3723_v39  ;;  %2870 = vmatpush.msrb.mxu1 %v2357_v9  ;;  %2890 = vmatpush.msrb.mxu2 %v2389_v32  ;;  %v3839_v56 = vpack.i.bf16 %v2066_v43, %v2037_v61  ;;  %v2419_v60 = vld [vmem:[#allocation8 + $0x830] sm:$0xff]  ;;  %v2417_v4 = vld [vmem:[#allocation8 + $0x820] sm:$0xff]  ;;  %v2053_v9 = vrot.slane %v5330_v19, 7 }
 0x501   :  { %v2106_v30 = vperm.slane %v1006_v13, 0  ;;  %v2125_v38 = vperm.slane %v1953_v36, 0  ;;  %2850 = vmatpush.msra.mxu0 %v2325_v44  ;;  %2910 = vmatpush.msrb.mxu3 %v2421_v8  ;;  %v3849_v18 = vpack.i.bf16 %v2049_v45, %v1102_v51  ;;  %v2319_v32 = vld [vmem:[#allocation8 + $0x510] sm:$0xff]  ;;  %v2505_v54 = vld [vmem:[#allocation8 + $0xae0] sm:$0xff] }
 0x502   :  { %3820 = vrot.lane.b32.xlu1 %v3819_v0, %s4098_s5  ;;  %3830 = vrot.lane.b32.xlu0 %v3829_v5, %s4095_s17  ;;  %v2507_v29 = vld [vmem:[#allocation8 + $0xaf0] sm:$0xff]  ;;  %v1106_v0 = vrot.slane %v5319_v55, 7  ;;  %v2317_v25 = vld [vmem:[#allocation8 + $0x500] sm:$0xff] }
 0x503   :  { %3845 = vrot.lane.b32.xlu2 %v3844_v33, %s4098_s5  ;;  %v5420_v35 = vsel %vm2120_vm2, %v2125_v38, %v2106_v30  ;;  %2871 = vmatpush.msrb.mxu1 %v2355_v31  ;;  %v2535_v16 = vld [vmem:[#allocation8 + $0xbd0] sm:$0xff]  ;;  %v3864_v31 = vpack.i.bf16 %v2078_v7, %v1131_v34  ;;  %v2533_v30 = vld [vmem:[#allocation8 + $0xbc0] sm:$0xff]  ;;  %v3869_v38 = vpack.i.bf16 %v2082_v12, %v1135_v17  ;;  %s3580_s5 = sshll.u32 %s4102_s18, 4  ;;  %s3581_s5 = int_to_ptr.vmem [resolvable:$true] %s3580_s5 }
 0x504   :  { %2835 = vmatmul.f32.vlgmr.msra.gmra.mxu3 %v5420_v35  ;;  %2891 = vmatpush.msrb.mxu2 %v2387_v2  ;;  %v2415_v21 = vld [vmem:[#allocation8 + $0x810] sm:$0xff]  ;;  %v3859_v33 = vpack.i.bf16 %v2053_v9, %v1106_v0  ;;  %v2413_v2 = vld [vmem:[#allocation8 + $0x800] sm:$0xff] }
 0x505   :  { %2872 = vmatpush.msrb.mxu1 %v2353_v26  ;;  %2851 = vmatpush.msra.mxu0 %v2323_v50  ;;  %v2503_v5 = vld [vmem:[#allocation8 + $0xad0] sm:$0xff]  ;;  %v2473_v40 = vld [vmem:[#allocation8 + $0x9e0] sm:$0xff] }
 0x506   :  { %2892 = vmatpush.msrb.mxu2 %v2385_v11  ;;  %2911 = vmatpush.msrb.mxu3 %v2419_v60  ;;  %v2475_v26 = vld [vmem:[#allocation8 + $0x9f0] sm:$0xff]  ;;  %v2501_v43 = vld [vmem:[#allocation8 + $0xac0] sm:$0xff] }
 0x507   :  { %2873 = vmatpush.msrb.mxu1 %v2351_v63  ;;  %v5429_v24 = vpop.permute.xlu2 %3755  ;;  %2852 = vmatpush.msra.mxu0 %v2321_v37  ;;  %v2531_v58 = vld [vmem:[#allocation8 + $0xbb0] sm:$0xff]  ;;  %v2529_v63 = vld [vmem:[#allocation8 + $0xba0] sm:$0xff] }
 0x508   :  { %2893 = vmatpush.msrb.mxu2 %v2383_v46  ;;  %2912 = vmatpush.msrb.mxu3 %v2417_v4  ;;  %v2571_v11 = vld [vmem:[#allocation8 + $0xcf0] sm:$0xff]  ;;  %v2569_v44 = vld [vmem:[#allocation8 + $0xce0] sm:$0xff] }
 0x509   :  { %2874 = vmatpush.msrb.mxu1 %v2349_v10  ;;  %2853 = vmatpush.msra.mxu0 %v2319_v32  ;;  %v2471_v45 = vld [vmem:[#allocation8 + $0x9d0] sm:$0xff]  ;;  %v2469_v51 = vld [vmem:[#allocation8 + $0x9c0] sm:$0xff] }
 0x50a   :  { %3855 = vrot.lane.b32.xlu1 %v3854_v53, %s4100_s3  ;;  %3840 = vrot.lane.b32.xlu0 %v3839_v56, %s4084_s19  ;;  %v2499_v46 = vld [vmem:[#allocation8 + $0xab0] sm:$0xff]  ;;  %v2565_v60 = vld [vmem:[#allocation8 + $0xcc0] sm:$0xff] }
 0x50b   :  { %3850 = vrot.lane.b32.xlu2 %v3849_v18, %s4101_s20  ;;  %2894 = vmatpush.msrb.mxu2 %v2381_v6  ;;  %v2527_v61 = vld [vmem:[#allocation8 + $0xb90] sm:$0xff]  ;;  %v2525_v6 = vld [vmem:[#allocation8 + $0xb80] sm:$0xff] }
 0x50c   :  { %2939 = vmatpush.msra.mxu1 %v2507_v29  ;;  %2913 = vmatpush.msrb.mxu3 %v2415_v21  ;;  %v2567_v10 = vld [vmem:[#allocation8 + $0xcd0] sm:$0xff]  ;;  %v2497_v9 = vld [vmem:[#allocation8 + $0xaa0] sm:$0xff] }
 0x50d   :  { %2959 = vmatpush.msra.mxu2 %v2539_v59  ;;  %v5440_v13 = vpop.permute.xlu1 %3725  ;;  %v5442_v36 = vpop.permute.xlu0 %3730  ;;  %2854 = vmatpush.msra.mxu0 %v2317_v25  ;;  %v2467_v37 = vld [vmem:[#allocation8 + $0x9b0] sm:$0xff]  ;;  %v2465_v21 = vld [vmem:[#allocation8 + $0x9a0] sm:$0xff] }
 0x50e   :  { %2940 = vmatpush.msra.mxu1 %v2505_v54  ;;  %2914 = vmatpush.msrb.mxu3 %v2413_v2  ;;  %v3727_v53 = vunpack.i.l.bf16 %v5440_v13  ;;  %v2523_v7 = vld [vmem:[#allocation8 + $0xb70] sm:$0xff]  ;;  %v3757_v54 = vunpack.i.l.bf16 %v5429_v24  ;;  %v2521_v25 = vld [vmem:[#allocation8 + $0xb60] sm:$0xff] }
 0x50f   :  { %2960 = vmatpush.msra.mxu2 %v2537_v1  ;;  %v3766_v22 = vpop.permute.xlu2 %3765  ;;  %2919 = vmatpush.msrb.mxu0 %v2475_v26  ;;  %v3732_v1 = vunpack.i.l.bf16 %v5442_v36  ;;  %v2495_v2 = vld [vmem:[#allocation8 + $0xa90] sm:$0xff] }
 0x510   :  { %2941 = vmatpush.msra.mxu1 %v2503_v5  ;;  %2979 = vmatpush.msra.mxu3 %v2571_v11  ;;  %v3768_v8 = vunpack.i.h.bf16 %v3766_v22  ;;  %v3767_v42 = vunpack.i.l.bf16 %v3766_v22  ;;  %v2561_v5 = vld [vmem:[#allocation8 + $0xca0] sm:$0xff] }
 0x511   :  { %2961 = vmatpush.msra.mxu2 %v2535_v16  ;;  %2920 = vmatpush.msrb.mxu0 %v2473_v40  ;;  %v2563_v16 = vld [vmem:[#allocation8 + $0xcb0] sm:$0xff] }
 0x512   :  { %3865 = vrot.lane.b32.xlu1 %v3864_v31, %s4101_s20  ;;  %3860 = vrot.lane.b32.xlu0 %v3859_v33, %s4099_s7  ;;  %v2014_v4 = vsel %vm606_vm10, %v5263_v62, %v3768_v8  ;;  %v1067_v34 = vsel %vm606_vm10, %v5254_v49, %v3767_v42  ;;  %v1007_v62 = vsel %vm998_vm3, %v3722_v14, %v3727_v53  ;;  %v2463_v31 = vld [vmem:[#allocation8 + $0x990] sm:$0xff]  ;;  %v3748_v33 = vunpack.i.h.bf16 %v5406_v47  ;;  %v2517_v8 = vld [vmem:[#allocation8 + $0xb40] sm:$0xff]  ;;  %s3582_s20 = sshll.u32 %s5803_s13, 4  ;;  %s3583_s20 = int_to_ptr.hbm [resolvable:$true] %s3582_s20 }
 0x513   :  { %3870 = vrot.lane.b32.xlu2 %v3869_v38, %s4099_s7  ;;  %2962 = vmatpush.msra.mxu2 %v2533_v30  ;;  %v2519_v38 = vld [vmem:[#allocation8 + $0xb50] sm:$0xff]  ;;  %v3747_v14 = vunpack.i.l.bf16 %v5406_v47  ;;  %v1008_v26 = vsel %vm1000_vm4, %v1007_v62, %v3732_v1  ;;  %v2493_v42 = vld [vmem:[#allocation8 + $0xa80] sm:$0xff] }
 0x514   :  { %2942 = vmatpush.msra.mxu1 %v2501_v43  ;;  %2980 = vmatpush.msra.mxu3 %v2569_v44  ;;  %v2559_v40 = vld [vmem:[#allocation8 + $0xc90] sm:$0xff]  ;;  %v2461_v43 = vld [vmem:[#allocation8 + $0x980] sm:$0xff]  ;;  %v1954_v44 = vsel %vm998_vm3, %v3723_v39, %v3757_v54  ;;  %v2107_v20 = vperm.slane %v1008_v26, 0 }
 0x515   :  { %2963 = vmatpush.msra.mxu2 %v2531_v58  ;;  %2921 = vmatpush.msrb.mxu0 %v2471_v45  ;;  %v2557_v53 = vld [vmem:[#allocation8 + $0xc80] sm:$0xff]  ;;  %v2555_v1 = vld [vmem:[#allocation8 + $0xc70] sm:$0xff] }
 0x516   :  { %2943 = vmatpush.msra.mxu1 %v2499_v46  ;;  %2981 = vmatpush.msra.mxu3 %v2567_v10  ;;  %v3733_v10 = vunpack.i.h.bf16 %v5442_v36  ;;  %v2553_v54 = vld [vmem:[#allocation8 + $0xc60] sm:$0xff]  ;;  %v2511_v62 = vld [vmem:[#allocation8 + $0xb10] sm:$0xff] }
 0x517   :  { %v3741_v50 = vpop.permute.xlu1 %3740  ;;  %2964 = vmatpush.msra.mxu2 %v2529_v63  ;;  %2922 = vmatpush.msrb.mxu0 %v2469_v51  ;;  %v3758_v63 = vunpack.i.h.bf16 %v5429_v24  ;;  %v2459_v24 = vld [vmem:[#allocation8 + $0x970] sm:$0xff] }
 0x518   :  { %v3736_v56 = vpop.permute.xlu0 %3735  ;;  %v3743_v32 = vunpack.i.h.bf16 %v3741_v50  ;;  %v3742_v29 = vunpack.i.l.bf16 %v3741_v50  ;;  %2982 = vmatpush.msra.mxu3 %v2565_v60  ;;  %2944 = vmatpush.msra.mxu1 %v2497_v9  ;;  %v2487_v26 = vld [vmem:[#allocation8 + $0xa50] sm:$0xff] }
 0x519   :  { %v3738_v18 = vunpack.i.h.bf16 %v3736_v56  ;;  %v3737_v59 = vunpack.i.l.bf16 %v3736_v56  ;;  %2965 = vmatpush.msra.mxu2 %v2527_v61  ;;  %2923 = vmatpush.msrb.mxu0 %v2467_v37  ;;  %v3728_v61 = vunpack.i.h.bf16 %v5440_v13 }
 0x51a   :  { %2983 = vmatpush.msra.mxu3 %v2563_v16  ;;  %2945 = vmatpush.msra.mxu1 %v2495_v2  ;;  %v2667_v2 = vld [vmem:[#allocation8 + $0xff0] sm:$0xff] }
 0x51b   :  { %v2015_v17 = vsel %vm846_vm13, %v2014_v4, %v3738_v18  ;;  %v1068_v12 = vsel %vm846_vm13, %v1067_v34, %v3737_v59  ;;  %2966 = vmatpush.msra.mxu2 %v2525_v6  ;;  %2924 = vmatpush.msrb.mxu0 %v2465_v21  ;;  %v2016_v58 = vsel %vm992_vm15, %v3738_v18, %v3743_v32  ;;  %v2515_v18 = vld [vmem:[#allocation8 + $0xb30] sm:$0xff]  ;;  %v2513_v32 = vld [vmem:[#allocation8 + $0xb20] sm:$0xff] }
 0x51c   :  { %v2127_v0 = vperm.slane %v2015_v17, 0  ;;  %v2108_v49 = vperm.slane %v1068_v12, 0  ;;  %v1069_v11 = vsel %vm992_vm15, %v3737_v59, %v3742_v29  ;;  %2984 = vmatpush.msra.mxu3 %v2561_v5  ;;  %v2017_v6 = vsel %vm994_vm0, %v2016_v58, %v3748_v33  ;;  %v2491_v59 = vld [vmem:[#allocation8 + $0xa70] sm:$0xff]  ;;  %2946 = vmatpush.msra.mxu1 %v2493_v42  ;;  %v2457_v29 = vld [vmem:[#allocation8 + $0x960] sm:$0xff] }
 0x51d   :  { %2967 = vmatpush.msra.mxu2 %v2523_v7  ;;  %2925 = vmatpush.msrb.mxu0 %v2463_v31  ;;  %v1070_v56 = vsel %vm994_vm0, %v1069_v11, %v3747_v14  ;;  %v2489_v5 = vld [vmem:[#allocation8 + $0xa60] sm:$0xff]  ;;  %v2551_v31 = vld [vmem:[#allocation8 + $0xc50] sm:$0xff] }
 0x51e   :  { %v5462_v30 = vsel %vm2120_vm2, %v2127_v0, %v2108_v49  ;;  %2985 = vmatpush.msra.mxu3 %v2559_v40  ;;  %2947 = vmatpush.msra.mxu1 %v2491_v59  ;;  %v2509_v33 = vld [vmem:[#allocation8 + $0xb00] sm:$0xff]  ;;  %v2451_v58 = vld [vmem:[#allocation8 + $0x930] sm:$0xff] }
 0x51f   :  { %2875 = vmatmul.f32.vlgmr.msrb.gmra.mxu1 %v5462_v30  ;;  %v3761_v22 = vpop.permute.xlu1 %3760  ;;  %2968 = vmatpush.msra.mxu2 %v2521_v25  ;;  %v2455_v25 = vld [vmem:[#allocation8 + $0x950] sm:$0xff]  ;;  %v2549_v14 = vld [vmem:[#allocation8 + $0xc40] sm:$0xff] }
 0x520   :  { %v3763_v45 = vunpack.i.h.bf16 %v3761_v22  ;;  %v3762_v47 = vunpack.i.l.bf16 %v3761_v22  ;;  %v3751_v46 = vpop.permute.xlu0 %3750  ;;  %2926 = vmatpush.msrb.mxu0 %v2461_v43  ;;  %2986 = vmatpush.msra.mxu3 %v2557_v53  ;;  %v2665_v11 = vld [vmem:[#allocation8 + $0xfe0] sm:$0xff]  ;;  %v2547_v22 = vld [vmem:[#allocation8 + $0xc30] sm:$0xff] }
 0x521   :  { %v3753_v50 = vunpack.i.h.bf16 %v3751_v46  ;;  %v3752_v51 = vunpack.i.l.bf16 %v3751_v46  ;;  %2969 = vmatpush.msra.mxu2 %v2519_v38  ;;  %v2453_v38 = vld [vmem:[#allocation8 + $0x940] sm:$0xff]  ;;  %2948 = vmatpush.msra.mxu1 %v2489_v5  ;;  %v2699_v53 = vld [vmem:[#allocation8 + $0x10f0] sm:$0xff] }
 0x522   :  { %v1955_v39 = vsel %vm1000_vm4, %v1954_v44, %v3762_v47  ;;  %2927 = vmatpush.msrb.mxu0 %v2459_v24  ;;  %2987 = vmatpush.msra.mxu3 %v2555_v1  ;;  %v2485_v40 = vld [vmem:[#allocation8 + $0xa40] sm:$0xff]  ;;  %v2447_v47 = vld [vmem:[#allocation8 + $0x910] sm:$0xff] }
 0x523   :  { %v2126_v13 = vperm.slane %v1955_v39, 0  ;;  %v2019_v36 = vsel %vm998_vm3, %v3753_v50, %v3758_v63  ;;  %v1071_v60 = vsel %vm996_vm1, %v1070_v56, %v3752_v51  ;;  %v1072_v37 = vsel %vm998_vm3, %v3752_v51, %v3728_v61  ;;  %2970 = vmatpush.msra.mxu2 %v2517_v8  ;;  %v2449_v43 = vld [vmem:[#allocation8 + $0x920] sm:$0xff]  ;;  %2949 = vmatpush.msra.mxu1 %v2487_v26  ;;  %v2663_v63 = vld [vmem:[#allocation8 + $0xfd0] sm:$0xff] }
 0x524   :  { %v2018_v4 = vsel %vm996_vm1, %v2017_v6, %v3753_v50  ;;  %v2109_v34 = vperm.slane %v1071_v60, 0  ;;  %v1073_v7 = vsel %vm1000_vm4, %v1072_v37, %v3733_v10  ;;  %v2020_v9 = vsel %vm1000_vm4, %v2019_v36, %v3763_v45  ;;  %2928 = vmatpush.msrb.mxu0 %v2457_v29  ;;  %2988 = vmatpush.msra.mxu3 %v2553_v54  ;;  %v2545_v44 = vld [vmem:[#allocation8 + $0xc20] sm:$0xff]  ;;  %v2483_v45 = vld [vmem:[#allocation8 + $0xa30] sm:$0xff] }
 0x525   :  { %v2128_v17 = vperm.slane %v2018_v4, 0  ;;  %v5486_v12 = vsel %vm2120_vm2, %v2126_v13, %v2107_v20  ;;  %v2110_v16 = vperm.slane %v1073_v7, 0  ;;  %v2129_v21 = vperm.slane %v2020_v9, 0  ;;  %2971 = vmatpush.msra.mxu2 %v2515_v18  ;;  %2950 = vmatpush.msra.mxu1 %v2485_v40  ;;  %v2661_v46 = vld [vmem:[#allocation8 + $0xfc0] sm:$0xff]  ;;  %v2543_v8 = vld [vmem:[#allocation8 + $0xc10] sm:$0xff]  ;;  %v3781_v18 = vpop.permute.xlu2 %3780 }
 0x526   :  { %2855 = vmatmul.f32.vlgmr.msra.gmra.mxu0 %v5486_v12  ;;  %2989 = vmatpush.msra.mxu3 %v2551_v31  ;;  %v2481_v42 = vld [vmem:[#allocation8 + $0xa20] sm:$0xff]  ;;  %v2659_v10 = vld [vmem:[#allocation8 + $0xfb0] sm:$0xff] }
 0x527   :  { %v5491_v0 = vsel %vm2120_vm2, %v2128_v17, %v2109_v34  ;;  %v5495_v49 = vsel %vm2120_vm2, %v2129_v21, %v2110_v16  ;;  %2972 = vmatpush.msra.mxu2 %v2513_v32  ;;  %2929 = vmatpush.msrb.mxu0 %v2455_v25  ;;  %v2445_v61 = vld [vmem:[#allocation8 + $0x900] sm:$0xff]  ;;  %v2603_v51 = vld [vmem:[#allocation8 + $0xdf0] sm:$0xff]  ;;  %v3783_v17 = vunpack.i.h.bf16 %v3781_v18  ;;  %v3782_v16 = vunpack.i.l.bf16 %v3781_v18 }
 0x528   :  { %2895 = vmatmul.f32.vlgmr.msrb.gmra.mxu2 %v5491_v0  ;;  %2915 = vmatmul.f32.vlgmr.msrb.gmra.mxu3 %v5495_v49  ;;  %v2541_v50 = vld [vmem:[#allocation8 + $0xc00] sm:$0xff]  ;;  %v2479_v39 = vld [vmem:[#allocation8 + $0xa10] sm:$0xff] }
 0x529   :  { %2973 = vmatpush.msra.mxu2 %v2511_v62  ;;  %2930 = vmatpush.msrb.mxu0 %v2453_v38  ;;  %v2657_v24 = vld [vmem:[#allocation8 + $0xfa0] sm:$0xff]  ;;  %v2655_v6 = vld [vmem:[#allocation8 + $0xf90] sm:$0xff] }
 0x52a   :  { %2990 = vmatpush.msra.mxu3 %v2549_v14  ;;  %2951 = vmatpush.msra.mxu1 %v2483_v45  ;;  %v2601_v20 = vld [vmem:[#allocation8 + $0xde0] sm:$0xff]  ;;  %v2599_v13 = vld [vmem:[#allocation8 + $0xdd0] sm:$0xff] }
 0x52b   :  { %2974 = vmatpush.msra.mxu2 %v2509_v33  ;;  %2931 = vmatpush.msrb.mxu0 %v2451_v58  ;;  %v2697_v56 = vld [vmem:[#allocation8 + $0x10e0] sm:$0xff]  ;;  %v2695_v4 = vld [vmem:[#allocation8 + $0x10d0] sm:$0xff] }
 0x52c   :  { %2991 = vmatpush.msra.mxu3 %v2547_v22  ;;  %2952 = vmatpush.msra.mxu1 %v2481_v42  ;;  %v2477_v36 = vld [vmem:[#allocation8 + $0xa00] sm:$0xff]  ;;  %v2635_v29 = vld [vmem:[#allocation8 + $0xef0] sm:$0xff] }
 0x52d   :  { %3039 = vmatpush.msrb.mxu2 %v2667_v2  ;;  %2932 = vmatpush.msrb.mxu0 %v2449_v43  ;;  %v2653_v34 = vld [vmem:[#allocation8 + $0xf80] sm:$0xff]  ;;  %v2651_v54 = vld [vmem:[#allocation8 + $0xf70] sm:$0xff] }
 0x52e   :  { %2992 = vmatpush.msra.mxu3 %v2545_v44  ;;  %2953 = vmatpush.msra.mxu1 %v2479_v39  ;;  %v2597_v32 = vld [vmem:[#allocation8 + $0xdc0] sm:$0xff]  ;;  %v2595_v5 = vld [vmem:[#allocation8 + $0xdb0] sm:$0xff] }
 0x52f   :  { %3040 = vmatpush.msrb.mxu2 %v2665_v11  ;;  %2933 = vmatpush.msrb.mxu0 %v2447_v47  ;;  %v2693_v21 = vld [vmem:[#allocation8 + $0x10c0] sm:$0xff]  ;;  %v2691_v2 = vld [vmem:[#allocation8 + $0x10b0] sm:$0xff] }
 0x530   :  { %2993 = vmatpush.msra.mxu3 %v2543_v8  ;;  %2954 = vmatpush.msra.mxu1 %v2477_v36  ;;  %v2633_v31 = vld [vmem:[#allocation8 + $0xee0] sm:$0xff]  ;;  %v2631_v22 = vld [vmem:[#allocation8 + $0xed0] sm:$0xff] }
 0x531   :  { %3041 = vmatpush.msrb.mxu2 %v2663_v63  ;;  %2934 = vmatpush.msrb.mxu0 %v2445_v61  ;;  %v2649_v14 = vld [vmem:[#allocation8 + $0xf60] sm:$0xff]  ;;  %v2647_v44 = vld [vmem:[#allocation8 + $0xf50] sm:$0xff] }
 0x532   :  { %2994 = vmatpush.msra.mxu3 %v2541_v50  ;;  %3019 = vmatpush.msrb.mxu1 %v2635_v29  ;;  %v2593_v11 = vld [vmem:[#allocation8 + $0xda0] sm:$0xff]  ;;  %v2591_v45 = vld [vmem:[#allocation8 + $0xd90] sm:$0xff] }
 0x533   :  { %3042 = vmatpush.msrb.mxu2 %v2661_v46  ;;  %2999 = vmatpush.msra.mxu0 %v2603_v51  ;;  %v2689_v40 = vld [vmem:[#allocation8 + $0x10a0] sm:$0xff]  ;;  %v2687_v61 = vld [vmem:[#allocation8 + $0x1090] sm:$0xff] }
 0x534   :  { %3059 = vmatpush.msrb.mxu3 %v2699_v53  ;;  %3020 = vmatpush.msrb.mxu1 %v2633_v31  ;;  %v2629_v42 = vld [vmem:[#allocation8 + $0xec0] sm:$0xff]  ;;  %v2587_v18 = vld [vmem:[#allocation8 + $0xd70] sm:$0xff] }
 0x535   :  { %3043 = vmatpush.msrb.mxu2 %v2659_v10  ;;  %3000 = vmatpush.msra.mxu0 %v2601_v20  ;;  %v2645_v51 = vld [vmem:[#allocation8 + $0xf40] sm:$0xff] }
 0x536   :  { %v3776_v59 = vpop.permute.xlu1 %3775  ;;  %3060 = vmatpush.msrb.mxu3 %v2697_v56  ;;  %3021 = vmatpush.msrb.mxu1 %v2631_v22  ;;  %v2589_v53 = vld [vmem:[#allocation8 + $0xd80] sm:$0xff] }
 0x537   :  { %3044 = vmatpush.msrb.mxu2 %v2657_v24  ;;  %v3778_v60 = vunpack.i.h.bf16 %v3776_v59  ;;  %v3777_v37 = vunpack.i.l.bf16 %v3776_v59  ;;  %v5499_v1 = vpop.permute.xlu0 %3770  ;;  %3001 = vmatpush.msra.mxu0 %v2599_v13  ;;  %v2627_v24 = vld [vmem:[#allocation8 + $0xeb0] sm:$0xff]  ;;  %v2685_v20 = vld [vmem:[#allocation8 + $0x1080] sm:$0xff] }
 0x538   :  { %v3773_v7 = vunpack.i.h.bf16 %v5499_v1  ;;  %v3772_v9 = vunpack.i.l.bf16 %v5499_v1  ;;  %3061 = vmatpush.msrb.mxu3 %v2695_v4  ;;  %3022 = vmatpush.msrb.mxu1 %v2629_v42  ;;  %v2625_v36 = vld [vmem:[#allocation8 + $0xea0] sm:$0xff]  ;;  %v2615_v1 = vld [vmem:[#allocation8 + $0xe50] sm:$0xff] }
 0x539   :  { %3045 = vmatpush.msrb.mxu2 %v2655_v6  ;;  %3002 = vmatpush.msra.mxu0 %v2597_v32  ;;  %v2643_v6 = vld [vmem:[#allocation8 + $0xf30] sm:$0xff] }
 0x53a   :  { %v2026_v62 = vsel %vm998_vm3, %v3773_v7, %v3778_v60  ;;  %v1079_v25 = vsel %vm998_vm3, %v3772_v9, %v3777_v37  ;;  %3062 = vmatpush.msrb.mxu3 %v2693_v21  ;;  %v2683_v60 = vld [vmem:[#allocation8 + $0x1070] sm:$0xff]  ;;  %v3796_v37 = vpop.permute.xlu2 %3795  ;;  %3023 = vmatpush.msrb.mxu1 %v2627_v24 }
 0x53b   :  { %3046 = vmatpush.msrb.mxu2 %v2653_v34  ;;  %v1080_v33 = vsel %vm1000_vm4, %v1079_v25, %v3782_v16  ;;  %v2027_v38 = vsel %vm1000_vm4, %v2026_v62, %v3783_v17  ;;  %3003 = vmatpush.msra.mxu0 %v2595_v5  ;;  %v2623_v32 = vld [vmem:[#allocation8 + $0xe90] sm:$0xff]  ;;  %v2681_v17 = vld [vmem:[#allocation8 + $0x1060] sm:$0xff]  ;;  %v3798_v21 = vunpack.i.h.bf16 %v3796_v37 }
 0x53c   :  { %v2113_v26 = vperm.slane %v1080_v33, 0  ;;  %v2132_v58 = vperm.slane %v2027_v38, 0  ;;  %3063 = vmatpush.msrb.mxu3 %v2691_v2  ;;  %3024 = vmatpush.msrb.mxu1 %v2625_v36  ;;  %v2639_v16 = vld [vmem:[#allocation8 + $0xf10] sm:$0xff]  ;;  %v2621_v5 = vld [vmem:[#allocation8 + $0xe80] sm:$0xff] }
 0x53d   :  { %3047 = vmatpush.msrb.mxu2 %v2651_v54  ;;  %3004 = vmatpush.msra.mxu0 %v2593_v11  ;;  %v3797_v54 = vunpack.i.l.bf16 %v3796_v37  ;;  %v2583_v25 = vld [vmem:[#allocation8 + $0xd50] sm:$0xff]  ;;  %v2637_v2 = vld [vmem:[#allocation8 + $0xf00] sm:$0xff]  ;;  %v2210_v37 = vld [vmem:[#allocation8 + $0x1a8] sm:$0xff] }
 0x53e   :  { %v5511_v43 = vpop.permute.xlu1 %3790  ;;  %v5515_v63 = vsel %vm2120_vm2, %v2132_v58, %v2113_v26  ;;  %3064 = vmatpush.msrb.mxu3 %v2689_v40  ;;  %3025 = vmatpush.msrb.mxu1 %v2623_v32  ;;  %v2679_v38 = vld [vmem:[#allocation8 + $0x1050] sm:$0xff]  ;;  %v2581_v58 = vld [vmem:[#allocation8 + $0xd40] sm:$0xff] }
 0x53f   :  { %3048 = vmatpush.msrb.mxu2 %v2649_v14  ;;  %v3793_v47 = vunpack.i.h.bf16 %v5511_v43  ;;  %v3792_v46 = vunpack.i.l.bf16 %v5511_v43  ;;  %v3786_v8 = vpop.permute.xlu0 %3785  ;;  %3005 = vmatpush.msra.mxu0 %v2591_v45  ;;  %v2619_v11 = vld [vmem:[#allocation8 + $0xe70] sm:$0xff]  ;;  %v2677_v43 = vld [vmem:[#allocation8 + $0x1040] sm:$0xff] }
 0x540   :  { %2975 = vmatmul.f32.vlgmr.msra.gmra.mxu2 %v5515_v63  ;;  %v3788_v10 = vunpack.i.h.bf16 %v3786_v8  ;;  %v3787_v50 = vunpack.i.l.bf16 %v3786_v8  ;;  %3065 = vmatpush.msrb.mxu3 %v2687_v61  ;;  %v2617_v8 = vld [vmem:[#allocation8 + $0xe60] sm:$0xff]  ;;  %v2575_v24 = vld [vmem:[#allocation8 + $0xd10] sm:$0xff] }
 0x541   :  { %3049 = vmatpush.msrb.mxu2 %v2647_v44  ;;  %3006 = vmatpush.msra.mxu0 %v2589_v53  ;;  %v2023_v14 = vsel %vm992_vm15, %v3793_v47, %v3798_v21  ;;  %v1076_v26 = vsel %vm992_vm15, %v3792_v46, %v3797_v54  ;;  %v2220_v44 = vld [vmem:[#allocation8 + $0x1f8] sm:$0xff]  ;;  %v2731_v36 = vld [vmem:[#allocation8 + $0x11f0] sm:$0xff]  ;;  %v2605_v32 = vld [vmem:[#allocation8 + $0xe00] sm:$0xff] }
 0x542   :  { %v2021_v39 = vsel %vm606_vm10, %v5290_v3, %v3788_v10  ;;  %v1074_v56 = vsel %vm606_vm10, %v5287_v28, %v3787_v50  ;;  %3066 = vmatpush.msrb.mxu3 %v2685_v20  ;;  %v2641_v3 = vld [vmem:[#allocation8 + $0xf20] sm:$0xff]  ;;  %3026 = vmatpush.msrb.mxu1 %v2621_v5  ;;  %v2675_v10 = vld [vmem:[#allocation8 + $0x1030] sm:$0xff]  ;;  %v2218_v50 = vld [vmem:[#allocation8 + $0x1e8] sm:$0xff] }
 0x543   :  { %v1075_v59 = vsel %vm846_vm13, %v1074_v56, %v3792_v46  ;;  %v2022_v13 = vsel %vm846_vm13, %v2021_v39, %v3793_v47  ;;  %3050 = vmatpush.msrb.mxu2 %v2645_v51  ;;  %3007 = vmatpush.msra.mxu0 %v2587_v18  ;;  %v2585_v28 = vld [vmem:[#allocation8 + $0xd60] sm:$0xff]  ;;  %v2579_v46 = vld [vmem:[#allocation8 + $0xd30] sm:$0xff]  ;;  %v2216_v53 = vld [vmem:[#allocation8 + $0x1d8] sm:$0xff]  ;;  %v5546_v54 = vpop.permute.xlu2 %3810 }
 0x544   :  { %v2111_v4 = vperm.slane %v1075_v59, 0  ;;  %v2130_v34 = vperm.slane %v2022_v13, 0  ;;  %3067 = vmatpush.msrb.mxu3 %v2683_v60  ;;  %3027 = vmatpush.msrb.mxu1 %v2619_v11  ;;  %v2577_v51 = vld [vmem:[#allocation8 + $0xd20] sm:$0xff]  ;;  %v2671_v39 = vld [vmem:[#allocation8 + $0x1010] sm:$0xff]  ;;  %v2214_v56 = vld [vmem:[#allocation8 + $0x1c8] sm:$0xff] }
 0x545   :  { %3051 = vmatpush.msrb.mxu2 %v2643_v6  ;;  %3008 = vmatpush.msra.mxu0 %v2585_v28  ;;  %v2613_v20 = vld [vmem:[#allocation8 + $0xe40] sm:$0xff]  ;;  %v2611_v18 = vld [vmem:[#allocation8 + $0xe30] sm:$0xff]  ;;  %v2212_v13 = vld [vmem:[#allocation8 + $0x1b8] sm:$0xff] }
 0x546   :  { %v5528_v29 = vsel %vm2120_vm2, %v2130_v34, %v2111_v4  ;;  %3068 = vmatpush.msrb.mxu3 %v2681_v17  ;;  %3028 = vmatpush.msrb.mxu1 %v2617_v8  ;;  %v2573_v6 = vld [vmem:[#allocation8 + $0xd00] sm:$0xff]  ;;  %v2607_v34 = vld [vmem:[#allocation8 + $0xe10] sm:$0xff]  ;;  %v2206_v17 = vld [vmem:[#allocation8 + $0x188] sm:$0xff] }
 0x547   :  { %v3801_v62 = vpop.permute.xlu0 %3800  ;;  %2935 = vmatmul.f32.vlgmr.msrb.gmra.mxu0 %v5528_v29  ;;  %3052 = vmatpush.msrb.mxu2 %v2641_v3  ;;  %v2669_v59 = vld [vmem:[#allocation8 + $0x1000] sm:$0xff]  ;;  %v2208_v3 = vld [vmem:[#allocation8 + $0x198] sm:$0xff]  ;;  %v2727_v28 = vld [vmem:[#allocation8 + $0x11d0] sm:$0xff] }
 0x548   :  { %v3803_v31 = vunpack.i.h.bf16 %v3801_v62  ;;  %v3802_v33 = vunpack.i.l.bf16 %v3801_v62  ;;  %3009 = vmatpush.msra.mxu0 %v2583_v25  ;;  %3069 = vmatpush.msrb.mxu3 %v2679_v38  ;;  %v2609_v60 = vld [vmem:[#allocation8 + $0xe20] sm:$0xff]  ;;  %v2188_v21 = vld [vmem:[#allocation8 + $0xf8] sm:$0xff]  ;;  %v2723_v25 = vld [vmem:[#allocation8 + $0x11b0] sm:$0xff] }
 0x549   :  { %3053 = vmatpush.msrb.mxu2 %v2639_v16  ;;  %3029 = vmatpush.msrb.mxu1 %v2615_v1  ;;  %v2729_v4 = vld [vmem:[#allocation8 + $0x11e0] sm:$0xff]  ;;  %v2204_v62 = vld [vmem:[#allocation8 + $0x178] sm:$0xff]  ;;  %v2250_v1 = vld [vmem:[#allocation8 + $0x2e8] sm:$0xff] }
 0x54a   :  { %v2024_v22 = vsel %vm994_vm0, %v2023_v14, %v3803_v31  ;;  %v1077_v40 = vsel %vm994_vm0, %v1076_v26, %v3802_v33  ;;  %3010 = vmatpush.msra.mxu0 %v2581_v58  ;;  %3070 = vmatpush.msrb.mxu3 %v2677_v43  ;;  %v2725_v16 = vld [vmem:[#allocation8 + $0x11c0] sm:$0xff]  ;;  %v2186_v31 = vld [vmem:[#allocation8 + $0xe8] sm:$0xff]  ;;  %v3813_v26 = vunpack.i.h.bf16 %v5546_v54  ;;  %v3812_v58 = vunpack.i.l.bf16 %v5546_v54  ;;  %v2184_v11 = vld [vmem:[#allocation8 + $0xd8] sm:$0xff] }
 0x54b   :  { %v1078_v45 = vsel %vm996_vm1, %v1077_v40, %v3772_v9  ;;  %v2025_v47 = vsel %vm996_vm1, %v2024_v22, %v3773_v7  ;;  %3054 = vmatpush.msrb.mxu2 %v2637_v2  ;;  %v2673_v7 = vld [vmem:[#allocation8 + $0x1020] sm:$0xff]  ;;  %3030 = vmatpush.msrb.mxu1 %v2613_v20  ;;  %v2202_v2 = vld [vmem:[#allocation8 + $0x168] sm:$0xff]  ;;  %v2200_v43 = vld [vmem:[#allocation8 + $0x158] sm:$0xff] }
 0x54c   :  { %v2112_v42 = vperm.slane %v1078_v45, 0  ;;  %v2131_v61 = vperm.slane %v2025_v47, 0  ;;  %3011 = vmatpush.msra.mxu0 %v2579_v46  ;;  %3071 = vmatpush.msrb.mxu3 %v2675_v10  ;;  %v2721_v14 = vld [vmem:[#allocation8 + $0x11a0] sm:$0xff]  ;;  %v2182_v46 = vld [vmem:[#allocation8 + $0xc8] sm:$0xff] }
 0x54d   :  { %3119 = vmatpush.msra.mxu2 %v2220_v44  ;;  %3031 = vmatpush.msrb.mxu1 %v2611_v18  ;;  %v2719_v44 = vld [vmem:[#allocation8 + $0x1190] sm:$0xff]  ;;  %v2194_v20 = vld [vmem:[#allocation8 + $0x128] sm:$0xff]  ;;  %v2192_v18 = vld [vmem:[#allocation8 + $0x118] sm:$0xff] }
 0x54e   :  { %v5543_v9 = vsel %vm2120_vm2, %v2131_v61, %v2112_v42  ;;  %3012 = vmatpush.msra.mxu0 %v2577_v51  ;;  %3072 = vmatpush.msrb.mxu3 %v2673_v7  ;;  %v2252_v61 = vld [vmem:[#allocation8 + $0x2f8] sm:$0xff]  ;;  %v2715_v7 = vld [vmem:[#allocation8 + $0x1170] sm:$0xff] }
 0x54f   :  { %2955 = vmatmul.f32.vlgmr.msra.gmra.mxu1 %v5543_v9  ;;  %3120 = vmatpush.msra.mxu2 %v2218_v50  ;;  %v2180_v50 = vld [vmem:[#allocation8 + $0xb8] sm:$0xff] }
 0x550   :  { %3013 = vmatpush.msra.mxu0 %v2575_v24  ;;  %3073 = vmatpush.msrb.mxu3 %v2671_v39  ;;  %v2196_v51 = vld [vmem:[#allocation8 + $0x138] sm:$0xff]  ;;  %v2178_v24 = vld [vmem:[#allocation8 + $0xa8] sm:$0xff] }
 0x551   :  { %3121 = vmatpush.msra.mxu2 %v2216_v53  ;;  %3032 = vmatpush.msrb.mxu1 %v2609_v60  ;;  %v2248_v39 = vld [vmem:[#allocation8 + $0x2d8] sm:$0xff]  ;;  %v2190_v60 = vld [vmem:[#allocation8 + $0x108] sm:$0xff] }
 0x552   :  { %3014 = vmatpush.msra.mxu0 %v2573_v6  ;;  %3074 = vmatpush.msrb.mxu3 %v2669_v59  ;;  %v2176_v6 = vld [vmem:[#allocation8 + $0x98] sm:$0xff]  ;;  %v2246_v59 = vld [vmem:[#allocation8 + $0x2c8] sm:$0xff] }
 0x553   :  { %3122 = vmatpush.msra.mxu2 %v2214_v56  ;;  %3033 = vmatpush.msrb.mxu1 %v2607_v34  ;;  %v2713_v56 = vld [vmem:[#allocation8 + $0x1160] sm:$0xff]  ;;  %v2172_v34 = vld [vmem:[#allocation8 + $0x78] sm:$0xff] }
 0x554   :  { %3079 = vmatpush.msrb.mxu0 %v2731_v36  ;;  %v2174_v36 = vld [vmem:[#allocation8 + $0x88] sm:$0xff] }
 0x555   :  { %3123 = vmatpush.msra.mxu2 %v2212_v13  ;;  %3034 = vmatpush.msrb.mxu1 %v2605_v32  ;;  %v5565_v53 = vpop.permute.xlu2 %3835  ;;  %v2711_v13 = vld [vmem:[#allocation8 + $0x1150] sm:$0xff]  ;;  %v2242_v32 = vld [vmem:[#allocation8 + $0x2a8] sm:$0xff] }
 0x556   :  { %3080 = vmatpush.msrb.mxu0 %v2729_v4  ;;  %v2709_v4 = vld [vmem:[#allocation8 + $0x1140] sm:$0xff] }
 0x557   :  { %3124 = vmatpush.msra.mxu2 %v2210_v37  ;;  %3099 = vmatpush.msra.mxu1 %v2188_v21  ;;  %v2244_v37 = vld [vmem:[#allocation8 + $0x2b8] sm:$0xff] }
 0x558   :  { %3081 = vmatpush.msrb.mxu0 %v2727_v28  ;;  %v2240_v21 = vld [vmem:[#allocation8 + $0x298] sm:$0xff] }
 0x559   :  { %3125 = vmatpush.msra.mxu2 %v2208_v3  ;;  %3100 = vmatpush.msra.mxu1 %v2186_v31  ;;  %v2238_v31 = vld [vmem:[#allocation8 + $0x288] sm:$0xff] }
 0x55a   :  { %3082 = vmatpush.msrb.mxu0 %v2725_v16  ;;  %v2170_v16 = vld [vmem:[#allocation8 + $0x68] sm:$0xff] }
 0x55b   :  { %v3806_v5 = vpop.permute.xlu1 %3805  ;;  %3126 = vmatpush.msra.mxu2 %v2206_v17  ;;  %3101 = vmatpush.msra.mxu1 %v2184_v11  ;;  %v2707_v17 = vld [vmem:[#allocation8 + $0x1130] sm:$0xff]  ;;  %v2164_v11 = vld [vmem:[#allocation8 + $0x38] sm:$0xff] }
 0x55c   :  { %v3808_v33 = vunpack.i.h.bf16 %v3806_v5  ;;  %v3807_v38 = vunpack.i.l.bf16 %v3806_v5  ;;  %3083 = vmatpush.msrb.mxu0 %v2723_v25  ;;  %v2168_v5 = vld [vmem:[#allocation8 + $0x58] sm:$0xff] }
 0x55d   :  { %3127 = vmatpush.msra.mxu2 %v2204_v62  ;;  %3102 = vmatpush.msra.mxu1 %v2182_v46  ;;  %v2705_v62 = vld [vmem:[#allocation8 + $0x1120] sm:$0xff]  ;;  %v5569_v25 = vpop.permute.xlu2 %3845  ;;  %v3838_v46 = vunpack.i.h.bf16 %v5565_v53 }
 0x55e   :  { %v2086_v22 = vsel %vm606_vm10, %v5330_v19, %v3808_v33  ;;  %v1139_v40 = vsel %vm606_vm10, %v5319_v55, %v3807_v38  ;;  %3084 = vmatpush.msrb.mxu0 %v2721_v14  ;;  %v2198_v19 = vld [vmem:[#allocation8 + $0x148] sm:$0xff]  ;;  %v2717_v55 = vld [vmem:[#allocation8 + $0x1180] sm:$0xff]  ;;  %v2703_v33 = vld [vmem:[#allocation8 + $0x1110] sm:$0xff] }
 0x55f   :  { %v1140_v45 = vsel %vm846_vm13, %v1139_v40, %v3812_v58  ;;  %v2087_v47 = vsel %vm846_vm13, %v2086_v22, %v3813_v26  ;;  %3128 = vmatpush.msra.mxu2 %v2202_v2  ;;  %3103 = vmatpush.msra.mxu1 %v2180_v50  ;;  %v2166_v38 = vld [vmem:[#allocation8 + $0x48] sm:$0xff]  ;;  %v2236_v2 = vld [vmem:[#allocation8 + $0x278] sm:$0xff]  ;;  %v2701_v14 = vld [vmem:[#allocation8 + $0x1100] sm:$0xff] }
 0x560   :  { %v2114_v8 = vperm.slane %v1140_v45, 0  ;;  %v2133_v42 = vperm.slane %v2087_v47, 0  ;;  %3085 = vmatpush.msrb.mxu0 %v2719_v44  ;;  %v2162_v47 = vld [vmem:[#allocation8 + $0x28] sm:$0xff] }
 0x561   :  { %3129 = vmatpush.msra.mxu2 %v2200_v43  ;;  %3104 = vmatpush.msra.mxu1 %v2178_v24  ;;  %v2234_v43 = vld [vmem:[#allocation8 + $0x268] sm:$0xff] }
 0x562   :  { %v5562_v10 = vsel %vm2120_vm2, %v2133_v42, %v2114_v8  ;;  %3086 = vmatpush.msrb.mxu0 %v2717_v55  ;;  %v3837_v8 = vunpack.i.l.bf16 %v5565_v53 }
 0x563   :  { %2995 = vmatmul.f32.vlgmr.msra.gmra.mxu3 %v5562_v10  ;;  %3130 = vmatpush.msra.mxu2 %v2198_v19 }
 0x564   :  { %3139 = vmatpush.msra.mxu3 %v2252_v61  ;;  %3087 = vmatpush.msrb.mxu0 %v2715_v7  ;;  %v2232_v61 = vld [vmem:[#allocation8 + $0x258] sm:$0xff] }
 0x565   :  { %3131 = vmatpush.msra.mxu2 %v2196_v51  ;;  %3105 = vmatpush.msra.mxu1 %v2176_v6  ;;  %v2160_v7 = vld [vmem:[#allocation8 + $0x18] sm:$0xff]  ;;  %v5579_v53 = vpop.permute.xlu2 %3850 }
 0x566   :  { %3140 = vmatpush.msra.mxu3 %v2250_v1  ;;  %3088 = vmatpush.msrb.mxu0 %v2713_v56 }
 0x567   :  { %3132 = vmatpush.msra.mxu2 %v2194_v20  ;;  %3106 = vmatpush.msra.mxu1 %v2174_v36 }
 0x568   :  { %3141 = vmatpush.msra.mxu3 %v2248_v39  ;;  %3089 = vmatpush.msrb.mxu0 %v2711_v13  ;;  %v2230_v39 = vld [vmem:[#allocation8 + $0x248] sm:$0xff]  ;;  %v2228_v13 = vld [vmem:[#allocation8 + $0x238] sm:$0xff] }
 0x569   :  { %3133 = vmatpush.msra.mxu2 %v2192_v18  ;;  %3107 = vmatpush.msra.mxu1 %v2172_v34  ;;  %v2158_v18 = vld [vmem:[#allocation8 + $0x8] sm:$0xff] }
 0x56a   :  { %3142 = vmatpush.msra.mxu3 %v2246_v59  ;;  %3090 = vmatpush.msrb.mxu0 %v2709_v4  ;;  %v2348_v59 = vld [vmem:[#allocation8 + $0x5f8] sm:$0xff] }
 0x56b   :  { %3134 = vmatpush.msra.mxu2 %v2190_v60  ;;  %3108 = vmatpush.msra.mxu1 %v2170_v16 }
 0x56c   :  { %v3816_v3 = vpop.permute.xlu1 %3815  ;;  %v5567_v28 = vpop.permute.xlu0 %3825  ;;  %3143 = vmatpush.msra.mxu3 %v2244_v37  ;;  %3091 = vmatpush.msrb.mxu0 %v2707_v17 }
 0x56d   :  { %3109 = vmatpush.msra.mxu1 %v2168_v5  ;;  %v3818_v42 = vunpack.i.h.bf16 %v3816_v3  ;;  %v3817_v19 = vunpack.i.l.bf16 %v3816_v3  ;;  %v3828_v4 = vunpack.i.h.bf16 %v5567_v28  ;;  %v3827_v34 = vunpack.i.l.bf16 %v5567_v28  ;;  %v2376_v28 = vld [vmem:[#allocation8 + $0x6d8] sm:$0xff] }
 0x56e   :  { %3144 = vmatpush.msra.mxu3 %v2242_v32  ;;  %3092 = vmatpush.msrb.mxu0 %v2705_v62  ;;  %v2346_v32 = vld [vmem:[#allocation8 + $0x5e8] sm:$0xff]  ;;  %v3848_v62 = vunpack.i.h.bf16 %v5569_v25  ;;  %v3847_v5 = vunpack.i.l.bf16 %v5569_v25 }
 0x56f   :  { %3110 = vmatpush.msra.mxu1 %v2166_v38 }
 0x570   :  { %3145 = vmatpush.msra.mxu3 %v2240_v21  ;;  %3093 = vmatpush.msrb.mxu0 %v2703_v33  ;;  %v2226_v21 = vld [vmem:[#allocation8 + $0x228] sm:$0xff] }
 0x571   :  { %3111 = vmatpush.msra.mxu1 %v2164_v11 }
 0x572   :  { %3146 = vmatpush.msra.mxu3 %v2238_v31  ;;  %3094 = vmatpush.msrb.mxu0 %v2701_v14  ;;  %v2344_v31 = vld [vmem:[#allocation8 + $0x5d8] sm:$0xff] }
 0x573   :  { %3112 = vmatpush.msra.mxu1 %v2162_v47 }
 0x574   :  { %v3821_v22 = vpop.permute.xlu1 %3820  ;;  %v3831_v40 = vpop.permute.xlu0 %3830  ;;  %3147 = vmatpush.msra.mxu3 %v2236_v2 }
 0x575   :  { %v3833_v44 = vunpack.i.h.bf16 %v3831_v40  ;;  %v3832_v45 = vunpack.i.l.bf16 %v3831_v40  ;;  %v3823_v55 = vunpack.i.h.bf16 %v3821_v22  ;;  %v3822_v50 = vunpack.i.l.bf16 %v3821_v22  ;;  %3113 = vmatpush.msra.mxu1 %v2160_v7  ;;  %v2224_v40 = vld [vmem:[#allocation8 + $0x218] sm:$0xff] }
 0x576   :  { %3148 = vmatpush.msra.mxu3 %v2234_v43 }
 0x577   :  { %v2093_v51 = vsel %vm606_vm10, %v5372_v57, %v3833_v44  ;;  %v1146_v1 = vsel %vm606_vm10, %v5363_v15, %v3832_v45  ;;  %v1141_v57 = vsel %vm992_vm15, %v3812_v58, %v3817_v19  ;;  %v1148_v15 = vsel %vm992_vm15, %v3837_v8, %v3818_v42  ;;  %3114 = vmatpush.msra.mxu1 %v2158_v18  ;;  %v2342_v44 = vld [vmem:[#allocation8 + $0x5c8] sm:$0xff] }
 0x578   :  { %v1147_v24 = vsel %vm846_vm13, %v1146_v1, %v3837_v8  ;;  %v2094_v20 = vsel %vm846_vm13, %v2093_v51, %v3838_v46  ;;  %3149 = vmatpush.msra.mxu3 %v2232_v61  ;;  %v1142_v36 = vsel %vm994_vm0, %v1141_v57, %v3822_v50  ;;  %v1149_v60 = vsel %vm994_vm0, %v1148_v15, %v3823_v55  ;;  %v2222_v45 = vld [vmem:[#allocation8 + $0x208] sm:$0xff]  ;;  %v3871_v61 = vpop.permute.xlu2 %3870  ;;  %v2284_v55 = vld [vmem:[#allocation8 + $0x3f8] sm:$0xff] }
 0x579   :  { %v2117_v56 = vperm.slane %v1147_v24, 0  ;;  %v2136_v6 = vperm.slane %v2094_v20, 0  ;;  %v1143_v33 = vsel %vm996_vm1, %v1142_v36, %v3827_v34  ;;  %v1150_v38 = vsel %vm996_vm1, %v1149_v60, %v3828_v4  ;;  %v2282_v15 = vld [vmem:[#allocation8 + $0x3e8] sm:$0xff] }
 0x57a   :  { %3150 = vmatpush.msra.mxu3 %v2230_v39  ;;  %v2115_v42 = vperm.slane %v1143_v33, 0  ;;  %v2118_v19 = vperm.slane %v1150_v38, 0  ;;  %v3853_v50 = vunpack.i.h.bf16 %v5579_v53  ;;  %v3852_v51 = vunpack.i.l.bf16 %v5579_v53  ;;  %v2380_v39 = vld [vmem:[#allocation8 + $0x6f8] sm:$0xff]  ;;  %v2338_v53 = vld [vmem:[#allocation8 + $0x5a8] sm:$0xff] }
 0x57b   :  { %v5589_v37 = vsel %vm2120_vm2, %v2136_v6, %v2117_v56  ;;  %v2378_v60 = vld [vmem:[#allocation8 + $0x6e8] sm:$0xff] }
 0x57c   :  { %v5593_v3 = vpop.permute.xlu1 %3855  ;;  %v3841_v58 = vpop.permute.xlu0 %3840  ;;  %3055 = vmatmul.f32.vlgmr.msrb.gmra.mxu2 %v5589_v37  ;;  %3151 = vmatpush.msra.mxu3 %v2228_v13  ;;  %v3872_v13 = vunpack.i.l.bf16 %v3871_v61  ;;  %v2334_v38 = vld [vmem:[#allocation8 + $0x588] sm:$0xff] }
 0x57d   :  { %v3843_v17 = vunpack.i.h.bf16 %v3841_v58  ;;  %v3842_v16 = vunpack.i.l.bf16 %v3841_v58  ;;  %3199 = vmatpush.msrb.mxu2 %v2348_v59  ;;  %v3858_v2 = vunpack.i.h.bf16 %v5593_v3  ;;  %v3857_v14 = vunpack.i.l.bf16 %v5593_v3 }
 0x57e   :  { %3152 = vmatpush.msra.mxu3 %v2226_v21  ;;  %v3873_v59 = vunpack.i.h.bf16 %v3871_v61  ;;  %v2326_v61 = vld [vmem:[#allocation8 + $0x548] sm:$0xff] }
 0x57f   :  { %v2095_v11 = vsel %vm992_vm15, %v3838_v46, %v3843_v17  ;;  %v2088_v22 = vsel %vm992_vm15, %v3813_v26, %v3842_v16  ;;  %3200 = vmatpush.msrb.mxu2 %v2346_v32  ;;  %v2340_v46 = vld [vmem:[#allocation8 + $0x5b8] sm:$0xff]  ;;  %v2091_v36 = vsel %vm998_vm3, %v3857_v14, %v3853_v50 }
 0x580   :  { %v2096_v25 = vsel %vm994_vm0, %v2095_v11, %v3848_v62  ;;  %v2089_v43 = vsel %vm994_vm0, %v2088_v22, %v3847_v5  ;;  %3153 = vmatpush.msra.mxu3 %v2224_v40  ;;  %v2280_v16 = vld [vmem:[#allocation8 + $0x3d8] sm:$0xff]  ;;  %v2374_v22 = vld [vmem:[#allocation8 + $0x6c8] sm:$0xff] }
 0x581   :  { %3201 = vmatpush.msrb.mxu2 %v2344_v31  ;;  %v2090_v47 = vsel %vm996_vm1, %v2089_v43, %v3857_v14  ;;  %v2097_v8 = vsel %vm996_vm1, %v2096_v25, %v3858_v2  ;;  %v2316_v11 = vld [vmem:[#allocation8 + $0x4f8] sm:$0xff] }
 0x582   :  { %v2134_v54 = vperm.slane %v2090_v47, 0  ;;  %v2137_v26 = vperm.slane %v2097_v8, 0  ;;  %3154 = vmatpush.msra.mxu3 %v2222_v45  ;;  %v2332_v40 = vld [vmem:[#allocation8 + $0x578] sm:$0xff]  ;;  %v2330_v47 = vld [vmem:[#allocation8 + $0x568] sm:$0xff] }
 0x583   :  { %3202 = vmatpush.msrb.mxu2 %v2342_v44  ;;  %v2276_v43 = vld [vmem:[#allocation8 + $0x3b8] sm:$0xff]  ;;  %v2314_v44 = vld [vmem:[#allocation8 + $0x4e8] sm:$0xff] }
 0x584   :  { %v3866_v1 = vpop.permute.xlu1 %3865  ;;  %v3861_v7 = vpop.permute.xlu0 %3860  ;;  %3135 = vmatmul.f32.vlgmr.msra.gmra.mxu2 %v5338_v23  ;;  %v5617_v24 = vsel %vm2120_vm2, %v2134_v54, %v2115_v42  ;;  %v5621_v20 = vsel %vm2120_vm2, %v2137_v26, %v2118_v19  ;;  %v1144_v23 = vsel %vm998_vm3, %v3827_v34, %v3852_v51  ;;  %v2336_v34 = vld [vmem:[#allocation8 + $0x598] sm:$0xff]  ;;  %v2274_v8 = vld [vmem:[#allocation8 + $0x3a8] sm:$0xff] }
 0x585   :  { %v3868_v56 = vunpack.i.h.bf16 %v3866_v1  ;;  %v3867_v6 = vunpack.i.l.bf16 %v3866_v1  ;;  %v3863_v18 = vunpack.i.h.bf16 %v3861_v7  ;;  %v3862_v57 = vunpack.i.l.bf16 %v3861_v7  ;;  %3203 = vmatpush.msrb.mxu2 %v2340_v46  ;;  %3015 = vmatmul.f32.vlgmr.msra.gmra.mxu0 %v5617_v24  ;;  %v2372_v45 = vld [vmem:[#allocation8 + $0x6b8] sm:$0xff]  ;;  %v2370_v42 = vld [vmem:[#allocation8 + $0x6a8] sm:$0xff] }
 0x586   :  { %3075 = vmatmul.f32.vlgmr.msrb.gmra.mxu3 %v5621_v20  ;;  %3159 = vmatpush.msra.mxu0 %v2284_v55  ;;  %v2312_v46 = vld [vmem:[#allocation8 + $0x4d8] sm:$0xff]  ;;  %v2310_v19 = vld [vmem:[#allocation8 + $0x4c8] sm:$0xff] }
 0x587   :  { %v1151_v3 = vsel %vm998_vm3, %v3828_v4, %v3867_v6  ;;  %v2098_v58 = vsel %vm998_vm3, %v3858_v2, %v3868_v56  ;;  %v2092_v32 = vsel %vm1000_vm4, %v2091_v36, %v3863_v18  ;;  %v1145_v17 = vsel %vm1000_vm4, %v1144_v23, %v3862_v57  ;;  %3219 = vmatpush.msrb.mxu3 %v2380_v39  ;;  %v2278_v2 = vld [vmem:[#allocation8 + $0x3c8] sm:$0xff]  ;;  %v2272_v54 = vld [vmem:[#allocation8 + $0x398] sm:$0xff] }
 0x588   :  { %v1152_v21 = vsel %vm1000_vm4, %v1151_v3, %v3872_v13  ;;  %v2099_v62 = vsel %vm1000_vm4, %v2098_v58, %v3873_v59  ;;  %v2135_v5 = vperm.slane %v2092_v32, 0  ;;  %v2116_v31 = vperm.slane %v1145_v17, 0  ;;  %3204 = vmatpush.msrb.mxu2 %v2338_v53  ;;  %3160 = vmatpush.msra.mxu0 %v2282_v15  ;;  %v2368_v26 = vld [vmem:[#allocation8 + $0x698] sm:$0xff]  ;;  %v2270_v55 = vld [vmem:[#allocation8 + $0x388] sm:$0xff] }
 0x589   :  { %v2119_v33 = vperm.slane %v1152_v21, 0  ;;  %v2138_v4 = vperm.slane %v2099_v62, 0  ;;  %3220 = vmatpush.msrb.mxu3 %v2378_v60  ;;  %v2308_v50 = vld [vmem:[#allocation8 + $0x4b8] sm:$0xff]  ;;  %v2306_v7 = vld [vmem:[#allocation8 + $0x4a8] sm:$0xff] }
 0x58a   :  { %3205 = vmatpush.msrb.mxu2 %v2336_v34  ;;  %3161 = vmatpush.msra.mxu0 %v2280_v16  ;;  %v5637_v14 = vsel %vm2120_vm2, %v2135_v5, %v2116_v31  ;;  %v2324_v51 = vld [vmem:[#allocation8 + $0x538] sm:$0xff]  ;;  %v2322_v56 = vld [vmem:[#allocation8 + $0x528] sm:$0xff] }
 0x58b   :  { %3221 = vmatpush.msrb.mxu3 %v2376_v28  ;;  %3035 = vmatmul.f32.vlgmr.msrb.gmra.mxu1 %v5637_v14  ;;  %v5642_v25 = vsel %vm2120_vm2, %v2138_v4, %v2119_v33  ;;  %v2268_v1 = vld [vmem:[#allocation8 + $0x378] sm:$0xff]  ;;  %v2266_v6 = vld [vmem:[#allocation8 + $0x368] sm:$0xff] }
 0x58c   :  { %3206 = vmatpush.msrb.mxu2 %v2334_v38  ;;  %3162 = vmatpush.msra.mxu0 %v2278_v2  ;;  %v2364_v39 = vld [vmem:[#allocation8 + $0x678] sm:$0xff]  ;;  %v2362_v57 = vld [vmem:[#allocation8 + $0x668] sm:$0xff] }
 0x58d   :  { %3179 = vmatpush.msrb.mxu1 %v2316_v11  ;;  %3222 = vmatpush.msrb.mxu3 %v2374_v22  ;;  %v2304_v18 = vld [vmem:[#allocation8 + $0x498] sm:$0xff]  ;;  %v2302_v23 = vld [vmem:[#allocation8 + $0x488] sm:$0xff] }
 0x58e   :  { %3207 = vmatpush.msrb.mxu2 %v2332_v40  ;;  %3095 = vmatmul.f32.vlgmr.msrb.gmra.mxu0 %v5642_v25  ;;  %v2320_v53 = vld [vmem:[#allocation8 + $0x518] sm:$0xff]  ;;  %v2318_v59 = vld [vmem:[#allocation8 + $0x508] sm:$0xff] }
 0x58f   :  { %3155 = vmatmul.f32.vlgmr.msra.gmra.mxu3 %v5356_v52  ;;  %3163 = vmatpush.msra.mxu0 %v2276_v43  ;;  %v2366_v52 = vld [vmem:[#allocation8 + $0x688] sm:$0xff]  ;;  %v2264_v15 = vld [vmem:[#allocation8 + $0x358] sm:$0xff] }
 0x590   :  { %3180 = vmatpush.msrb.mxu1 %v2314_v44  ;;  %3223 = vmatpush.msrb.mxu3 %v2372_v45  ;;  %v2262_v13 = vld [vmem:[#allocation8 + $0x348] sm:$0xff]  ;;  %v2300_v36 = vld [vmem:[#allocation8 + $0x478] sm:$0xff] }
 0x591   :  { %3208 = vmatpush.msrb.mxu2 %v2330_v47  ;;  %3164 = vmatpush.msra.mxu0 %v2274_v8  ;;  %v2358_v60 = vld [vmem:[#allocation8 + $0x648] sm:$0xff]  ;;  %v2476_v3 = vld [vmem:[#allocation8 + $0x9f8] sm:$0xff] }
 0x592   :  { %3181 = vmatpush.msrb.mxu1 %v2312_v46  ;;  %3224 = vmatpush.msrb.mxu3 %v2370_v42  ;;  %v2260_v58 = vld [vmem:[#allocation8 + $0x338] sm:$0xff]  ;;  %v2298_v32 = vld [vmem:[#allocation8 + $0x468] sm:$0xff] }
 0x593   :  { %3209 = vmatpush.msrb.mxu2 %v2328_v41  ;;  %3165 = vmatpush.msra.mxu0 %v2272_v54  ;;  %v2356_v17 = vld [vmem:[#allocation8 + $0x638] sm:$0xff]  ;;  %v2474_v34 = vld [vmem:[#allocation8 + $0x9e8] sm:$0xff] }
 0x594   :  { %3182 = vmatpush.msrb.mxu1 %v2310_v19  ;;  %3225 = vmatpush.msrb.mxu3 %v2368_v26  ;;  %v2258_v16 = vld [vmem:[#allocation8 + $0x328] sm:$0xff]  ;;  %v2296_v21 = vld [vmem:[#allocation8 + $0x458] sm:$0xff] }
 0x595   :  { %3210 = vmatpush.msrb.mxu2 %v2326_v61  ;;  %3115 = vmatmul.f32.vlgmr.msra.gmra.mxu1 %v5345_v27  ;;  %v2360_v27 = vld [vmem:[#allocation8 + $0x658] sm:$0xff]  ;;  %v2354_v62 = vld [vmem:[#allocation8 + $0x628] sm:$0xff] }
 0x596   :  { %3166 = vmatpush.msra.mxu0 %v2270_v55  ;;  %3183 = vmatpush.msrb.mxu1 %v2308_v50  ;;  %v2472_v5 = vld [vmem:[#allocation8 + $0x9d8] sm:$0xff]  ;;  %v2294_v28 = vld [vmem:[#allocation8 + $0x448] sm:$0xff] }
 0x597   :  { %3226 = vmatpush.msrb.mxu3 %v2366_v52  ;;  %3211 = vmatpush.msrb.mxu2 %v2324_v51  ;;  %v2256_v31 = vld [vmem:[#allocation8 + $0x318] sm:$0xff]  ;;  %v2470_v4 = vld [vmem:[#allocation8 + $0x9c8] sm:$0xff] }
 0x598   :  { %3167 = vmatpush.msra.mxu0 %v2268_v1  ;;  %3184 = vmatpush.msrb.mxu1 %v2306_v7  ;;  %v2352_v33 = vld [vmem:[#allocation8 + $0x618] sm:$0xff]  ;;  %v2254_v38 = vld [vmem:[#allocation8 + $0x308] sm:$0xff] }
 0x599   :  { %3227 = vmatpush.msrb.mxu3 %v2364_v39  ;;  %3212 = vmatpush.msrb.mxu2 %v2322_v56  ;;  %v2350_v2 = vld [vmem:[#allocation8 + $0x608] sm:$0xff]  ;;  %v2468_v11 = vld [vmem:[#allocation8 + $0x9b8] sm:$0xff] }
 0x59a   :  { %3168 = vmatpush.msra.mxu0 %v2266_v6  ;;  %3185 = vmatpush.msrb.mxu1 %v2304_v18  ;;  %v2412_v22 = vld [vmem:[#allocation8 + $0x7f8] sm:$0xff]  ;;  %v2290_v43 = vld [vmem:[#allocation8 + $0x428] sm:$0xff] }
 0x59b   :  { %3228 = vmatpush.msrb.mxu3 %v2362_v57  ;;  %3213 = vmatpush.msrb.mxu2 %v2320_v53  ;;  %v2508_v40 = vld [vmem:[#allocation8 + $0xaf8] sm:$0xff]  ;;  %v2466_v44 = vld [vmem:[#allocation8 + $0x9a8] sm:$0xff] }
 0x59c   :  { %3169 = vmatpush.msra.mxu0 %v2264_v15  ;;  %3186 = vmatpush.msrb.mxu1 %v2302_v23  ;;  %v2410_v45 = vld [vmem:[#allocation8 + $0x7e8] sm:$0xff]  ;;  %v2288_v8 = vld [vmem:[#allocation8 + $0x418] sm:$0xff] }
 0x59d   :  { %3229 = vmatpush.msrb.mxu3 %v2360_v27  ;;  %3214 = vmatpush.msrb.mxu2 %v2318_v59  ;;  %v2506_v47 = vld [vmem:[#allocation8 + $0xae8] sm:$0xff]  ;;  %v2464_v46 = vld [vmem:[#allocation8 + $0x998] sm:$0xff] }
 0x59e   :  { %3170 = vmatpush.msra.mxu0 %v2262_v13  ;;  %3187 = vmatpush.msrb.mxu1 %v2300_v36  ;;  %v2408_v42 = vld [vmem:[#allocation8 + $0x7d8] sm:$0xff]  ;;  %v2286_v54 = vld [vmem:[#allocation8 + $0x408] sm:$0xff] }
 0x59f   :  { %3215 = vmatmul.f32.vlgmr.msrb.gmra.mxu2 %v5486_v12  ;;  %3230 = vmatpush.msrb.mxu3 %v2358_v60  ;;  %v2292_v12 = vld [vmem:[#allocation8 + $0x438] sm:$0xff]  ;;  %v2462_v19 = vld [vmem:[#allocation8 + $0x988] sm:$0xff] }
 0x5a0   :  { %3279 = vmatpush.msra.mxu2 %v2476_v3  ;;  %3171 = vmatpush.msra.mxu0 %v2260_v58  ;;  %v2504_v41 = vld [vmem:[#allocation8 + $0xad8] sm:$0xff]  ;;  %v2442_v50 = vld [vmem:[#allocation8 + $0x8e8] sm:$0xff] }
 0x5a1   :  { %3188 = vmatpush.msrb.mxu1 %v2298_v32  ;;  %3231 = vmatpush.msrb.mxu3 %v2356_v17  ;;  %v2444_v26 = vld [vmem:[#allocation8 + $0x8f8] sm:$0xff]  ;;  %v2458_v51 = vld [vmem:[#allocation8 + $0x968] sm:$0xff] }
 0x5a2   :  { %3280 = vmatpush.msra.mxu2 %v2474_v34  ;;  %3172 = vmatpush.msra.mxu0 %v2258_v16  ;;  %v2460_v61 = vld [vmem:[#allocation8 + $0x978] sm:$0xff]  ;;  %v2402_v1 = vld [vmem:[#allocation8 + $0x7a8] sm:$0xff] }
 0x5a3   :  { %3189 = vmatpush.msrb.mxu1 %v2296_v21  ;;  %3232 = vmatpush.msrb.mxu3 %v2354_v62  ;;  %v2404_v55 = vld [vmem:[#allocation8 + $0x7b8] sm:$0xff]  ;;  %v2498_v39 = vld [vmem:[#allocation8 + $0xaa8] sm:$0xff] }
 0x5a4   :  { %3281 = vmatpush.msra.mxu2 %v2472_v5  ;;  %3173 = vmatpush.msra.mxu0 %v2256_v31  ;;  %v2500_v52 = vld [vmem:[#allocation8 + $0xab8] sm:$0xff]  ;;  %v2438_v18 = vld [vmem:[#allocation8 + $0x8c8] sm:$0xff] }
 0x5a5   :  { %3190 = vmatpush.msrb.mxu1 %v2294_v28  ;;  %3233 = vmatpush.msrb.mxu3 %v2352_v33  ;;  %v2440_v7 = vld [vmem:[#allocation8 + $0x8d8] sm:$0xff]  ;;  %v2454_v57 = vld [vmem:[#allocation8 + $0x948] sm:$0xff] }
 0x5a6   :  { %3282 = vmatpush.msra.mxu2 %v2470_v4  ;;  %3174 = vmatpush.msra.mxu0 %v2254_v38  ;;  %v2456_v56 = vld [vmem:[#allocation8 + $0x958] sm:$0xff]  ;;  %v2398_v53 = vld [vmem:[#allocation8 + $0x788] sm:$0xff] }
 0x5a7   :  { %3191 = vmatpush.msrb.mxu1 %v2292_v12  ;;  %3234 = vmatpush.msrb.mxu3 %v2350_v2  ;;  %v2400_v6 = vld [vmem:[#allocation8 + $0x798] sm:$0xff]  ;;  %v2494_v23 = vld [vmem:[#allocation8 + $0xa88] sm:$0xff] }
 0x5a8   :  { %3283 = vmatpush.msra.mxu2 %v2468_v11  ;;  %3175 = vmatmul.f32.vlgmr.msra.gmra.mxu0 %v5389_v48  ;;  %v2406_v48 = vld [vmem:[#allocation8 + $0x7c8] sm:$0xff]  ;;  %v2436_v15 = vld [vmem:[#allocation8 + $0x8b8] sm:$0xff] }
 0x5a9   :  { %3235 = vmatmul.f32.vlgmr.msrb.gmra.mxu3 %v5462_v30  ;;  %3239 = vmatpush.msrb.mxu0 %v2412_v22  ;;  %v2502_v30 = vld [vmem:[#allocation8 + $0xac8] sm:$0xff]  ;;  %v2452_v27 = vld [vmem:[#allocation8 + $0x938] sm:$0xff] }
 0x5aa   :  { %3299 = vmatpush.msra.mxu3 %v2508_v40  ;;  %3192 = vmatpush.msrb.mxu1 %v2290_v43  ;;  %v2396_v59 = vld [vmem:[#allocation8 + $0x778] sm:$0xff]  ;;  %v2434_v13 = vld [vmem:[#allocation8 + $0x8a8] sm:$0xff] }
 0x5ab   :  { %3284 = vmatpush.msra.mxu2 %v2466_v44  ;;  %3240 = vmatpush.msrb.mxu0 %v2410_v45  ;;  %v2492_v36 = vld [vmem:[#allocation8 + $0xa78] sm:$0xff]  ;;  %v2450_v60 = vld [vmem:[#allocation8 + $0x928] sm:$0xff] }
 0x5ac   :  { %3300 = vmatpush.msra.mxu3 %v2506_v47  ;;  %3193 = vmatpush.msrb.mxu1 %v2288_v8  ;;  %v2394_v3 = vld [vmem:[#allocation8 + $0x768] sm:$0xff]  ;;  %v2432_v58 = vld [vmem:[#allocation8 + $0x898] sm:$0xff] }
 0x5ad   :  { %3285 = vmatpush.msra.mxu2 %v2464_v46  ;;  %3241 = vmatpush.msrb.mxu0 %v2408_v42  ;;  %v2490_v32 = vld [vmem:[#allocation8 + $0xa68] sm:$0xff]  ;;  %v2448_v17 = vld [vmem:[#allocation8 + $0x918] sm:$0xff] }
 0x5ae   :  { %3301 = vmatpush.msra.mxu3 %v2504_v41  ;;  %3194 = vmatpush.msrb.mxu1 %v2286_v54  ;;  %v2392_v34 = vld [vmem:[#allocation8 + $0x758] sm:$0xff]  ;;  %v2430_v16 = vld [vmem:[#allocation8 + $0x888] sm:$0xff] }
 0x5af   :  { %3286 = vmatpush.msra.mxu2 %v2462_v19  ;;  %3195 = vmatmul.f32.vlgmr.msrb.gmra.mxu1 %v5420_v35  ;;  %v2496_v35 = vld [vmem:[#allocation8 + $0xa98] sm:$0xff]  ;;  %v2446_v62 = vld [vmem:[#allocation8 + $0x908] sm:$0xff] }
 0x5b0   :  { %3242 = vmatpush.msrb.mxu0 %v2406_v48  ;;  %3259 = vmatpush.msra.mxu1 %v2444_v26  ;;  %v2488_v21 = vld [vmem:[#allocation8 + $0xa58] sm:$0xff]  ;;  %v2390_v5 = vld [vmem:[#allocation8 + $0x748] sm:$0xff] }
 0x5b1   :  { %3302 = vmatpush.msra.mxu3 %v2502_v30  ;;  %3287 = vmatpush.msra.mxu2 %v2460_v61  ;;  %v2428_v31 = vld [vmem:[#allocation8 + $0x878] sm:$0xff]  ;;  %v2486_v28 = vld [vmem:[#allocation8 + $0xa48] sm:$0xff] }
 0x5b2   :  { %3243 = vmatpush.msrb.mxu0 %v2404_v55  ;;  %3260 = vmatpush.msra.mxu1 %v2442_v50  ;;  %v2604_v33 = vld [vmem:[#allocation8 + $0xdf8] sm:$0xff]  ;;  %v2426_v38 = vld [vmem:[#allocation8 + $0x868] sm:$0xff] }
 0x5b3   :  { %3303 = vmatpush.msra.mxu3 %v2500_v52  ;;  %3288 = vmatpush.msra.mxu2 %v2458_v51  ;;  %v2388_v4 = vld [vmem:[#allocation8 + $0x738] sm:$0xff]  ;;  %v2602_v2 = vld [vmem:[#allocation8 + $0xde8] sm:$0xff] }
 0x5b4   :  { %3244 = vmatpush.msrb.mxu0 %v2402_v1  ;;  %3261 = vmatpush.msra.mxu1 %v2440_v7  ;;  %v2484_v12 = vld [vmem:[#allocation8 + $0xa38] sm:$0xff]  ;;  %v2386_v11 = vld [vmem:[#allocation8 + $0x728] sm:$0xff] }
 0x5b5   :  { %3304 = vmatpush.msra.mxu3 %v2498_v39  ;;  %3289 = vmatpush.msra.mxu2 %v2456_v56  ;;  %v2424_v22 = vld [vmem:[#allocation8 + $0x858] sm:$0xff]  ;;  %v2482_v40 = vld [vmem:[#allocation8 + $0xa28] sm:$0xff] }
 0x5b6   :  { %3245 = vmatpush.msrb.mxu0 %v2400_v6  ;;  %3262 = vmatpush.msra.mxu1 %v2438_v18  ;;  %v2600_v43 = vld [vmem:[#allocation8 + $0xdd8] sm:$0xff]  ;;  %v2422_v45 = vld [vmem:[#allocation8 + $0x848] sm:$0xff] }
 0x5b7   :  { %3305 = vmatpush.msra.mxu3 %v2496_v35  ;;  %3290 = vmatpush.msra.mxu2 %v2454_v57  ;;  %v2384_v44 = vld [vmem:[#allocation8 + $0x718] sm:$0xff]  ;;  %v2598_v8 = vld [vmem:[#allocation8 + $0xdc8] sm:$0xff] }
 0x5b8   :  { %3246 = vmatpush.msrb.mxu0 %v2398_v53  ;;  %3263 = vmatpush.msra.mxu1 %v2436_v15  ;;  %v2480_v47 = vld [vmem:[#allocation8 + $0xa18] sm:$0xff]  ;;  %v2382_v46 = vld [vmem:[#allocation8 + $0x708] sm:$0xff] }
 0x5b9   :  { %3306 = vmatpush.msra.mxu3 %v2494_v23  ;;  %3291 = vmatpush.msra.mxu2 %v2452_v27  ;;  %v2478_v42 = vld [vmem:[#allocation8 + $0xa08] sm:$0xff]  ;;  %v2596_v41 = vld [vmem:[#allocation8 + $0xdb8] sm:$0xff] }
 0x5ba   :  { %3247 = vmatpush.msrb.mxu0 %v2396_v59  ;;  %3264 = vmatpush.msra.mxu1 %v2434_v13  ;;  %v2540_v54 = vld [vmem:[#allocation8 + $0xbf8] sm:$0xff]  ;;  %v2418_v48 = vld [vmem:[#allocation8 + $0x828] sm:$0xff] }
 0x5bb   :  { %3307 = vmatpush.msra.mxu3 %v2492_v36  ;;  %3292 = vmatpush.msra.mxu2 %v2450_v60  ;;  %v2636_v19 = vld [vmem:[#allocation8 + $0xef8] sm:$0xff]  ;;  %v2594_v26 = vld [vmem:[#allocation8 + $0xda8] sm:$0xff] }
 0x5bc   :  { %3248 = vmatpush.msrb.mxu0 %v2394_v3  ;;  %3265 = vmatpush.msra.mxu1 %v2432_v58  ;;  %v2538_v30 = vld [vmem:[#allocation8 + $0xbe8] sm:$0xff]  ;;  %v2416_v55 = vld [vmem:[#allocation8 + $0x818] sm:$0xff] }
 0x5bd   :  { %3308 = vmatpush.msra.mxu3 %v2490_v32  ;;  %3293 = vmatpush.msra.mxu2 %v2448_v17  ;;  %v2634_v61 = vld [vmem:[#allocation8 + $0xee8] sm:$0xff]  ;;  %v2592_v50 = vld [vmem:[#allocation8 + $0xd98] sm:$0xff] }
 0x5be   :  { %3249 = vmatpush.msrb.mxu0 %v2392_v34  ;;  %3266 = vmatpush.msra.mxu1 %v2430_v16  ;;  %v2536_v52 = vld [vmem:[#allocation8 + $0xbd8] sm:$0xff]  ;;  %v2414_v1 = vld [vmem:[#allocation8 + $0x808] sm:$0xff] }
 0x5bf   :  { %3309 = vmatpush.msra.mxu3 %v2488_v21  ;;  %3294 = vmatpush.msra.mxu2 %v2446_v62  ;;  %v2632_v51 = vld [vmem:[#allocation8 + $0xed8] sm:$0xff]  ;;  %v2590_v7 = vld [vmem:[#allocation8 + $0xd88] sm:$0xff] }
 0x5c0   :  { %3250 = vmatpush.msrb.mxu0 %v2390_v5  ;;  %3267 = vmatpush.msra.mxu1 %v2428_v31  ;;  %v2572_v39 = vld [vmem:[#allocation8 + $0xcf8] sm:$0xff]  ;;  %v2570_v18 = vld [vmem:[#allocation8 + $0xce8] sm:$0xff] }
 0x5c1   :  { %3295 = vmatmul.f32.vlgmr.msra.gmra.mxu2 %v5528_v29  ;;  %3310 = vmatpush.msra.mxu3 %v2486_v28  ;;  %v2420_v29 = vld [vmem:[#allocation8 + $0x838] sm:$0xff]  ;;  %v2586_v57 = vld [vmem:[#allocation8 + $0xd68] sm:$0xff] }
 0x5c2   :  { %3359 = vmatpush.msrb.mxu2 %v2604_v33  ;;  %3251 = vmatpush.msrb.mxu0 %v2388_v4  ;;  %v2588_v56 = vld [vmem:[#allocation8 + $0xd78] sm:$0xff]  ;;  %v2530_v53 = vld [vmem:[#allocation8 + $0xba8] sm:$0xff] }
 0x5c3   :  { %3268 = vmatpush.msra.mxu1 %v2426_v38  ;;  %3311 = vmatpush.msra.mxu3 %v2484_v12  ;;  %v2532_v6 = vld [vmem:[#allocation8 + $0xbb8] sm:$0xff]  ;;  %v2626_v23 = vld [vmem:[#allocation8 + $0xea8] sm:$0xff]  ;;  %v5655_v38 = vld [vmem:[#allocation10] sm:$0x3]  ;;  %v2756_v12 = vpop.f32.mrf.mxu1 }
 0x5c4   :  { %3360 = vmatpush.msrb.mxu2 %v2602_v2  ;;  %3252 = vmatpush.msrb.mxu0 %v2386_v11  ;;  %v2628_v35 = vld [vmem:[#allocation8 + $0xeb8] sm:$0xff]  ;;  %v2566_v13 = vld [vmem:[#allocation8 + $0xcc8] sm:$0xff] }
 0x5c5   :  { %3269 = vmatpush.msra.mxu1 %v2424_v22  ;;  %3312 = vmatpush.msra.mxu3 %v2482_v40  ;;  %v2568_v15 = vld [vmem:[#allocation8 + $0xcd8] sm:$0xff]  ;;  %v2582_v36 = vld [vmem:[#allocation8 + $0xd48] sm:$0xff] }
 0x5c6   :  { %3361 = vmatpush.msrb.mxu2 %v2600_v43  ;;  %3253 = vmatpush.msrb.mxu0 %v2384_v44  ;;  %v2584_v27 = vld [vmem:[#allocation8 + $0xd58] sm:$0xff]  ;;  %v2526_v60 = vld [vmem:[#allocation8 + $0xb88] sm:$0xff]  ;;  %v2735_v44 = vperm.slane %v5655_v38, 0 }
 0x5c7   :  { %3270 = vmatpush.msra.mxu1 %v2422_v45  ;;  %3313 = vmatpush.msra.mxu3 %v2480_v47  ;;  %v2528_v59 = vld [vmem:[#allocation8 + $0xb98] sm:$0xff]  ;;  %v2622_v58 = vld [vmem:[#allocation8 + $0xe88] sm:$0xff] }
 0x5c8   :  { %3362 = vmatpush.msrb.mxu2 %v2598_v8  ;;  %3254 = vmatpush.msrb.mxu0 %v2382_v46  ;;  %v2564_v3 = vld [vmem:[#allocation8 + $0xcb8] sm:$0xff]  ;;  %v2562_v34 = vld [vmem:[#allocation8 + $0xca8] sm:$0xff]  ;;  %v2776_v8 = vpop.f32.mrf.mxu2 }
 0x5c9   :  { %3271 = vmatpush.msra.mxu1 %v2420_v29  ;;  %3314 = vmatpush.msra.mxu3 %v2478_v42  ;;  %v2580_v32 = vld [vmem:[#allocation8 + $0xd38] sm:$0xff]  ;;  %v2578_v21 = vld [vmem:[#allocation8 + $0xd28] sm:$0xff] }
 0x5ca   :  { %3363 = vmatpush.msrb.mxu2 %v2596_v41  ;;  %3255 = vmatmul.f32.vlgmr.msrb.gmra.mxu0 %v5491_v0  ;;  %v2534_v0 = vld [vmem:[#allocation8 + $0xbc8] sm:$0xff]  ;;  %v2524_v17 = vld [vmem:[#allocation8 + $0xb78] sm:$0xff] }
 0x5cb   :  { %3315 = vmatmul.f32.vlgmr.msra.gmra.mxu3 %v5543_v9  ;;  %3319 = vmatpush.msra.mxu0 %v2540_v54  ;;  %v2630_v9 = vld [vmem:[#allocation8 + $0xec8] sm:$0xff]  ;;  %v2620_v16 = vld [vmem:[#allocation8 + $0xe78] sm:$0xff] }
 0x5cc   :  { %3379 = vmatpush.msrb.mxu3 %v2636_v19  ;;  %3272 = vmatpush.msra.mxu1 %v2418_v48  ;;  %v2522_v62 = vld [vmem:[#allocation8 + $0xb68] sm:$0xff]  ;;  %v2560_v5 = vld [vmem:[#allocation8 + $0xc98] sm:$0xff]  ;;  %v2757_v48 = vadd.f32 %v2756_v12, %v2735_v44 }
 0x5cd   :  { %3364 = vmatpush.msrb.mxu2 %v2594_v26  ;;  %3320 = vmatpush.msra.mxu0 %v2538_v30  ;;  %v2618_v31 = vld [vmem:[#allocation8 + $0xe68] sm:$0xff]  ;;  %v2576_v28 = vld [vmem:[#allocation8 + $0xd18] sm:$0xff] }
 0x5ce   :  { %3380 = vmatpush.msrb.mxu3 %v2634_v61  ;;  %3273 = vmatpush.msra.mxu1 %v2416_v55  ;;  %v2520_v33 = vld [vmem:[#allocation8 + $0xb58] sm:$0xff]  ;;  %v2558_v4 = vld [vmem:[#allocation8 + $0xc88] sm:$0xff] }
 0x5cf   :  { %3365 = vmatpush.msrb.mxu2 %v2592_v50  ;;  %3321 = vmatpush.msra.mxu0 %v2536_v52  ;;  %v2616_v2 = vld [vmem:[#allocation8 + $0xe58] sm:$0xff]  ;;  %v2574_v11 = vld [vmem:[#allocation8 + $0xd08] sm:$0xff]  ;;  %v2777_v50 = vadd.f32 %v2776_v8, %v2757_v48 }
 0x5d0   :  { %3381 = vmatpush.msrb.mxu3 %v2632_v51  ;;  %3274 = vmatpush.msra.mxu1 %v2414_v1  ;;  %v2518_v22 = vld [vmem:[#allocation8 + $0xb48] sm:$0xff]  ;;  %v2556_v40 = vld [vmem:[#allocation8 + $0xc78] sm:$0xff]  ;;  %v2796_v51 = vpop.f32.mrf.mxu1 }
 0x5d1   :  { %3366 = vmatpush.msrb.mxu2 %v2590_v7  ;;  %3275 = vmatmul.f32.vlgmr.msra.gmra.mxu1 %v5495_v49  ;;  %v2624_v49 = vld [vmem:[#allocation8 + $0xe98] sm:$0xff]  ;;  %v2614_v43 = vld [vmem:[#allocation8 + $0xe48] sm:$0xff] }
 0x5d2   :  { %3322 = vmatpush.msra.mxu0 %v2534_v0  ;;  %3339 = vmatpush.msrb.mxu1 %v2572_v39  ;;  %v2732_v45 = vld [vmem:[#allocation8 + $0x11f8] sm:$0xff]  ;;  %v2554_v46 = vld [vmem:[#allocation8 + $0xc68] sm:$0xff]  ;;  %v2816_v39 = vpop.f32.mrf.mxu2 }
 0x5d3   :  { %3382 = vmatpush.msrb.mxu3 %v2630_v9  ;;  %3367 = vmatpush.msrb.mxu2 %v2588_v56  ;;  %v2516_v47 = vld [vmem:[#allocation8 + $0xb38] sm:$0xff]  ;;  %v2730_v42 = vld [vmem:[#allocation8 + $0x11e8] sm:$0xff]  ;;  %v2797_v56 = vadd.f32 %v2796_v51, %v2777_v50 }
 0x5d4   :  { %3323 = vmatpush.msra.mxu0 %v2532_v6  ;;  %3340 = vmatpush.msrb.mxu1 %v2570_v18  ;;  %v2612_v29 = vld [vmem:[#allocation8 + $0xe38] sm:$0xff]  ;;  %v2514_v41 = vld [vmem:[#allocation8 + $0xb28] sm:$0xff] }
 0x5d5   :  { %3383 = vmatpush.msrb.mxu3 %v2628_v35  ;;  %3368 = vmatpush.msrb.mxu2 %v2586_v57  ;;  %v2552_v54 = vld [vmem:[#allocation8 + $0xc58] sm:$0xff]  ;;  %v2610_v19 = vld [vmem:[#allocation8 + $0xe28] sm:$0xff]  ;;  %v2836_v35 = vpop.f32.mrf.mxu3 }
 0x5d6   :  { %3324 = vmatpush.msra.mxu0 %v2530_v53  ;;  %3341 = vmatpush.msrb.mxu1 %v2568_v15  ;;  %v2728_v26 = vld [vmem:[#allocation8 + $0x11d8] sm:$0xff]  ;;  %v2550_v61 = vld [vmem:[#allocation8 + $0xc48] sm:$0xff]  ;;  %v2817_v15 = vadd.f32 %v2816_v39, %v2797_v56 }
 0x5d7   :  { %3384 = vmatpush.msrb.mxu3 %v2626_v23  ;;  %3369 = vmatpush.msrb.mxu2 %v2584_v27  ;;  %v2512_v30 = vld [vmem:[#allocation8 + $0xb18] sm:$0xff]  ;;  %v2510_v52 = vld [vmem:[#allocation8 + $0xb08] sm:$0xff] }
 0x5d8   :  { %3325 = vmatpush.msra.mxu0 %v2528_v59  ;;  %3342 = vmatpush.msrb.mxu1 %v2566_v13  ;;  %v2608_v55 = vld [vmem:[#allocation8 + $0xe18] sm:$0xff]  ;;  %v2606_v7 = vld [vmem:[#allocation8 + $0xe08] sm:$0xff]  ;;  %v2856_v59 = vpop.f32.mrf.mxu0 }
 0x5d9   :  { %3385 = vmatpush.msrb.mxu3 %v2624_v49  ;;  %3370 = vmatpush.msrb.mxu2 %v2582_v36  ;;  %v2548_v1 = vld [vmem:[#allocation8 + $0xc38] sm:$0xff]  ;;  %v2546_v6 = vld [vmem:[#allocation8 + $0xc28] sm:$0xff] }
 0x5da   :  { %3326 = vmatpush.msra.mxu0 %v2526_v60  ;;  %3343 = vmatpush.msrb.mxu1 %v2564_v3  ;;  %v2724_v0 = vld [vmem:[#allocation8 + $0x11b8] sm:$0xff]  ;;  %v2722_v18 = vld [vmem:[#allocation8 + $0x11a8] sm:$0xff] }
 0x5db   :  { %3386 = vmatpush.msrb.mxu3 %v2622_v58  ;;  %3371 = vmatpush.msrb.mxu2 %v2580_v32  ;;  %v2668_v9 = vld [vmem:[#allocation8 + $0xff8] sm:$0xff]  ;;  %v2666_v57 = vld [vmem:[#allocation8 + $0xfe8] sm:$0xff] }
 0x5dc   :  { %3327 = vmatpush.msra.mxu0 %v2524_v17  ;;  %3344 = vmatpush.msrb.mxu1 %v2562_v34  ;;  %v3476_v53 = vld [vmem:[%s5799_s9 + $0x78] sm:$0xff]  ;;  %v3475_v49 = vld [vmem:[%s5799_s9 + $0x70] sm:$0xff]  ;;  %v3474_v34 = vld [vmem:[%s5799_s9 + $0x68] sm:$0xff] }
 0x5dd   :  { %3387 = vmatpush.msrb.mxu3 %v2620_v16  ;;  %3372 = vmatpush.msrb.mxu2 %v2578_v21  ;;  %v2544_v23 = vld [vmem:[#allocation8 + $0xc18] sm:$0xff]  ;;  %v2542_v36 = vld [vmem:[#allocation8 + $0xc08] sm:$0xff] }
 0x5de   :  { %3328 = vmatpush.msra.mxu0 %v2522_v62  ;;  %3345 = vmatpush.msrb.mxu1 %v2560_v5  ;;  %v2720_v27 = vld [vmem:[#allocation8 + $0x1198] sm:$0xff]  ;;  %v2718_v60 = vld [vmem:[#allocation8 + $0x1188] sm:$0xff]  ;;  %v2876_v62 = vpop.f32.mrf.mxu1  ;;  %v2896_v5 = vpop.f32.mrf.mxu2 }
 0x5df   :  { %3388 = vmatpush.msrb.mxu3 %v2618_v31  ;;  %3373 = vmatpush.msrb.mxu2 %v2576_v28  ;;  %v2664_v13 = vld [vmem:[#allocation8 + $0xfd8] sm:$0xff]  ;;  %v2662_v3 = vld [vmem:[#allocation8 + $0xfc8] sm:$0xff] }
 0x5e0   :  { %3329 = vmatpush.msra.mxu0 %v2520_v33  ;;  %3346 = vmatpush.msrb.mxu1 %v2558_v4  ;;  %v2700_v58 = vld [vmem:[#allocation8 + $0x10f8] sm:$0xff]  ;;  %v2698_v16 = vld [vmem:[#allocation8 + $0x10e8] sm:$0xff] }
 0x5e1   :  { %3389 = vmatpush.msrb.mxu3 %v2616_v2  ;;  %3374 = vmatpush.msrb.mxu2 %v2574_v11  ;;  %v2716_v32 = vld [vmem:[#allocation8 + $0x1178] sm:$0xff]  ;;  %v2714_v21 = vld [vmem:[#allocation8 + $0x1168] sm:$0xff] }
 0x5e2   :  { %3330 = vmatpush.msra.mxu0 %v2518_v22  ;;  %3347 = vmatpush.msrb.mxu1 %v2556_v40  ;;  %v2660_v17 = vld [vmem:[#allocation8 + $0xfb8] sm:$0xff]  ;;  %v2658_v31 = vld [vmem:[#allocation8 + $0xfa8] sm:$0xff] }
 0x5e3   :  { %3375 = vmatmul.f32.vlgmr.msrb.gmra.mxu2 %v5617_v24  ;;  %3390 = vmatpush.msrb.mxu3 %v2614_v43  ;;  %v2726_v24 = vld [vmem:[#allocation8 + $0x11c8] sm:$0xff]  ;;  %v3473_v28 = vld [vmem:[%s5799_s9 + $0x60] sm:$0xff]  ;;  %v3472_v2 = vld [vmem:[%s5799_s9 + $0x58] sm:$0xff]  ;;  %v2916_v43 = vpop.f32.mrf.mxu3 }
 0x5e4   :  { %3439 = vmatpush.msra.mxu2 %v2732_v45  ;;  %3331 = vmatpush.msra.mxu0 %v2516_v47  ;;  %v2696_v4 = vld [vmem:[#allocation8 + $0x10d8] sm:$0xff]  ;;  %v2694_v22 = vld [vmem:[#allocation8 + $0x10c8] sm:$0xff] }
 0x5e5   :  { %3348 = vmatpush.msrb.mxu1 %v2554_v46  ;;  %3391 = vmatpush.msrb.mxu3 %v2612_v29  ;;  %v2712_v12 = vld [vmem:[#allocation8 + $0x1158] sm:$0xff]  ;;  %v2710_v40 = vld [vmem:[#allocation8 + $0x1148] sm:$0xff]  ;;  %v2936_v46 = vpop.f32.mrf.mxu0 }
 0x5e6   :  { %3440 = vmatpush.msra.mxu2 %v2730_v42  ;;  %3332 = vmatpush.msra.mxu0 %v2514_v41  ;;  %v2654_v44 = vld [vmem:[#allocation8 + $0xf88] sm:$0xff]  ;;  %v2692_v47 = vld [vmem:[#allocation8 + $0x10b8] sm:$0xff]  ;;  %v2956_v48 = vpop.f32.mrf.mxu1  ;;  %v2976_v56 = vpop.f32.mrf.mxu2 }
 0x5e7   :  { %3349 = vmatpush.msrb.mxu1 %v2552_v54  ;;  %3392 = vmatpush.msrb.mxu3 %v2610_v19  ;;  %v3471_v45 = vld [vmem:[%s5799_s9 + $0x50] sm:$0xff]  ;;  %v2708_v8 = vld [vmem:[#allocation8 + $0x1138] sm:$0xff]  ;;  %v3470_v42 = vld [vmem:[%s5799_s9 + $0x48] sm:$0xff] }
 0x5e8   :  { %3441 = vmatpush.msra.mxu2 %v2728_v26  ;;  %3333 = vmatpush.msra.mxu0 %v2512_v30  ;;  %v2652_v29 = vld [vmem:[#allocation8 + $0xf78] sm:$0xff]  ;;  %v2690_v54 = vld [vmem:[#allocation8 + $0x10a8] sm:$0xff] }
 0x5e9   :  { %3350 = vmatpush.msrb.mxu1 %v2550_v61  ;;  %3393 = vmatpush.msrb.mxu3 %v2608_v55  ;;  %v2706_v19 = vld [vmem:[#allocation8 + $0x1128] sm:$0xff]  ;;  %v3469_v30 = vld [vmem:[%s5799_s9 + $0x40] sm:$0xff] }
 0x5ea   :  { %3442 = vmatpush.msra.mxu2 %v2726_v24  ;;  %3334 = vmatpush.msra.mxu0 %v2510_v52  ;;  %v2650_v26 = vld [vmem:[#allocation8 + $0xf68] sm:$0xff]  ;;  %v2688_v55 = vld [vmem:[#allocation8 + $0x1098] sm:$0xff] }
 0x5eb   :  { %3351 = vmatpush.msrb.mxu1 %v2548_v1  ;;  %3394 = vmatpush.msrb.mxu3 %v2606_v7  ;;  %v2704_v50 = vld [vmem:[#allocation8 + $0x1118] sm:$0xff]  ;;  %v2686_v1 = vld [vmem:[#allocation8 + $0x1088] sm:$0xff] }
 0x5ec   :  { %3443 = vmatpush.msra.mxu2 %v2724_v0  ;;  %3335 = vmatmul.f32.vlgmr.msra.gmra.mxu0 %v5515_v63  ;;  %v2837_v63 = vadd.f32 %v2836_v35, %v2817_v15  ;;  %v2648_v24 = vld [vmem:[#allocation8 + $0xf58] sm:$0xff]  ;;  %v2702_v7 = vld [vmem:[#allocation8 + $0x1108] sm:$0xff] }
 0x5ed   :  { %3395 = vmatmul.f32.vlgmr.msrb.gmra.mxu3 %v5637_v14  ;;  %3399 = vmatpush.msrb.mxu0 %v2668_v9  ;;  %v3468_v52 = vld [vmem:[%s5799_s9 + $0x38] sm:$0xff]  ;;  %v2646_v0 = vld [vmem:[#allocation8 + $0xf48] sm:$0xff] }
 0x5ee   :  { %3352 = vmatpush.msrb.mxu1 %v2546_v6  ;;  %3444 = vmatpush.msra.mxu2 %v2722_v18  ;;  %v2857_v14 = vadd.f32 %v2856_v59, %v2837_v63  ;;  %v2684_v39 = vld [vmem:[#allocation8 + $0x1078] sm:$0xff]  ;;  %v3467_v9 = vld [vmem:[%s5799_s9 + $0x30] sm:$0xff]  ;;  %v2996_v6 = vpop.f32.mrf.mxu3 }
 0x5ef   :  { %3400 = vmatpush.msrb.mxu0 %v2666_v57  ;;  %3497 = vmatpush.msra.mxu3 %v3476_v53  ;;  %v2644_v18 = vld [vmem:[#allocation8 + $0xf38] sm:$0xff]  ;;  %v2682_v57 = vld [vmem:[#allocation8 + $0x1068] sm:$0xff] }
 0x5f0   :  { %3353 = vmatpush.msrb.mxu1 %v2544_v23  ;;  %3445 = vmatpush.msra.mxu2 %v2720_v27  ;;  %v2877_v33 = vadd.f32 %v2876_v62, %v2857_v14  ;;  %v3466_v53 = vld [vmem:[%s5799_s9 + $0x28] sm:$0xff]  ;;  %v2680_v59 = vld [vmem:[#allocation8 + $0x1058] sm:$0xff] }
 0x5f1   :  { %3401 = vmatpush.msrb.mxu0 %v2664_v13  ;;  %3498 = vmatpush.msra.mxu3 %v3475_v49  ;;  %v2642_v15 = vld [vmem:[#allocation8 + $0xf28] sm:$0xff]  ;;  %v3465_v13 = vld [vmem:[%s5799_s9 + $0x20] sm:$0xff] }
 0x5f2   :  { %3354 = vmatpush.msrb.mxu1 %v2542_v36  ;;  %3446 = vmatpush.msra.mxu2 %v2718_v60  ;;  %v2897_v11 = vadd.f32 %v2896_v5, %v2877_v33  ;;  %v2640_v49 = vld [vmem:[#allocation8 + $0xf18] sm:$0xff]  ;;  %v2638_v60 = vld [vmem:[#allocation8 + $0xf08] sm:$0xff] }
 0x5f3   :  { %3355 = vmatmul.f32.vlgmr.msrb.gmra.mxu1 %v5562_v10  ;;  %3402 = vmatpush.msrb.mxu0 %v2662_v3  ;;  %v2656_v10 = vld [vmem:[#allocation8 + $0xf98] sm:$0xff]  ;;  %v3462_v62 = vld [vmem:[%s5799_s9 + $0x8] sm:$0xff] }
 0x5f4   :  { %3419 = vmatpush.msra.mxu1 %v2700_v58  ;;  %3447 = vmatpush.msra.mxu2 %v2716_v32  ;;  %v2917_v41 = vadd.f32 %v2916_v43, %v2897_v11  ;;  %v3464_v36 = vld [vmem:[%s5799_s9 + $0x18] sm:$0xff]  ;;  %v3461_v33 = vld [vmem:[%s5799_s9] sm:$0xff]  ;;  %v3490_v11 = vld [vmem:[%s5799_s9 + $0xe8] sm:$0xff] }
 0x5f5   :  { %3403 = vmatpush.msrb.mxu0 %v2660_v17  ;;  %3499 = vmatpush.msra.mxu3 %v3474_v34  ;;  %v2676_v14 = vld [vmem:[#allocation8 + $0x1038] sm:$0xff]  ;;  %v3463_v17 = vld [vmem:[%s5799_s9 + $0x10] sm:$0xff] }
 0x5f6   :  { %3420 = vmatpush.msra.mxu1 %v2698_v16  ;;  %3448 = vmatpush.msra.mxu2 %v2714_v21  ;;  %v2937_v61 = vadd.f32 %v2936_v46, %v2917_v41  ;;  %v2674_v34 = vld [vmem:[#allocation8 + $0x1028] sm:$0xff]  ;;  %v2672_v5 = vld [vmem:[#allocation8 + $0x1018] sm:$0xff] }
 0x5f7   :  { %3404 = vmatpush.msrb.mxu0 %v2658_v31  ;;  %3500 = vmatpush.msra.mxu3 %v3473_v28  ;;  %v3487_v43 = vld [vmem:[%s5799_s9 + $0xd0] sm:$0xff] }
 0x5f8   :  { %3421 = vmatpush.msra.mxu1 %v2696_v4  ;;  %3449 = vmatpush.msra.mxu2 %v2712_v12  ;;  %v2957_v51 = vadd.f32 %v2956_v48, %v2937_v61  ;;  %v2670_v4 = vld [vmem:[#allocation8 + $0x1008] sm:$0xff]  ;;  %v3481_v61 = vld [vmem:[%s5799_s9 + $0xa0] sm:$0xff] }
 0x5f9   :  { %3405 = vmatpush.msrb.mxu0 %v2656_v10  ;;  %3501 = vmatpush.msra.mxu3 %v3472_v2  ;;  %v3491_v2 = vld [vmem:[%s5799_s9 + $0xf0] sm:$0xff] }
 0x5fa   :  { %3422 = vmatpush.msra.mxu1 %v2694_v22  ;;  %3450 = vmatpush.msra.mxu2 %v2710_v40  ;;  %v2977_v35 = vadd.f32 %v2976_v56, %v2957_v51  ;;  %v3489_v22 = vld [vmem:[%s5799_s9 + $0xe0] sm:$0xff]  ;;  %v2736_v40 = vperm.slane %v5655_v38, 1  ;;  %v3479_v51 = vld [vmem:[%s5799_s9 + $0x90] sm:$0xff] }
 0x5fb   :  { %3406 = vmatpush.msrb.mxu0 %v2654_v44  ;;  %3502 = vmatpush.msra.mxu3 %v3471_v45  ;;  %v3486_v45 = vld [vmem:[%s5799_s9 + $0xc8] sm:$0xff] }
 0x5fc   :  { %3423 = vmatpush.msra.mxu1 %v2692_v47  ;;  %3451 = vmatpush.msra.mxu2 %v2708_v8  ;;  %v2997_v27 = vadd.f32 %v2996_v6, %v2977_v35  ;;  %v3485_v8 = vld [vmem:[%s5799_s9 + $0xc0] sm:$0xff]  ;;  %v3544_v35 = vld [vmem:[%s5801_s11 + $0x30] sm:$0xff] }
 0x5fd   :  { %3407 = vmatpush.msrb.mxu0 %v2652_v29  ;;  %3503 = vmatpush.msra.mxu3 %v3470_v42  ;;  %v3484_v29 = vld [vmem:[%s5799_s9 + $0xb8] sm:$0xff] }
 0x5fe   :  { %3424 = vmatpush.msra.mxu1 %v2690_v54  ;;  %3452 = vmatpush.msra.mxu2 %v2706_v19  ;;  %v3483_v19 = vld [vmem:[%s5799_s9 + $0xb0] sm:$0xff] }
 0x5ff   :  { %3408 = vmatpush.msrb.mxu0 %v2650_v26  ;;  %3504 = vmatpush.msra.mxu3 %v3469_v30  ;;  %v3056_v32 = vpop.f32.mrf.mxu2  ;;  %v3482_v26 = vld [vmem:[%s5799_s9 + $0xa8] sm:$0xff] }
 0x600   :  { %3425 = vmatpush.msra.mxu1 %v2688_v55  ;;  %3453 = vmatpush.msra.mxu2 %v2704_v50  ;;  %v3480_v50 = vld [vmem:[%s5799_s9 + $0x98] sm:$0xff] }
 0x601   :  { %3409 = vmatpush.msrb.mxu0 %v2648_v24  ;;  %3505 = vmatpush.msra.mxu3 %v3468_v52 }
 0x602   :  { %3426 = vmatpush.msra.mxu1 %v2686_v1  ;;  %3454 = vmatpush.msra.mxu2 %v2702_v7  ;;  %v3016_v23 = vpop.f32.mrf.mxu0  ;;  %v3478_v1 = vld [vmem:[%s5799_s9 + $0x88] sm:$0xff] }
 0x603   :  { %3410 = vmatpush.msrb.mxu0 %v2646_v0  ;;  %3455 = vmatmul.f32.vlgmr.msra.gmra.mxu2 %v5642_v25  ;;  %v2678_v25 = vld [vmem:[#allocation8 + $0x1048] sm:$0xff]  ;;  %v3017_v63 = vadd.f32 %v3016_v23, %v2997_v27 }
 0x604   :  { %3427 = vmatpush.msra.mxu1 %v2684_v39  ;;  %3506 = vmatpush.msra.mxu3 %v3467_v9  ;;  %v3477_v9 = vld [vmem:[%s5799_s9 + $0x80] sm:$0xff] }
 0x605   :  { %3411 = vmatpush.msrb.mxu0 %v2644_v18  ;;  %v3545_v18 = vld [vmem:[%s5801_s11 + $0x38] sm:$0xff] }
 0x606   :  { %3428 = vmatpush.msra.mxu1 %v2682_v57  ;;  %3507 = vmatpush.msra.mxu3 %v3466_v53  ;;  %v3543_v53 = vld [vmem:[%s5801_s11 + $0x28] sm:$0xff] }
 0x607   :  { %3412 = vmatpush.msrb.mxu0 %v2642_v15  ;;  %v3136_v46 = vpop.f32.mrf.mxu2  ;;  %v3542_v15 = vld [vmem:[%s5801_s11 + $0x20] sm:$0xff] }
 0x608   :  { %3429 = vmatpush.msra.mxu1 %v2680_v59  ;;  %v3036_v3 = vpop.f32.mrf.mxu1  ;;  %3508 = vmatpush.msra.mxu3 %v3465_v13  ;;  %v3541_v59 = vld [vmem:[%s5801_s11 + $0x18] sm:$0xff] }
 0x609   :  { %3413 = vmatpush.msrb.mxu0 %v2640_v49  ;;  %v3037_v58 = vadd.f32 %v3036_v3, %v3017_v63  ;;  %v3076_v21 = vpop.f32.mrf.mxu3 }
 0x60a   :  { %3430 = vmatpush.msra.mxu1 %v2678_v25  ;;  %3509 = vmatpush.msra.mxu3 %v3464_v36 }
 0x60b   :  { %3414 = vmatpush.msrb.mxu0 %v2638_v60  ;;  %v3057_v16 = vadd.f32 %v3056_v32, %v3037_v58  ;;  %v3096_v28 = vpop.f32.mrf.mxu0 }
 0x60c   :  { %3431 = vmatpush.msra.mxu1 %v2676_v14  ;;  %3415 = vmatmul.f32.vlgmr.msrb.gmra.mxu0 %v5589_v37  ;;  %v3492_v37 = vld [vmem:[%s5799_s9 + $0xf8] sm:$0xff] }
 0x60d   :  { %v3077_v31 = vadd.f32 %v3076_v21, %v3057_v16  ;;  %3510 = vmatpush.msra.mxu3 %v3463_v17  ;;  %3517 = vmatpush.msra.mxu0 %v3492_v37 }
 0x60e   :  { %3432 = vmatpush.msra.mxu1 %v2674_v34 }
 0x60f   :  { %v3097_v12 = vadd.f32 %v3096_v28, %v3077_v31  ;;  %3511 = vmatpush.msra.mxu3 %v3462_v62  ;;  %3518 = vmatpush.msra.mxu0 %v3491_v2  ;;  %v3540_v28 = vld [vmem:[%s5801_s11 + $0x10] sm:$0xff] }
 0x610   :  { %3433 = vmatpush.msra.mxu1 %v2672_v5 }
 0x611   :  { %v3459_v10 = vmax.f32 %v3097_v12, 0.0  ;;  %3512 = vmatpush.msra.mxu3 %v3461_v33  ;;  %3519 = vmatpush.msra.mxu0 %v3490_v11  ;;  %v3539_v33 = vld [vmem:[%s5801_s11 + $0x8] sm:$0xff] }
 0x612   :  { %3434 = vmatpush.msra.mxu1 %v2670_v4  ;;  %v3116_v44 = vpop.f32.mrf.mxu1  ;;  %v3156_v42 = vpop.f32.mrf.mxu3  ;;  %v3538_v4 = vld [vmem:[%s5801_s11] sm:$0xff]  ;;  %v3877_v12 = vld [vmem:[#allocation11] ss:$0 sm:$0xff] }
 0x613   :  { %3435 = vmatmul.f32.vlgmr.msra.gmra.mxu1 %v5621_v20  ;;  %3513 = vmatmul.f32.vlgmr.msra.gmra.mxu3 %v3459_v10  ;;  %v3488_v20 = vld [vmem:[%s5799_s9 + $0xd8] sm:$0xff]  ;;  %v3117_v47 = vadd.f32 %v3116_v44, %v2736_v40 }
 0x614   :  { %3520 = vmatpush.msra.mxu0 %v3489_v22  ;;  %3561 = vmatpush.msrb.mxu1 %v3545_v18 }
 0x615   :  { %v3137_v38 = vadd.f32 %v3136_v46, %v3117_v47 }
 0x616   :  { %3521 = vmatpush.msra.mxu0 %v3488_v20  ;;  %3562 = vmatpush.msrb.mxu1 %v3544_v35  ;;  %v3878_v20 = vld [vmem:[#allocation13] ss:$0 sm:$0xff] }
 0x617   :  { %v3157_v54 = vadd.f32 %v3156_v42, %v3137_v38 }
 0x618   :  { %3522 = vmatpush.msra.mxu0 %v3487_v43  ;;  %3563 = vmatpush.msrb.mxu1 %v3543_v53 }
 0x61a   :  { %3523 = vmatpush.msra.mxu0 %v3486_v45  ;;  %3564 = vmatpush.msrb.mxu1 %v3542_v15 }
 0x61c   :  { %3524 = vmatpush.msra.mxu0 %v3485_v8  ;;  %3565 = vmatpush.msrb.mxu1 %v3541_v59 }
 0x61e   :  { %3525 = vmatpush.msra.mxu0 %v3484_v29  ;;  %3566 = vmatpush.msrb.mxu1 %v3540_v28 }
 0x620   :  { %3526 = vmatpush.msra.mxu0 %v3483_v19  ;;  %3567 = vmatpush.msrb.mxu1 %v3539_v33 }
 0x622   :  { %3527 = vmatpush.msra.mxu0 %v3482_v26  ;;  %v3216_v24 = vpop.f32.mrf.mxu2  ;;  %3568 = vmatpush.msrb.mxu1 %v3538_v4 }
 0x624   :  { %3528 = vmatpush.msra.mxu0 %v3481_v61 }
 0x625   :  { %v3176_v41 = vpop.f32.mrf.mxu0 }
 0x626   :  { %v3177_v30 = vadd.f32 %v3176_v41, %v3157_v54  ;;  %3529 = vmatpush.msra.mxu0 %v3480_v50 }
 0x628   :  { %3530 = vmatpush.msra.mxu0 %v3479_v51 }
 0x62a   :  { %3531 = vmatpush.msra.mxu0 %v3478_v1 }
 0x62c   :  { %v3196_v48 = vpop.f32.mrf.mxu1  ;;  %v3236_v7 = vpop.f32.mrf.mxu3  ;;  %3532 = vmatpush.msra.mxu0 %v3477_v9 }
 0x62d   :  { %v3197_v55 = vadd.f32 %v3196_v48, %v3177_v30 }
 0x62f   :  { %v3217_v52 = vadd.f32 %v3216_v24, %v3197_v55 }
 0x631   :  { %v3237_v39 = vadd.f32 %v3236_v7, %v3217_v52 }
 0x644   :  { %v3296_v23 = vpop.f32.mrf.mxu2 }
 0x647   :  { %v3256_v0 = vpop.f32.mrf.mxu0 }
 0x648   :  { %v3257_v6 = vadd.f32 %v3256_v0, %v3237_v39 }
 0x64e   :  { %v3276_v56 = vpop.f32.mrf.mxu1  ;;  %v3316_v13 = vpop.f32.mrf.mxu3 }
 0x64f   :  { %v3277_v57 = vadd.f32 %v3276_v56, %v3257_v6 }
 0x651   :  { %v3297_v27 = vadd.f32 %v3296_v23, %v3277_v57 }
 0x653   :  { %v3317_v25 = vadd.f32 %v3316_v13, %v3297_v27 }
 0x666   :  { %v3376_v3 = vpop.f32.mrf.mxu2 }
 0x669   :  { %v3336_v49 = vpop.f32.mrf.mxu0 }
 0x66a   :  { %v3337_v36 = vadd.f32 %v3336_v49, %v3317_v25 }
 0x670   :  { %v3356_v63 = vpop.f32.mrf.mxu1  ;;  %v3396_v58 = vpop.f32.mrf.mxu3 }
 0x671   :  { %v3357_v60 = vadd.f32 %v3356_v63, %v3337_v36 }
 0x673   :  { %v3377_v14 = vadd.f32 %v3376_v3, %v3357_v60 }
 0x675   :  { %v3397_v17 = vadd.f32 %v3396_v58, %v3377_v14 }
 0x686   :  { %v3456_v62 = vpop.f32.mrf.mxu2 }
 0x689   :  { %v3416_v32 = vpop.f32.mrf.mxu0 }
 0x68a   :  { %v3417_v34 = vadd.f32 %v3416_v32, %v3397_v17 }
 0x690   :  { %v3436_v16 = vpop.f32.mrf.mxu1 }
 0x691   :  { %v3437_v21 = vadd.f32 %v3436_v16, %v3417_v34 }
 0x693   :  { %v3457_v5 = vadd.f32 %v3456_v62, %v3437_v21 }
 0x695   :  { %v3460_v31 = vmax.f32 %v3457_v5, 0.0 }
 0x696   :  { %v3514_v10 = vpop.f32.mrf.mxu3 }
 0x697   :  { %3533 = vmatmul.f32.vlgmr.msra.gmra.mxu0 %v3460_v31  ;;  %v3515_v37 = vadd.f32 %v3877_v12, %v3514_v10 }
 0x714   :  { %v3534_v2 = vpop.f32.mrf.mxu0 }
 0x715   :  { %v3535_v11 = vadd.f32 %v3534_v2, %v3515_v37 }
 0x717   :  { %v3537_v22 = vmax.f32 %v3535_v11, 0.0 }
 0x719   :  { %3640 = vmatmul.msk.f32.vlgmr.msrb.gmra.mxu1 %vm994_vm0, %v3537_v22 }
 0x796   :  { %v3570_v40 = vpop.f32.mrf.mxu1 }
 0x797   :  { %v3571_v43 = vadd.f32 %v3878_v20, %v3570_v40 }
 0x799   :  { %3574 = vst.msk [vmem:[#allocation14] sm:$0x3] %vm3573_vm5, %v3571_v43 }
 0x79a   :  { %3585 = dma.vmem_to_hbm [thread:$0]  %s3581_s5, 32, %s3583_s20, [#allocation4]  }
 0x79b   :  { %4079 = dma.done.wait [#allocation4], 32  }
 0x79c   :  { %4080 = vsyncadd [#allocation4], 4294967264 }
 0x79d   :  { %3590 = vsyncpa [#allocation3], 1 }
 0x79e   :  { %3591 = vsyncpa [#allocation6], 1 }
 0x79f   :  { %3592 = vsyncpa [#allocation9], 1 }
 0x7a0   :  { %3593 = vsyncpa [#allocation12], 1 }
 0x7a1   :  { %3594 = vsyncpa [#allocation4], 1 }

</bundles_post_ra>
